<compile_context>
chip_gen: v6e
topology: v6e:2x2x1
jax: 0.10.0
libtpu: 0.0.40
codegen_flags: <defaults>
</compile_context>

<pallas_src>
import math

import jax
import jax.numpy as jnp
from jax.experimental import pallas as pl
from jax.experimental.pallas import tpu as pltpu

# ---------------- small-shape config (structure identical to the torch module) ----------
B = 2
T_IN = 48              # input feature frames
NUM_INPUTS = 16        # mel bins            (torch: 80)
CONV1_CH = 8           # conv1_channels      (torch: 32)
CONV2_CH = 8           # conv2_channels      (torch: 64)
CONV3_CH = 8           # conv3_channels      (torch: 64)
CONV_K = 3
CONV1_STRIDE, CONV2_STRIDE, CONV3_STRIDE = 1, 3, 2
POOL = 2
E = 64                 # conformer_size      (torch: 512)
NUM_LAYERS = 2         # conformer layers    (torch: 8)
NUM_HEADS = 4
FF_DIM = 64            # == conformer_size in the torch config
DW_KERNEL = 9
NUM_LABELS = 10
SUBSAMPLE = CONV1_STRIDE * CONV2_STRIDE * CONV3_STRIDE          # 6
EPS = 1e-5
F2 = NUM_INPUTS // POOL                                          # pooled freq bins (8)
FHALF = F2 * CONV1_CH                                            # 64
T2 = (T_IN - 1) // CONV2_STRIDE + 1                              # 16
T3 = (T2 - 1) // CONV3_STRIDE + 1                                # 8 (subsampled frames)
DH = E // NUM_HEADS
ATT_SCALE = 1.0 / math.sqrt(DH)
DW_PAD = (DW_KERNEL - 1) // 2
VOCAB = NUM_LABELS + 1
VOCAB_PAD = 128                                                  # lane-dense head width
NEG = -1e30
BF16 = jnp.bfloat16

assert FF_DIM == E, "per-layer bias packing below assumes hidden_dim == conformer_size"

# per-layer bias / LayerNorm vector packing indices (rows of the [L, NV, E] tensor)
(V_FF1_G, V_FF1_B, V_FF1_B1, V_FF1_B2,
 V_MH_G, V_MH_B, V_MH_BQ, V_MH_BK, V_MH_BV, V_MH_BO,
 V_CV_G, V_CV_B, V_CV_BA, V_CV_BG, V_CV_DWB, V_CV_NG, V_CV_NB, V_CV_B2,
 V_FF2_G, V_FF2_B, V_FF2_B1, V_FF2_B2,
 V_FIN_G, V_FIN_B) = range(24)
NV = 24

# frontend vector packing (rows of the [5, E] tensor)
FEV_B2, FEV_B3, FEV_LINB, FEV_LNG, FEV_LNB = range(5)


# --------------------------------- in-kernel helpers ------------------------------------
def _ln(x, g, b):
    mean = jnp.mean(x, axis=-1, keepdims=True)
    xc = x - mean
    var = jnp.mean(xc * xc, axis=-1, keepdims=True)
    return xc * jax.lax.rsqrt(var + EPS) * g + b


def _silu(x):
    return x * jax.nn.sigmoid(x)


# ----------------------------------- fused model kernel ---------------------------------
def _model_kernel(xp_ref, kb_ref, w1x_ref, b1x_ref, s2_ref, w2x_ref, s3_ref,
                  w3x_ref, flin_ref, fev_ref, vecs_ref, ff1w1_ref, ff1w2_ref,
                  inw_ref, wo_ref, pw1_ref, pw2_ref, ff2w1_ref, ff2w2_ref,
                  dww_ref, finw_ref, finb_ref, o_ref):
    """Whole eval-mode model for one batch element: VGG frontend -> conformer blocks ->
    final linear + log_softmax (vocab padded to 128 lanes)."""
    fev = fev_ref[...]

    def frow(i):
        return fev[i:i + 1, :]

    # ------------------------------ VGG frontend --------------------------------------
    xin = xp_ref[0]                                            # [T_IN+2, F] (time-padded)
    # conv1 (K,1), stride 1, SAME over time: one lane-dense matmul over time-shifted cols
    x1 = jnp.concatenate([xin[0:T_IN], xin[1:T_IN + 1], xin[2:T_IN + 2]], axis=1)
    y1 = jnp.dot(x1.astype(BF16), w1x_ref[...],
                 preferred_element_type=jnp.float32) + b1x_ref[...]
    y1 = _silu(y1)                                             # [T_IN, 2*F2*C1] = [48,128]
    # MaxPool(1,2): W1x columns were ordered [even freqs | odd freqs] at init
    pooled = jnp.maximum(y1[:, :FHALF], y1[:, FHALF:])         # [T_IN, F2*C1] = [48,64]

    # conv2 3x3, stride (3,1), SAME: stride-3 time taps gathered via a constant 0/1
    # selection matmul, freq taps folded into the expanded weight -> one K=192 matmul.
    g2 = jnp.dot(s2_ref[...], pooled.astype(BF16),
                 preferred_element_type=jnp.float32)           # [3*T2, F2*C1]
    x2 = jnp.concatenate([g2[0:T2], g2[T2:2 * T2], g2[2 * T2:3 * T2]], axis=1)
    y2 = jnp.dot(x2.astype(BF16), w2x_ref[...],
                 preferred_element_type=jnp.float32) + frow(FEV_B2)
    y2 = _silu(y2)                                             # [T2, F2*C2] = [16,64]

    # conv3 3x3, stride (2,1), SAME: same trick.
    g3 = jnp.dot(s3_ref[...], y2.astype(BF16),
                 preferred_element_type=jnp.float32)           # [3*T3, F2*C2]
    x3 = jnp.concatenate([g3[0:T3], g3[T3:2 * T3], g3[2 * T3:3 * T3]], axis=1)
    y3 = jnp.dot(x3.astype(BF16), w3x_ref[...],
                 preferred_element_type=jnp.float32) + frow(FEV_B3)
    y3 = _silu(y3)                                             # [T3, F2*C3] = [8,64]

    # flatten + linear + LayerNorm (dropout = identity in eval mode)
    lin = jnp.dot(y3.astype(BF16), flin_ref[...],
                  preferred_element_type=jnp.float32) + frow(FEV_LINB)
    x = _ln(lin, frow(FEV_LNG), frow(FEV_LNB))                 # [T3, E]

    # ------------------------------ conformer blocks -----------------------------------
    kb = kb_ref[0]                                             # [1, T3] additive key mask
    for l in range(NUM_LAYERS):
        vl = vecs_ref[l]                                       # [NV, E]

        def row(i, _vl=vl):
            return _vl[i:i + 1, :]

        # ---- feed-forward 1 (half-step residual) ----
        y = _ln(x, row(V_FF1_G), row(V_FF1_B))
        h = jnp.dot(y.astype(BF16), ff1w1_ref[l],
                    preferred_element_type=jnp.float32) + row(V_FF1_B1)
        h = _silu(h)
        x = x + 0.5 * (jnp.dot(h.astype(BF16), ff1w2_ref[l],
                               preferred_element_type=jnp.float32) + row(V_FF1_B2))

        # ---- MHSA: LN -> fused QKV matmul -> per-head masked softmax -> one out-proj ----
        y = _ln(x, row(V_MH_G), row(V_MH_B))
        qkv = jnp.dot(y.astype(BF16), inw_ref[l],
                      preferred_element_type=jnp.float32)      # [T3, 3E]
        q = qkv[:, 0:E] + row(V_MH_BQ)
        k = qkv[:, E:2 * E] + row(V_MH_BK)
        v = qkv[:, 2 * E:3 * E] + row(V_MH_BV)
        heads = []
        for hh in range(NUM_HEADS):
            sl = slice(hh * DH, (hh + 1) * DH)
            qh = q[:, sl].astype(BF16)
            kh = k[:, sl].astype(BF16)
            vh = v[:, sl].astype(BF16)
            s = jax.lax.dot_general(qh, kh, (((1,), (1,)), ((), ())),
                                    preferred_element_type=jnp.float32)
            s = s * ATT_SCALE + kb
            s = s - jnp.max(s, axis=-1, keepdims=True)
            p = jnp.exp(s)
            p = p * pl.reciprocal(jnp.sum(p, axis=-1, keepdims=True), approx=True)
            heads.append(jnp.dot(p.astype(BF16), vh,
                                 preferred_element_type=jnp.float32))
        att = jnp.concatenate(heads, axis=1)                   # [T3, E]
        x = x + jnp.dot(att.astype(BF16), wo_ref[l],
                        preferred_element_type=jnp.float32) + row(V_MH_BO)

        # ---- convolution module ----
        y = _ln(x, row(V_CV_G), row(V_CV_B))
        ag = jnp.dot(y.astype(BF16), pw1_ref[l],
                     preferred_element_type=jnp.float32)       # pointwise_conv1, [T3, 2E]
        a = ag[:, 0:E] + row(V_CV_BA)
        g = ag[:, E:2 * E] + row(V_CV_BG)
        z = a * jax.nn.sigmoid(g)                              # GLU
        zp = jnp.concatenate([jnp.zeros((DW_PAD, E), jnp.float32), z,
                              jnp.zeros((DW_PAD, E), jnp.float32)], axis=0)
        dwl = dww_ref[l]                                       # [DW_KERNEL, E]
        acc = jnp.zeros((T3, E), jnp.float32)
        for kk in range(DW_KERNEL):                            # depthwise conv over time
            acc = acc + zp[kk:kk + T3, :] * dwl[kk:kk + 1, :]
        acc = acc + row(V_CV_DWB)
        h = _ln(acc, row(V_CV_NG), row(V_CV_NB))               # LayerNormNC over channels
        h = _silu(h)
        x = x + jnp.dot(h.astype(BF16), pw2_ref[l],
                        preferred_element_type=jnp.float32) + row(V_CV_B2)

        # ---- feed-forward 2 (half-step residual) + block-final LayerNorm ----
        y = _ln(x, row(V_FF2_G), row(V_FF2_B))
        h = jnp.dot(y.astype(BF16), ff2w1_ref[l],
                    preferred_element_type=jnp.float32) + row(V_FF2_B1)
        h = _silu(h)
        x = x + 0.5 * (jnp.dot(h.astype(BF16), ff2w2_ref[l],
                               preferred_element_type=jnp.float32) + row(V_FF2_B2))
        x = _ln(x, row(V_FIN_G), row(V_FIN_B))

    # --------------------- final linear + exact log_softmax (padded vocab) -------------
    logits = jnp.dot(x.astype(BF16), finw_ref[...],
                     preferred_element_type=jnp.float32) + finb_ref[...]
    m = jnp.max(logits, axis=-1, keepdims=True)
    lse = m + jnp.log(jnp.sum(jnp.exp(logits - m), axis=-1, keepdims=True))
    o_ref[0] = (logits - lse).astype(o_ref.dtype)


# ------------------------------------- mask helpers -------------------------------------
def subsample_mask(sequence_mask, factor):
    if factor == 1:
        return sequence_mask
    b, t = sequence_mask.shape
    pad = (-t) % factor
    padded = jnp.pad(sequence_mask, ((0, 0), (0, pad)), constant_values=False)
    return jnp.any(padded.reshape(b, -1, factor), axis=2)


# ---------------------------------------- forward ---------------------------------------
def model_forward(params, audio_features, audio_features_len):
    """Eval-mode Model.forward on pre-extracted log-mel features."""
    b, t, f = audio_features.shape
    mask = jnp.arange(t)[None, :] < audio_features_len[:, None]          # [B, T]
    sub_mask = subsample_mask(mask, SUBSAMPLE)                           # [B, T3]
    key_bias = jnp.where(sub_mask, 0.0, NEG)[:, None, :].astype(jnp.float32)
    xp = jnp.pad(audio_features, ((0, 0), (1, 1), (0, 0)))               # conv1 SAME pad

    def full(*shape):
        return pl.BlockSpec(shape, lambda bb: (0,) * len(shape))

    out = pl.pallas_call(
        _model_kernel,
        out_shape=jax.ShapeDtypeStruct((b, T3, VOCAB_PAD), jnp.float32),
        grid=(b,),
        in_specs=[
            pl.BlockSpec((1, t + 2, f), lambda bb: (bb, 0, 0)),          # features
            pl.BlockSpec((1, 1, T3), lambda bb: (bb, 0, 0)),             # key mask bias
            full(CONV_K * NUM_INPUTS, 2 * FHALF),                        # fe_w1x
            full(1, 2 * FHALF),                                          # fe_b1x
            full(CONV_K * T2, T_IN),                                     # fe_s2 (gather)
            full(CONV_K * FHALF, F2 * CONV2_CH),                         # fe_w2x
            full(CONV_K * T3, T2),                                       # fe_s3 (gather)
            full(CONV_K * F2 * CONV2_CH, F2 * CONV3_CH),                 # fe_w3x
            full(F2 * CONV3_CH, E),                                      # fe_linw
            full(5, E),                                                  # fe_vecs
            full(NUM_LAYERS, NV, E),                                     # per-layer vecs
            full(NUM_LAYERS, E, FF_DIM),                                 # ff1_w1
            full(NUM_LAYERS, FF_DIM, E),                                 # ff1_w2
            full(NUM_LAYERS, E, 3 * E),                                  # in_w (QKV)
            full(NUM_LAYERS, E, E),                                      # wo
            full(NUM_LAYERS, E, 2 * E),                                  # pw1_w
            full(NUM_LAYERS, E, E),                                      # pw2_w
            full(NUM_LAYERS, E, FF_DIM),                                 # ff2_w1
            full(NUM_LAYERS, FF_DIM, E),                                 # ff2_w2
            full(NUM_LAYERS, DW_KERNEL, E),                              # dw_w
            full(E, VOCAB_PAD),                                          # fin_w
            full(1, VOCAB_PAD),                                          # fin_b
        ],
        out_specs=pl.BlockSpec((1, T3, VOCAB_PAD), lambda bb: (bb, 0, 0)),
        compiler_params=pltpu.CompilerParams(dimension_semantics=("parallel",)),
    )(xp, key_bias, params["fe_w1x"], params["fe_b1x"], params["fe_s2"],
      params["fe_w2x"], params["fe_s3"], params["fe_w3x"], params["fe_linw"],
      params["fe_vecs"], params["vecs"], params["ff1_w1"], params["ff1_w2"],
      params["in_w"], params["wo"], params["pw1_w"], params["pw2_w"],
      params["ff2_w1"], params["ff2_w2"], params["dw_w"],
      params["fin_w"], params["fin_b"])

    log_probs = out[:, :, :VOCAB]
    out_len = jnp.sum(sub_mask.astype(jnp.int32), axis=1)
    return log_probs, out_len


# ----------------------------------- parameter init -------------------------------------
def init_params(key):
    ks = iter(jax.random.split(key, 64))

    def xav(shape, fan_in, fan_out):
        limit = math.sqrt(6.0 / (fan_in + fan_out))
        return jax.random.uniform(next(ks), shape, jnp.float32, -limit, limit)

    def zeros(shape):
        return jnp.zeros(shape, jnp.float32)

    def ones(shape):
        return jnp.ones(shape, jnp.float32)

    # ------------- frontend: raw conv weights, then lane-dense expansions --------------
    w1 = xav((CONV_K, CONV1_CH), CONV_K, CONV_K * CONV1_CH)
    b1 = zeros((CONV1_CH,))
    w2 = xav((CONV_K, CONV_K, CONV1_CH, CONV2_CH), CONV_K * CONV_K * CONV1_CH, CONV2_CH)
    b2 = zeros((CONV2_CH,))
    w3 = xav((CONV_K, CONV_K, CONV2_CH, CONV3_CH), CONV_K * CONV_K * CONV2_CH, CONV3_CH)
    b3 = zeros((CONV3_CH,))
    # linear-in features ordered (freq, channel); permute rows when porting torch weights
    lin_w = xav((F2 * CONV3_CH, E), F2 * CONV3_CH, E)
    lin_b = zeros((E,))

    # conv1 (K,1) expanded to [3*F, 2*F2*C1]; output cols ordered [even freqs | odd freqs]
    w1x = jnp.zeros((CONV_K * NUM_INPUTS, 2 * FHALF), jnp.float32)
    for k in range(CONV_K):
        for f_ in range(NUM_INPUTS):
            col = (f_ % POOL) * FHALF + (f_ // POOL) * CONV1_CH
            w1x = w1x.at[k * NUM_INPUTS + f_, col:col + CONV1_CH].set(w1[k])
    b1x = jnp.tile(b1, 2 * F2)[None, :]

    def expand_33(w, cin, cout):
        """3x3 conv (stride over time handled separately) as a [3*F2*cin, F2*cout] matrix."""
        wx = jnp.zeros((CONV_K * F2 * cin, F2 * cout), jnp.float32)
        for i in range(CONV_K):
            for j in range(CONV_K):
                for fo in range(F2):
                    fi = fo - 1 + j
                    if 0 <= fi < F2:
                        r0 = i * F2 * cin + fi * cin
                        wx = wx.at[r0:r0 + cin, fo * cout:(fo + 1) * cout].set(w[i, j])
        return wx

    w2x = expand_33(w2, CONV1_CH, CONV2_CH)
    w3x = expand_33(w3, CONV2_CH, CONV3_CH)

    def select_mat(t_out, t_in, stride):
        """0/1 matrix gathering the 3 strided time taps (SAME padding) of a conv layer."""
        s = jnp.zeros((CONV_K * t_out, t_in), jnp.float32)
        for i in range(CONV_K):
            for t in range(t_out):
                r = stride * t + i - 1
                if 0 <= r < t_in:
                    s = s.at[i * t_out + t, r].set(1.0)
        return s

    fe_s2 = select_mat(T2, T_IN, CONV2_STRIDE)
    fe_s3 = select_mat(T3, T2, CONV3_STRIDE)

    fe_vecs = jnp.stack([jnp.tile(b2, F2), jnp.tile(b3, F2), lin_b,
                         ones((E,)), zeros((E,))])

    # ------------------------------- conformer blocks ----------------------------------
    vecs = []
    m_ff1w1, m_ff1w2, m_inw, m_wo = [], [], [], []
    m_pw1, m_pw2, m_ff2w1, m_ff2w2, m_dw = [], [], [], [], []
    for _ in range(NUM_LAYERS):
        f1w1 = xav((E, FF_DIM), E, FF_DIM); f1b1 = zeros((FF_DIM,))
        f1w2 = xav((FF_DIM, E), FF_DIM, E); f1b2 = zeros((E,))
        w_in = xav((E, 3 * E), E, 3 * E);   b_in = zeros((3 * E,))
        w_o = xav((E, E), E, E);            b_o = zeros((E,))
        p1w = xav((E, 2 * E), E, 2 * E);    p1b = zeros((2 * E,))
        dw = xav((DW_KERNEL, E), DW_KERNEL, DW_KERNEL)
        dwb = zeros((E,))
        p2w = xav((E, E), E, E);            p2b = zeros((E,))
        f2w1 = xav((E, FF_DIM), E, FF_DIM); f2b1 = zeros((FF_DIM,))
        f2w2 = xav((FF_DIM, E), FF_DIM, E); f2b2 = zeros((E,))
        vecs.append(jnp.stack([
            ones((E,)), zeros((E,)), f1b1, f1b2,
            ones((E,)), zeros((E,)), b_in[:E], b_in[E:2 * E], b_in[2 * E:], b_o,
            ones((E,)), zeros((E,)), p1b[:E], p1b[E:], dwb, ones((E,)), zeros((E,)), p2b,
            ones((E,)), zeros((E,)), f2b1, f2b2,
            ones((E,)), zeros((E,)),
        ]))
        m_ff1w1.append(f1w1); m_ff1w2.append(f1w2)
        m_inw.append(w_in);   m_wo.append(w_o)
        m_pw1.append(p1w);    m_pw2.append(p2w)
        m_ff2w1.append(f2w1); m_ff2w2.append(f2w2)
        m_dw.append(dw)

    # ------------------------- final linear (vocab padded to 128) ----------------------
    fw = xav((E, VOCAB), E, VOCAB)
    fin_w = jnp.zeros((E, VOCAB_PAD), jnp.float32).at[:, :VOCAB].set(fw)
    fin_b = jnp.full((1, VOCAB_PAD), -1e9, jnp.float32).at[:, :VOCAB].set(0.0)

    stk = jnp.stack
    return dict(
        fe_w1x=w1x.astype(BF16), fe_b1x=b1x,
        fe_s2=fe_s2.astype(BF16), fe_w2x=w2x.astype(BF16),
        fe_s3=fe_s3.astype(BF16), fe_w3x=w3x.astype(BF16),
        fe_linw=lin_w.astype(BF16), fe_vecs=fe_vecs,
        vecs=stk(vecs),
        ff1_w1=stk(m_ff1w1).astype(BF16), ff1_w2=stk(m_ff1w2).astype(BF16),
        in_w=stk(m_inw).astype(BF16), wo=stk(m_wo).astype(BF16),
        pw1_w=stk(m_pw1).astype(BF16), pw2_w=stk(m_pw2).astype(BF16),
        ff2_w1=stk(m_ff2w1).astype(BF16), ff2_w2=stk(m_ff2w2).astype(BF16),
        dw_w=stk(m_dw),
        fin_w=fin_w.astype(BF16), fin_b=fin_b,
    )


# ---------------------------------------- main -------------------------------------------
if __name__ == "__main__":
    root = jax.random.PRNGKey(0)
    pkey, dkey = jax.random.split(root)
    params = init_params(pkey)

    # log-mel features [B, T, num_inputs] and their lengths [B]
    audio_features = jax.random.normal(dkey, (B, T_IN, NUM_INPUTS), jnp.float32)
    audio_features_len = jnp.array([T_IN, T_IN - 12], dtype=jnp.int32)

    fwd = jax.jit(model_forward)
    log_probs, out_lens = fwd(params, audio_features, audio_features_len)
    jax.block_until_ready((log_probs, out_lens))

    # sanity checks
    assert log_probs.shape == (B, T3, VOCAB), log_probs.shape
    assert bool(jnp.all(jnp.isfinite(log_probs)))
    assert bool(jnp.allclose(jnp.exp(log_probs).sum(-1), 1.0, atol=1e-3))
    assert out_lens.shape == (B,)
    assert int(out_lens[0]) == T3
    assert int(out_lens[1]) == (T_IN - 12 + SUBSAMPLE - 1) // SUBSAMPLE

    print("KERNEL_OK")
</pallas_src>

<mosaic_0001>
module attributes {stable_mosaic.version = 11 : i64} {
  func.func @_model_kernel(%arg0: i32, %arg1: memref<1x50x16xf32, #tpu.memory_space<vmem>>, %arg2: memref<1x1x8xf32, #tpu.memory_space<vmem>>, %arg3: memref<48x128xbf16, #tpu.memory_space<vmem>>, %arg4: memref<1x128xf32, #tpu.memory_space<vmem>>, %arg5: memref<48x48xbf16, #tpu.memory_space<vmem>>, %arg6: memref<192x64xbf16, #tpu.memory_space<vmem>>, %arg7: memref<24x16xbf16, #tpu.memory_space<vmem>>, %arg8: memref<192x64xbf16, #tpu.memory_space<vmem>>, %arg9: memref<64x64xbf16, #tpu.memory_space<vmem>>, %arg10: memref<5x64xf32, #tpu.memory_space<vmem>>, %arg11: memref<2x24x64xf32, #tpu.memory_space<vmem>>, %arg12: memref<2x64x64xbf16, #tpu.memory_space<vmem>>, %arg13: memref<2x64x64xbf16, #tpu.memory_space<vmem>>, %arg14: memref<2x64x192xbf16, #tpu.memory_space<vmem>>, %arg15: memref<2x64x64xbf16, #tpu.memory_space<vmem>>, %arg16: memref<2x64x128xbf16, #tpu.memory_space<vmem>>, %arg17: memref<2x64x64xbf16, #tpu.memory_space<vmem>>, %arg18: memref<2x64x64xbf16, #tpu.memory_space<vmem>>, %arg19: memref<2x64x64xbf16, #tpu.memory_space<vmem>>, %arg20: memref<2x9x64xf32, #tpu.memory_space<vmem>>, %arg21: memref<64x128xbf16, #tpu.memory_space<vmem>>, %arg22: memref<1x128xf32, #tpu.memory_space<vmem>>, %arg23: memref<1x8x128xf32, #tpu.memory_space<vmem>>) attributes {dimension_semantics = [#tpu.dimension_semantics<parallel>], iteration_bounds = array<i64: 2>, scalar_prefetch = 0 : i64, scratch_operands = 0 : i64, tpu.core_type = #tpu.core_type<tc>, window_params = [{transform_indices = @transform_0, window_bounds = array<i64: 1, 50, 16>}, {transform_indices = @transform_1, window_bounds = array<i64: 1, 1, 8>}, {pipeline_mode = #tpu.pipeline_mode<synchronous>, transform_indices = @transform_2, window_bounds = array<i64: 48, 128>}, {pipeline_mode = #tpu.pipeline_mode<synchronous>, transform_indices = @transform_3, window_bounds = array<i64: 1, 128>}, {pipeline_mode = #tpu.pipeline_mode<synchronous>, transform_indices = @transform_4, window_bounds = array<i64: 48, 48>}, {pipeline_mode = #tpu.pipeline_mode<synchronous>, transform_indices = @transform_5, window_bounds = array<i64: 192, 64>}, {pipeline_mode = #tpu.pipeline_mode<synchronous>, transform_indices = @transform_6, window_bounds = array<i64: 24, 16>}, {pipeline_mode = #tpu.pipeline_mode<synchronous>, transform_indices = @transform_7, window_bounds = array<i64: 192, 64>}, {pipeline_mode = #tpu.pipeline_mode<synchronous>, transform_indices = @transform_8, window_bounds = array<i64: 64, 64>}, {pipeline_mode = #tpu.pipeline_mode<synchronous>, transform_indices = @transform_9, window_bounds = array<i64: 5, 64>}, {pipeline_mode = #tpu.pipeline_mode<synchronous>, transform_indices = @transform_10, window_bounds = array<i64: 2, 24, 64>}, {pipeline_mode = #tpu.pipeline_mode<synchronous>, transform_indices = @transform_11, window_bounds = array<i64: 2, 64, 64>}, {pipeline_mode = #tpu.pipeline_mode<synchronous>, transform_indices = @transform_12, window_bounds = array<i64: 2, 64, 64>}, {pipeline_mode = #tpu.pipeline_mode<synchronous>, transform_indices = @transform_13, window_bounds = array<i64: 2, 64, 192>}, {pipeline_mode = #tpu.pipeline_mode<synchronous>, transform_indices = @transform_14, window_bounds = array<i64: 2, 64, 64>}, {pipeline_mode = #tpu.pipeline_mode<synchronous>, transform_indices = @transform_15, window_bounds = array<i64: 2, 64, 128>}, {pipeline_mode = #tpu.pipeline_mode<synchronous>, transform_indices = @transform_16, window_bounds = array<i64: 2, 64, 64>}, {pipeline_mode = #tpu.pipeline_mode<synchronous>, transform_indices = @transform_17, window_bounds = array<i64: 2, 64, 64>}, {pipeline_mode = #tpu.pipeline_mode<synchronous>, transform_indices = @transform_18, window_bounds = array<i64: 2, 64, 64>}, {pipeline_mode = #tpu.pipeline_mode<synchronous>, transform_indices = @transform_19, window_bounds = array<i64: 2, 9, 64>}, {pipeline_mode = #tpu.pipeline_mode<synchronous>, transform_indices = @transform_20, window_bounds = array<i64: 64, 128>}, {pipeline_mode = #tpu.pipeline_mode<synchronous>, transform_indices = @transform_21, window_bounds = array<i64: 1, 128>}, {transform_indices = @transform_22, window_bounds = array<i64: 1, 8, 128>}]} {
    %c0 = arith.constant 0 : index
    %c0_0 = arith.constant 0 : index
    %0 = vector.load %arg10[%c0, %c0_0] : memref<5x64xf32, #tpu.memory_space<vmem>>, vector<5x64xf32>
    %c0_1 = arith.constant 0 : index
    %c0_2 = arith.constant 0 : index
    %c0_3 = arith.constant 0 : index
    %1 = vector.load %arg1[%c0_1, %c0_2, %c0_3] : memref<1x50x16xf32, #tpu.memory_space<vmem>>, vector<1x50x16xf32>
    %2 = vector.shape_cast %1 : vector<1x50x16xf32> to vector<50x16xf32>
    %3 = vector.extract_strided_slice %2 {offsets = [0, 0], sizes = [48, 16], strides = [1, 1]} : vector<50x16xf32> to vector<48x16xf32>
    %4 = vector.extract_strided_slice %2 {offsets = [1, 0], sizes = [48, 16], strides = [1, 1]} : vector<50x16xf32> to vector<48x16xf32>
    %5 = vector.extract_strided_slice %2 {offsets = [2, 0], sizes = [48, 16], strides = [1, 1]} : vector<50x16xf32> to vector<48x16xf32>
    %6 = tpu.concatenate %3, %4, %5 in 1 : vector<48x16xf32>, vector<48x16xf32>, vector<48x16xf32> -> vector<48x48xf32>
    %7 = arith.truncf %6 : vector<48x48xf32> to vector<48x48xbf16>
    %c0_4 = arith.constant 0 : index
    %c0_5 = arith.constant 0 : index
    %8 = vector.load %arg3[%c0_4, %c0_5] : memref<48x128xbf16, #tpu.memory_space<vmem>>, vector<48x128xbf16>
    %cst = arith.constant dense<0.000000e+00> : vector<48x128xf32>
    %9 = tpu.matmul %7, %8, %cst {dimension_numbers = #tpu.dot_dimension_numbers<[1], [0], [0], [1], [0, 0, 1, 1], [], []>} : vector<48x48xbf16>, vector<48x128xbf16>, vector<48x128xf32> -> vector<48x128xf32>
    %c0_6 = arith.constant 0 : index
    %c0_7 = arith.constant 0 : index
    %10 = vector.load %arg4[%c0_6, %c0_7] : memref<1x128xf32, #tpu.memory_space<vmem>>, vector<1x128xf32>
    %11 = vector.broadcast %10 : vector<1x128xf32> to vector<48x128xf32>
    %12 = arith.addf %9, %11 : vector<48x128xf32>
    %13 = arith.negf %12 : vector<48x128xf32>
    %14 = math.exp %13 : vector<48x128xf32>
    %cst_8 = arith.constant 1.000000e+00 : f32
    %15 = vector.broadcast %cst_8 : f32 to vector<48x128xf32>
    %16 = arith.addf %15, %14 : vector<48x128xf32>
    %17 = arith.divf %15, %16 : vector<48x128xf32>
    %18 = arith.mulf %12, %17 : vector<48x128xf32>
    %19 = vector.extract_strided_slice %18 {offsets = [0, 0], sizes = [48, 64], strides = [1, 1]} : vector<48x128xf32> to vector<48x64xf32>
    %20 = vector.extract_strided_slice %18 {offsets = [0, 64], sizes = [48, 64], strides = [1, 1]} : vector<48x128xf32> to vector<48x64xf32>
    %21 = arith.maximumf %19, %20 : vector<48x64xf32>
    %c0_9 = arith.constant 0 : index
    %c0_10 = arith.constant 0 : index
    %22 = vector.load %arg5[%c0_9, %c0_10] : memref<48x48xbf16, #tpu.memory_space<vmem>>, vector<48x48xbf16>
    %23 = arith.truncf %21 : vector<48x64xf32> to vector<48x64xbf16>
    %cst_11 = arith.constant dense<0.000000e+00> : vector<48x64xf32>
    %24 = tpu.matmul %22, %23, %cst_11 {dimension_numbers = #tpu.dot_dimension_numbers<[1], [0], [0], [1], [0, 0, 1, 1], [], []>} : vector<48x48xbf16>, vector<48x64xbf16>, vector<48x64xf32> -> vector<48x64xf32>
    %25 = vector.extract_strided_slice %24 {offsets = [0, 0], sizes = [16, 64], strides = [1, 1]} : vector<48x64xf32> to vector<16x64xf32>
    %26 = vector.extract_strided_slice %24 {offsets = [16, 0], sizes = [16, 64], strides = [1, 1]} : vector<48x64xf32> to vector<16x64xf32>
    %27 = vector.extract_strided_slice %24 {offsets = [32, 0], sizes = [16, 64], strides = [1, 1]} : vector<48x64xf32> to vector<16x64xf32>
    %28 = tpu.concatenate %25, %26, %27 in 1 : vector<16x64xf32>, vector<16x64xf32>, vector<16x64xf32> -> vector<16x192xf32>
    %29 = arith.truncf %28 : vector<16x192xf32> to vector<16x192xbf16>
    %c0_12 = arith.constant 0 : index
    %c0_13 = arith.constant 0 : index
    %30 = vector.load %arg6[%c0_12, %c0_13] : memref<192x64xbf16, #tpu.memory_space<vmem>>, vector<192x64xbf16>
    %cst_14 = arith.constant dense<0.000000e+00> : vector<16x64xf32>
    %31 = tpu.matmul %29, %30, %cst_14 {dimension_numbers = #tpu.dot_dimension_numbers<[1], [0], [0], [1], [0, 0, 1, 1], [], []>} : vector<16x192xbf16>, vector<192x64xbf16>, vector<16x64xf32> -> vector<16x64xf32>
    %32 = vector.extract_strided_slice %0 {offsets = [0, 0], sizes = [1, 64], strides = [1, 1]} : vector<5x64xf32> to vector<1x64xf32>
    %33 = vector.broadcast %32 : vector<1x64xf32> to vector<16x64xf32>
    %34 = arith.addf %31, %33 : vector<16x64xf32>
    %35 = arith.negf %34 : vector<16x64xf32>
    %36 = math.exp %35 : vector<16x64xf32>
    %cst_15 = arith.constant 1.000000e+00 : f32
    %37 = vector.broadcast %cst_15 : f32 to vector<16x64xf32>
    %38 = arith.addf %37, %36 : vector<16x64xf32>
    %39 = arith.divf %37, %38 : vector<16x64xf32>
    %40 = arith.mulf %34, %39 : vector<16x64xf32>
    %c0_16 = arith.constant 0 : index
    %c0_17 = arith.constant 0 : index
    %41 = vector.load %arg7[%c0_16, %c0_17] : memref<24x16xbf16, #tpu.memory_space<vmem>>, vector<24x16xbf16>
    %42 = arith.truncf %40 : vector<16x64xf32> to vector<16x64xbf16>
    %cst_18 = arith.constant dense<0.000000e+00> : vector<24x64xf32>
    %43 = tpu.matmul %41, %42, %cst_18 {dimension_numbers = #tpu.dot_dimension_numbers<[1], [0], [0], [1], [0, 0, 1, 1], [], []>} : vector<24x16xbf16>, vector<16x64xbf16>, vector<24x64xf32> -> vector<24x64xf32>
    %44 = vector.extract_strided_slice %43 {offsets = [0, 0], sizes = [8, 64], strides = [1, 1]} : vector<24x64xf32> to vector<8x64xf32>
    %45 = vector.extract_strided_slice %43 {offsets = [8, 0], sizes = [8, 64], strides = [1, 1]} : vector<24x64xf32> to vector<8x64xf32>
    %46 = vector.extract_strided_slice %43 {offsets = [16, 0], sizes = [8, 64], strides = [1, 1]} : vector<24x64xf32> to vector<8x64xf32>
    %47 = tpu.concatenate %44, %45, %46 in 1 : vector<8x64xf32>, vector<8x64xf32>, vector<8x64xf32> -> vector<8x192xf32>
    %48 = arith.truncf %47 : vector<8x192xf32> to vector<8x192xbf16>
    %c0_19 = arith.constant 0 : index
    %c0_20 = arith.constant 0 : index
    %49 = vector.load %arg8[%c0_19, %c0_20] : memref<192x64xbf16, #tpu.memory_space<vmem>>, vector<192x64xbf16>
    %cst_21 = arith.constant dense<0.000000e+00> : vector<8x64xf32>
    %50 = tpu.matmul %48, %49, %cst_21 {dimension_numbers = #tpu.dot_dimension_numbers<[1], [0], [0], [1], [0, 0, 1, 1], [], []>} : vector<8x192xbf16>, vector<192x64xbf16>, vector<8x64xf32> -> vector<8x64xf32>
    %51 = vector.extract_strided_slice %0 {offsets = [1, 0], sizes = [1, 64], strides = [1, 1]} : vector<5x64xf32> to vector<1x64xf32>
    %52 = vector.broadcast %51 : vector<1x64xf32> to vector<8x64xf32>
    %53 = arith.addf %50, %52 : vector<8x64xf32>
    %54 = arith.negf %53 : vector<8x64xf32>
    %55 = math.exp %54 : vector<8x64xf32>
    %cst_22 = arith.constant 1.000000e+00 : f32
    %56 = vector.broadcast %cst_22 : f32 to vector<8x64xf32>
    %57 = arith.addf %56, %55 : vector<8x64xf32>
    %58 = arith.divf %56, %57 : vector<8x64xf32>
    %59 = arith.mulf %53, %58 : vector<8x64xf32>
    %60 = arith.truncf %59 : vector<8x64xf32> to vector<8x64xbf16>
    %c0_23 = arith.constant 0 : index
    %c0_24 = arith.constant 0 : index
    %61 = vector.load %arg9[%c0_23, %c0_24] : memref<64x64xbf16, #tpu.memory_space<vmem>>, vector<64x64xbf16>
    %cst_25 = arith.constant dense<0.000000e+00> : vector<8x64xf32>
    %62 = tpu.matmul %60, %61, %cst_25 {dimension_numbers = #tpu.dot_dimension_numbers<[1], [0], [0], [1], [0, 0, 1, 1], [], []>} : vector<8x64xbf16>, vector<64x64xbf16>, vector<8x64xf32> -> vector<8x64xf32>
    %63 = vector.extract_strided_slice %0 {offsets = [2, 0], sizes = [1, 64], strides = [1, 1]} : vector<5x64xf32> to vector<1x64xf32>
    %64 = vector.broadcast %63 : vector<1x64xf32> to vector<8x64xf32>
    %65 = arith.addf %62, %64 : vector<8x64xf32>
    %66 = vector.extract_strided_slice %0 {offsets = [3, 0], sizes = [1, 64], strides = [1, 1]} : vector<5x64xf32> to vector<1x64xf32>
    %67 = vector.extract_strided_slice %0 {offsets = [4, 0], sizes = [1, 64], strides = [1, 1]} : vector<5x64xf32> to vector<1x64xf32>
    %cst_26 = arith.constant dense<0.000000e+00> : vector<8xf32>
    %68 = vector.multi_reduction <add>, %65, %cst_26 [1] : vector<8x64xf32> to vector<8xf32>
    %69 = vector.shape_cast %68 : vector<8xf32> to vector<8x1xf32>
    %cst_27 = arith.constant 6.400000e+01 : f32
    %70 = vector.broadcast %cst_27 : f32 to vector<8x1xf32>
    %71 = arith.divf %69, %70 : vector<8x1xf32>
    %72 = vector.broadcast %71 : vector<8x1xf32> to vector<8x64xf32>
    %73 = arith.subf %65, %72 : vector<8x64xf32>
    %74 = arith.mulf %73, %73 : vector<8x64xf32>
    %cst_28 = arith.constant dense<0.000000e+00> : vector<8xf32>
    %75 = vector.multi_reduction <add>, %74, %cst_28 [1] : vector<8x64xf32> to vector<8xf32>
    %76 = vector.shape_cast %75 : vector<8xf32> to vector<8x1xf32>
    %cst_29 = arith.constant 6.400000e+01 : f32
    %77 = vector.broadcast %cst_29 : f32 to vector<8x1xf32>
    %78 = arith.divf %76, %77 : vector<8x1xf32>
    %cst_30 = arith.constant 9.99999974E-6 : f32
    %79 = vector.broadcast %cst_30 : f32 to vector<8x1xf32>
    %80 = arith.addf %78, %79 : vector<8x1xf32>
    %81 = math.rsqrt %80 : vector<8x1xf32>
    %82 = vector.broadcast %81 : vector<8x1xf32> to vector<8x64xf32>
    %83 = arith.mulf %73, %82 : vector<8x64xf32>
    %84 = vector.broadcast %66 : vector<1x64xf32> to vector<8x64xf32>
    %85 = arith.mulf %83, %84 : vector<8x64xf32>
    %86 = vector.broadcast %67 : vector<1x64xf32> to vector<8x64xf32>
    %87 = arith.addf %85, %86 : vector<8x64xf32>
    %c0_31 = arith.constant 0 : index
    %c0_32 = arith.constant 0 : index
    %c0_33 = arith.constant 0 : index
    %88 = vector.load %arg2[%c0_31, %c0_32, %c0_33] : memref<1x1x8xf32, #tpu.memory_space<vmem>>, vector<1x1x8xf32>
    %89 = vector.shape_cast %88 : vector<1x1x8xf32> to vector<1x8xf32>
    %c0_34 = arith.constant 0 : index
    %c0_35 = arith.constant 0 : index
    %c0_36 = arith.constant 0 : index
    %90 = vector.load %arg11[%c0_34, %c0_35, %c0_36] : memref<2x24x64xf32, #tpu.memory_space<vmem>>, vector<1x24x64xf32>
    %91 = vector.shape_cast %90 : vector<1x24x64xf32> to vector<24x64xf32>
    %92 = vector.extract_strided_slice %91 {offsets = [0, 0], sizes = [1, 64], strides = [1, 1]} : vector<24x64xf32> to vector<1x64xf32>
    %93 = vector.extract_strided_slice %91 {offsets = [1, 0], sizes = [1, 64], strides = [1, 1]} : vector<24x64xf32> to vector<1x64xf32>
    %cst_37 = arith.constant dense<0.000000e+00> : vector<8xf32>
    %94 = vector.multi_reduction <add>, %87, %cst_37 [1] : vector<8x64xf32> to vector<8xf32>
    %95 = vector.shape_cast %94 : vector<8xf32> to vector<8x1xf32>
    %cst_38 = arith.constant 6.400000e+01 : f32
    %96 = vector.broadcast %cst_38 : f32 to vector<8x1xf32>
    %97 = arith.divf %95, %96 : vector<8x1xf32>
    %98 = vector.broadcast %97 : vector<8x1xf32> to vector<8x64xf32>
    %99 = arith.subf %87, %98 : vector<8x64xf32>
    %100 = arith.mulf %99, %99 : vector<8x64xf32>
    %cst_39 = arith.constant dense<0.000000e+00> : vector<8xf32>
    %101 = vector.multi_reduction <add>, %100, %cst_39 [1] : vector<8x64xf32> to vector<8xf32>
    %102 = vector.shape_cast %101 : vector<8xf32> to vector<8x1xf32>
    %cst_40 = arith.constant 6.400000e+01 : f32
    %103 = vector.broadcast %cst_40 : f32 to vector<8x1xf32>
    %104 = arith.divf %102, %103 : vector<8x1xf32>
    %cst_41 = arith.constant 9.99999974E-6 : f32
    %105 = vector.broadcast %cst_41 : f32 to vector<8x1xf32>
    %106 = arith.addf %104, %105 : vector<8x1xf32>
    %107 = math.rsqrt %106 : vector<8x1xf32>
    %108 = vector.broadcast %107 : vector<8x1xf32> to vector<8x64xf32>
    %109 = arith.mulf %99, %108 : vector<8x64xf32>
    %110 = vector.broadcast %92 : vector<1x64xf32> to vector<8x64xf32>
    %111 = arith.mulf %109, %110 : vector<8x64xf32>
    %112 = vector.broadcast %93 : vector<1x64xf32> to vector<8x64xf32>
    %113 = arith.addf %111, %112 : vector<8x64xf32>
    %114 = arith.truncf %113 : vector<8x64xf32> to vector<8x64xbf16>
    %c0_42 = arith.constant 0 : index
    %c0_43 = arith.constant 0 : index
    %c0_44 = arith.constant 0 : index
    %115 = vector.load %arg12[%c0_42, %c0_43, %c0_44] : memref<2x64x64xbf16, #tpu.memory_space<vmem>>, vector<1x64x64xbf16>
    %116 = vector.shape_cast %115 : vector<1x64x64xbf16> to vector<64x64xbf16>
    %cst_45 = arith.constant dense<0.000000e+00> : vector<8x64xf32>
    %117 = tpu.matmul %114, %116, %cst_45 {dimension_numbers = #tpu.dot_dimension_numbers<[1], [0], [0], [1], [0, 0, 1, 1], [], []>} : vector<8x64xbf16>, vector<64x64xbf16>, vector<8x64xf32> -> vector<8x64xf32>
    %118 = vector.extract_strided_slice %91 {offsets = [2, 0], sizes = [1, 64], strides = [1, 1]} : vector<24x64xf32> to vector<1x64xf32>
    %119 = vector.broadcast %118 : vector<1x64xf32> to vector<8x64xf32>
    %120 = arith.addf %117, %119 : vector<8x64xf32>
    %121 = arith.negf %120 : vector<8x64xf32>
    %122 = math.exp %121 : vector<8x64xf32>
    %cst_46 = arith.constant 1.000000e+00 : f32
    %123 = vector.broadcast %cst_46 : f32 to vector<8x64xf32>
    %124 = arith.addf %123, %122 : vector<8x64xf32>
    %125 = arith.divf %123, %124 : vector<8x64xf32>
    %126 = arith.mulf %120, %125 : vector<8x64xf32>
    %127 = arith.truncf %126 : vector<8x64xf32> to vector<8x64xbf16>
    %c0_47 = arith.constant 0 : index
    %c0_48 = arith.constant 0 : index
    %c0_49 = arith.constant 0 : index
    %128 = vector.load %arg13[%c0_47, %c0_48, %c0_49] : memref<2x64x64xbf16, #tpu.memory_space<vmem>>, vector<1x64x64xbf16>
    %129 = vector.shape_cast %128 : vector<1x64x64xbf16> to vector<64x64xbf16>
    %cst_50 = arith.constant dense<0.000000e+00> : vector<8x64xf32>
    %130 = tpu.matmul %127, %129, %cst_50 {dimension_numbers = #tpu.dot_dimension_numbers<[1], [0], [0], [1], [0, 0, 1, 1], [], []>} : vector<8x64xbf16>, vector<64x64xbf16>, vector<8x64xf32> -> vector<8x64xf32>
    %131 = vector.extract_strided_slice %91 {offsets = [3, 0], sizes = [1, 64], strides = [1, 1]} : vector<24x64xf32> to vector<1x64xf32>
    %132 = vector.broadcast %131 : vector<1x64xf32> to vector<8x64xf32>
    %133 = arith.addf %130, %132 : vector<8x64xf32>
    %cst_51 = arith.constant 5.000000e-01 : f32
    %134 = vector.broadcast %cst_51 : f32 to vector<8x64xf32>
    %135 = arith.mulf %134, %133 : vector<8x64xf32>
    %136 = arith.addf %87, %135 : vector<8x64xf32>
    %137 = vector.extract_strided_slice %91 {offsets = [4, 0], sizes = [1, 64], strides = [1, 1]} : vector<24x64xf32> to vector<1x64xf32>
    %138 = vector.extract_strided_slice %91 {offsets = [5, 0], sizes = [1, 64], strides = [1, 1]} : vector<24x64xf32> to vector<1x64xf32>
    %cst_52 = arith.constant dense<0.000000e+00> : vector<8xf32>
    %139 = vector.multi_reduction <add>, %136, %cst_52 [1] : vector<8x64xf32> to vector<8xf32>
    %140 = vector.shape_cast %139 : vector<8xf32> to vector<8x1xf32>
    %cst_53 = arith.constant 6.400000e+01 : f32
    %141 = vector.broadcast %cst_53 : f32 to vector<8x1xf32>
    %142 = arith.divf %140, %141 : vector<8x1xf32>
    %143 = vector.broadcast %142 : vector<8x1xf32> to vector<8x64xf32>
    %144 = arith.subf %136, %143 : vector<8x64xf32>
    %145 = arith.mulf %144, %144 : vector<8x64xf32>
    %cst_54 = arith.constant dense<0.000000e+00> : vector<8xf32>
    %146 = vector.multi_reduction <add>, %145, %cst_54 [1] : vector<8x64xf32> to vector<8xf32>
    %147 = vector.shape_cast %146 : vector<8xf32> to vector<8x1xf32>
    %cst_55 = arith.constant 6.400000e+01 : f32
    %148 = vector.broadcast %cst_55 : f32 to vector<8x1xf32>
    %149 = arith.divf %147, %148 : vector<8x1xf32>
    %cst_56 = arith.constant 9.99999974E-6 : f32
    %150 = vector.broadcast %cst_56 : f32 to vector<8x1xf32>
    %151 = arith.addf %149, %150 : vector<8x1xf32>
    %152 = math.rsqrt %151 : vector<8x1xf32>
    %153 = vector.broadcast %152 : vector<8x1xf32> to vector<8x64xf32>
    %154 = arith.mulf %144, %153 : vector<8x64xf32>
    %155 = vector.broadcast %137 : vector<1x64xf32> to vector<8x64xf32>
    %156 = arith.mulf %154, %155 : vector<8x64xf32>
    %157 = vector.broadcast %138 : vector<1x64xf32> to vector<8x64xf32>
    %158 = arith.addf %156, %157 : vector<8x64xf32>
    %159 = arith.truncf %158 : vector<8x64xf32> to vector<8x64xbf16>
    %c0_57 = arith.constant 0 : index
    %c0_58 = arith.constant 0 : index
    %c0_59 = arith.constant 0 : index
    %160 = vector.load %arg14[%c0_57, %c0_58, %c0_59] : memref<2x64x192xbf16, #tpu.memory_space<vmem>>, vector<1x64x192xbf16>
    %161 = vector.shape_cast %160 : vector<1x64x192xbf16> to vector<64x192xbf16>
    %cst_60 = arith.constant dense<0.000000e+00> : vector<8x192xf32>
    %162 = tpu.matmul %159, %161, %cst_60 {dimension_numbers = #tpu.dot_dimension_numbers<[1], [0], [0], [1], [0, 0, 1, 1], [], []>} : vector<8x64xbf16>, vector<64x192xbf16>, vector<8x192xf32> -> vector<8x192xf32>
    %163 = vector.extract_strided_slice %162 {offsets = [0, 0], sizes = [8, 64], strides = [1, 1]} : vector<8x192xf32> to vector<8x64xf32>
    %164 = vector.extract_strided_slice %91 {offsets = [6, 0], sizes = [1, 64], strides = [1, 1]} : vector<24x64xf32> to vector<1x64xf32>
    %165 = vector.broadcast %164 : vector<1x64xf32> to vector<8x64xf32>
    %166 = arith.addf %163, %165 : vector<8x64xf32>
    %167 = vector.extract_strided_slice %162 {offsets = [0, 64], sizes = [8, 64], strides = [1, 1]} : vector<8x192xf32> to vector<8x64xf32>
    %168 = vector.extract_strided_slice %91 {offsets = [7, 0], sizes = [1, 64], strides = [1, 1]} : vector<24x64xf32> to vector<1x64xf32>
    %169 = vector.broadcast %168 : vector<1x64xf32> to vector<8x64xf32>
    %170 = arith.addf %167, %169 : vector<8x64xf32>
    %171 = vector.extract_strided_slice %162 {offsets = [0, 128], sizes = [8, 64], strides = [1, 1]} : vector<8x192xf32> to vector<8x64xf32>
    %172 = vector.extract_strided_slice %91 {offsets = [8, 0], sizes = [1, 64], strides = [1, 1]} : vector<24x64xf32> to vector<1x64xf32>
    %173 = vector.broadcast %172 : vector<1x64xf32> to vector<8x64xf32>
    %174 = arith.addf %171, %173 : vector<8x64xf32>
    %175 = vector.extract_strided_slice %166 {offsets = [0, 0], sizes = [8, 16], strides = [1, 1]} : vector<8x64xf32> to vector<8x16xf32>
    %176 = arith.truncf %175 : vector<8x16xf32> to vector<8x16xbf16>
    %177 = vector.extract_strided_slice %170 {offsets = [0, 0], sizes = [8, 16], strides = [1, 1]} : vector<8x64xf32> to vector<8x16xf32>
    %178 = arith.truncf %177 : vector<8x16xf32> to vector<8x16xbf16>
    %179 = vector.extract_strided_slice %174 {offsets = [0, 0], sizes = [8, 16], strides = [1, 1]} : vector<8x64xf32> to vector<8x16xf32>
    %180 = arith.truncf %179 : vector<8x16xf32> to vector<8x16xbf16>
    %cst_61 = arith.constant dense<0.000000e+00> : vector<8x8xf32>
    %181 = tpu.matmul %176, %178, %cst_61 {dimension_numbers = #tpu.dot_dimension_numbers<[1], [1], [0], [0], [0, 0, 1, 0], [], []>} : vector<8x16xbf16>, vector<8x16xbf16>, vector<8x8xf32> -> vector<8x8xf32>
    %cst_62 = arith.constant 2.500000e-01 : f32
    %182 = vector.broadcast %cst_62 : f32 to vector<8x8xf32>
    %183 = arith.mulf %181, %182 : vector<8x8xf32>
    %184 = vector.broadcast %89 : vector<1x8xf32> to vector<8x8xf32>
    %185 = arith.addf %183, %184 : vector<8x8xf32>
    %cst_63 = arith.constant dense<0xFF800000> : vector<8xf32>
    %186 = vector.multi_reduction <maximumf>, %185, %cst_63 [1] : vector<8x8xf32> to vector<8xf32>
    %187 = vector.shape_cast %186 : vector<8xf32> to vector<8x1xf32>
    %188 = vector.broadcast %187 : vector<8x1xf32> to vector<8x8xf32>
    %189 = arith.subf %185, %188 : vector<8x8xf32>
    %190 = math.exp %189 : vector<8x8xf32>
    %cst_64 = arith.constant dense<0.000000e+00> : vector<8xf32>
    %191 = vector.multi_reduction <add>, %190, %cst_64 [1] : vector<8x8xf32> to vector<8xf32>
    %192 = vector.shape_cast %191 : vector<8xf32> to vector<8x1xf32>
    %193 = tpu.reciprocal %192 {approx = true} : vector<8x1xf32> -> vector<8x1xf32>
    %194 = vector.broadcast %193 : vector<8x1xf32> to vector<8x8xf32>
    %195 = arith.mulf %190, %194 : vector<8x8xf32>
    %196 = arith.truncf %195 : vector<8x8xf32> to vector<8x8xbf16>
    %cst_65 = arith.constant dense<0.000000e+00> : vector<8x16xf32>
    %197 = tpu.matmul %196, %180, %cst_65 {dimension_numbers = #tpu.dot_dimension_numbers<[1], [0], [0], [1], [0, 0, 1, 1], [], []>} : vector<8x8xbf16>, vector<8x16xbf16>, vector<8x16xf32> -> vector<8x16xf32>
    %198 = vector.extract_strided_slice %166 {offsets = [0, 16], sizes = [8, 16], strides = [1, 1]} : vector<8x64xf32> to vector<8x16xf32>
    %199 = arith.truncf %198 : vector<8x16xf32> to vector<8x16xbf16>
    %200 = vector.extract_strided_slice %170 {offsets = [0, 16], sizes = [8, 16], strides = [1, 1]} : vector<8x64xf32> to vector<8x16xf32>
    %201 = arith.truncf %200 : vector<8x16xf32> to vector<8x16xbf16>
    %202 = vector.extract_strided_slice %174 {offsets = [0, 16], sizes = [8, 16], strides = [1, 1]} : vector<8x64xf32> to vector<8x16xf32>
    %203 = arith.truncf %202 : vector<8x16xf32> to vector<8x16xbf16>
    %cst_66 = arith.constant dense<0.000000e+00> : vector<8x8xf32>
    %204 = tpu.matmul %199, %201, %cst_66 {dimension_numbers = #tpu.dot_dimension_numbers<[1], [1], [0], [0], [0, 0, 1, 0], [], []>} : vector<8x16xbf16>, vector<8x16xbf16>, vector<8x8xf32> -> vector<8x8xf32>
    %cst_67 = arith.constant 2.500000e-01 : f32
    %205 = vector.broadcast %cst_67 : f32 to vector<8x8xf32>
    %206 = arith.mulf %204, %205 : vector<8x8xf32>
    %207 = vector.broadcast %89 : vector<1x8xf32> to vector<8x8xf32>
    %208 = arith.addf %206, %207 : vector<8x8xf32>
    %cst_68 = arith.constant dense<0xFF800000> : vector<8xf32>
    %209 = vector.multi_reduction <maximumf>, %208, %cst_68 [1] : vector<8x8xf32> to vector<8xf32>
    %210 = vector.shape_cast %209 : vector<8xf32> to vector<8x1xf32>
    %211 = vector.broadcast %210 : vector<8x1xf32> to vector<8x8xf32>
    %212 = arith.subf %208, %211 : vector<8x8xf32>
    %213 = math.exp %212 : vector<8x8xf32>
    %cst_69 = arith.constant dense<0.000000e+00> : vector<8xf32>
    %214 = vector.multi_reduction <add>, %213, %cst_69 [1] : vector<8x8xf32> to vector<8xf32>
    %215 = vector.shape_cast %214 : vector<8xf32> to vector<8x1xf32>
    %216 = tpu.reciprocal %215 {approx = true} : vector<8x1xf32> -> vector<8x1xf32>
    %217 = vector.broadcast %216 : vector<8x1xf32> to vector<8x8xf32>
    %218 = arith.mulf %213, %217 : vector<8x8xf32>
    %219 = arith.truncf %218 : vector<8x8xf32> to vector<8x8xbf16>
    %cst_70 = arith.constant dense<0.000000e+00> : vector<8x16xf32>
    %220 = tpu.matmul %219, %203, %cst_70 {dimension_numbers = #tpu.dot_dimension_numbers<[1], [0], [0], [1], [0, 0, 1, 1], [], []>} : vector<8x8xbf16>, vector<8x16xbf16>, vector<8x16xf32> -> vector<8x16xf32>
    %221 = vector.extract_strided_slice %166 {offsets = [0, 32], sizes = [8, 16], strides = [1, 1]} : vector<8x64xf32> to vector<8x16xf32>
    %222 = arith.truncf %221 : vector<8x16xf32> to vector<8x16xbf16>
    %223 = vector.extract_strided_slice %170 {offsets = [0, 32], sizes = [8, 16], strides = [1, 1]} : vector<8x64xf32> to vector<8x16xf32>
    %224 = arith.truncf %223 : vector<8x16xf32> to vector<8x16xbf16>
    %225 = vector.extract_strided_slice %174 {offsets = [0, 32], sizes = [8, 16], strides = [1, 1]} : vector<8x64xf32> to vector<8x16xf32>
    %226 = arith.truncf %225 : vector<8x16xf32> to vector<8x16xbf16>
    %cst_71 = arith.constant dense<0.000000e+00> : vector<8x8xf32>
    %227 = tpu.matmul %222, %224, %cst_71 {dimension_numbers = #tpu.dot_dimension_numbers<[1], [1], [0], [0], [0, 0, 1, 0], [], []>} : vector<8x16xbf16>, vector<8x16xbf16>, vector<8x8xf32> -> vector<8x8xf32>
    %cst_72 = arith.constant 2.500000e-01 : f32
    %228 = vector.broadcast %cst_72 : f32 to vector<8x8xf32>
    %229 = arith.mulf %227, %228 : vector<8x8xf32>
    %230 = vector.broadcast %89 : vector<1x8xf32> to vector<8x8xf32>
    %231 = arith.addf %229, %230 : vector<8x8xf32>
    %cst_73 = arith.constant dense<0xFF800000> : vector<8xf32>
    %232 = vector.multi_reduction <maximumf>, %231, %cst_73 [1] : vector<8x8xf32> to vector<8xf32>
    %233 = vector.shape_cast %232 : vector<8xf32> to vector<8x1xf32>
    %234 = vector.broadcast %233 : vector<8x1xf32> to vector<8x8xf32>
    %235 = arith.subf %231, %234 : vector<8x8xf32>
    %236 = math.exp %235 : vector<8x8xf32>
    %cst_74 = arith.constant dense<0.000000e+00> : vector<8xf32>
    %237 = vector.multi_reduction <add>, %236, %cst_74 [1] : vector<8x8xf32> to vector<8xf32>
    %238 = vector.shape_cast %237 : vector<8xf32> to vector<8x1xf32>
    %239 = tpu.reciprocal %238 {approx = true} : vector<8x1xf32> -> vector<8x1xf32>
    %240 = vector.broadcast %239 : vector<8x1xf32> to vector<8x8xf32>
    %241 = arith.mulf %236, %240 : vector<8x8xf32>
    %242 = arith.truncf %241 : vector<8x8xf32> to vector<8x8xbf16>
    %cst_75 = arith.constant dense<0.000000e+00> : vector<8x16xf32>
    %243 = tpu.matmul %242, %226, %cst_75 {dimension_numbers = #tpu.dot_dimension_numbers<[1], [0], [0], [1], [0, 0, 1, 1], [], []>} : vector<8x8xbf16>, vector<8x16xbf16>, vector<8x16xf32> -> vector<8x16xf32>
    %244 = vector.extract_strided_slice %166 {offsets = [0, 48], sizes = [8, 16], strides = [1, 1]} : vector<8x64xf32> to vector<8x16xf32>
    %245 = arith.truncf %244 : vector<8x16xf32> to vector<8x16xbf16>
    %246 = vector.extract_strided_slice %170 {offsets = [0, 48], sizes = [8, 16], strides = [1, 1]} : vector<8x64xf32> to vector<8x16xf32>
    %247 = arith.truncf %246 : vector<8x16xf32> to vector<8x16xbf16>
    %248 = vector.extract_strided_slice %174 {offsets = [0, 48], sizes = [8, 16], strides = [1, 1]} : vector<8x64xf32> to vector<8x16xf32>
    %249 = arith.truncf %248 : vector<8x16xf32> to vector<8x16xbf16>
    %cst_76 = arith.constant dense<0.000000e+00> : vector<8x8xf32>
    %250 = tpu.matmul %245, %247, %cst_76 {dimension_numbers = #tpu.dot_dimension_numbers<[1], [1], [0], [0], [0, 0, 1, 0], [], []>} : vector<8x16xbf16>, vector<8x16xbf16>, vector<8x8xf32> -> vector<8x8xf32>
    %cst_77 = arith.constant 2.500000e-01 : f32
    %251 = vector.broadcast %cst_77 : f32 to vector<8x8xf32>
    %252 = arith.mulf %250, %251 : vector<8x8xf32>
    %253 = vector.broadcast %89 : vector<1x8xf32> to vector<8x8xf32>
    %254 = arith.addf %252, %253 : vector<8x8xf32>
    %cst_78 = arith.constant dense<0xFF800000> : vector<8xf32>
    %255 = vector.multi_reduction <maximumf>, %254, %cst_78 [1] : vector<8x8xf32> to vector<8xf32>
    %256 = vector.shape_cast %255 : vector<8xf32> to vector<8x1xf32>
    %257 = vector.broadcast %256 : vector<8x1xf32> to vector<8x8xf32>
    %258 = arith.subf %254, %257 : vector<8x8xf32>
    %259 = math.exp %258 : vector<8x8xf32>
    %cst_79 = arith.constant dense<0.000000e+00> : vector<8xf32>
    %260 = vector.multi_reduction <add>, %259, %cst_79 [1] : vector<8x8xf32> to vector<8xf32>
    %261 = vector.shape_cast %260 : vector<8xf32> to vector<8x1xf32>
    %262 = tpu.reciprocal %261 {approx = true} : vector<8x1xf32> -> vector<8x1xf32>
    %263 = vector.broadcast %262 : vector<8x1xf32> to vector<8x8xf32>
    %264 = arith.mulf %259, %263 : vector<8x8xf32>
    %265 = arith.truncf %264 : vector<8x8xf32> to vector<8x8xbf16>
    %cst_80 = arith.constant dense<0.000000e+00> : vector<8x16xf32>
    %266 = tpu.matmul %265, %249, %cst_80 {dimension_numbers = #tpu.dot_dimension_numbers<[1], [0], [0], [1], [0, 0, 1, 1], [], []>} : vector<8x8xbf16>, vector<8x16xbf16>, vector<8x16xf32> -> vector<8x16xf32>
    %267 = tpu.concatenate %197, %220, %243, %266 in 1 : vector<8x16xf32>, vector<8x16xf32>, vector<8x16xf32>, vector<8x16xf32> -> vector<8x64xf32>
    %268 = arith.truncf %267 : vector<8x64xf32> to vector<8x64xbf16>
    %c0_81 = arith.constant 0 : index
    %c0_82 = arith.constant 0 : index
    %c0_83 = arith.constant 0 : index
    %269 = vector.load %arg15[%c0_81, %c0_82, %c0_83] : memref<2x64x64xbf16, #tpu.memory_space<vmem>>, vector<1x64x64xbf16>
    %270 = vector.shape_cast %269 : vector<1x64x64xbf16> to vector<64x64xbf16>
    %cst_84 = arith.constant dense<0.000000e+00> : vector<8x64xf32>
    %271 = tpu.matmul %268, %270, %cst_84 {dimension_numbers = #tpu.dot_dimension_numbers<[1], [0], [0], [1], [0, 0, 1, 1], [], []>} : vector<8x64xbf16>, vector<64x64xbf16>, vector<8x64xf32> -> vector<8x64xf32>
    %272 = arith.addf %136, %271 : vector<8x64xf32>
    %273 = vector.extract_strided_slice %91 {offsets = [9, 0], sizes = [1, 64], strides = [1, 1]} : vector<24x64xf32> to vector<1x64xf32>
    %274 = vector.broadcast %273 : vector<1x64xf32> to vector<8x64xf32>
    %275 = arith.addf %272, %274 : vector<8x64xf32>
    %276 = vector.extract_strided_slice %91 {offsets = [10, 0], sizes = [1, 64], strides = [1, 1]} : vector<24x64xf32> to vector<1x64xf32>
    %277 = vector.extract_strided_slice %91 {offsets = [11, 0], sizes = [1, 64], strides = [1, 1]} : vector<24x64xf32> to vector<1x64xf32>
    %cst_85 = arith.constant dense<0.000000e+00> : vector<8xf32>
    %278 = vector.multi_reduction <add>, %275, %cst_85 [1] : vector<8x64xf32> to vector<8xf32>
    %279 = vector.shape_cast %278 : vector<8xf32> to vector<8x1xf32>
    %cst_86 = arith.constant 6.400000e+01 : f32
    %280 = vector.broadcast %cst_86 : f32 to vector<8x1xf32>
    %281 = arith.divf %279, %280 : vector<8x1xf32>
    %282 = vector.broadcast %281 : vector<8x1xf32> to vector<8x64xf32>
    %283 = arith.subf %275, %282 : vector<8x64xf32>
    %284 = arith.mulf %283, %283 : vector<8x64xf32>
    %cst_87 = arith.constant dense<0.000000e+00> : vector<8xf32>
    %285 = vector.multi_reduction <add>, %284, %cst_87 [1] : vector<8x64xf32> to vector<8xf32>
    %286 = vector.shape_cast %285 : vector<8xf32> to vector<8x1xf32>
    %cst_88 = arith.constant 6.400000e+01 : f32
    %287 = vector.broadcast %cst_88 : f32 to vector<8x1xf32>
    %288 = arith.divf %286, %287 : vector<8x1xf32>
    %cst_89 = arith.constant 9.99999974E-6 : f32
    %289 = vector.broadcast %cst_89 : f32 to vector<8x1xf32>
    %290 = arith.addf %288, %289 : vector<8x1xf32>
    %291 = math.rsqrt %290 : vector<8x1xf32>
    %292 = vector.broadcast %291 : vector<8x1xf32> to vector<8x64xf32>
    %293 = arith.mulf %283, %292 : vector<8x64xf32>
    %294 = vector.broadcast %276 : vector<1x64xf32> to vector<8x64xf32>
    %295 = arith.mulf %293, %294 : vector<8x64xf32>
    %296 = vector.broadcast %277 : vector<1x64xf32> to vector<8x64xf32>
    %297 = arith.addf %295, %296 : vector<8x64xf32>
    %298 = arith.truncf %297 : vector<8x64xf32> to vector<8x64xbf16>
    %c0_90 = arith.constant 0 : index
    %c0_91 = arith.constant 0 : index
    %c0_92 = arith.constant 0 : index
    %299 = vector.load %arg16[%c0_90, %c0_91, %c0_92] : memref<2x64x128xbf16, #tpu.memory_space<vmem>>, vector<1x64x128xbf16>
    %300 = vector.shape_cast %299 : vector<1x64x128xbf16> to vector<64x128xbf16>
    %cst_93 = arith.constant dense<0.000000e+00> : vector<8x128xf32>
    %301 = tpu.matmul %298, %300, %cst_93 {dimension_numbers = #tpu.dot_dimension_numbers<[1], [0], [0], [1], [0, 0, 1, 1], [], []>} : vector<8x64xbf16>, vector<64x128xbf16>, vector<8x128xf32> -> vector<8x128xf32>
    %302 = vector.extract_strided_slice %301 {offsets = [0, 0], sizes = [8, 64], strides = [1, 1]} : vector<8x128xf32> to vector<8x64xf32>
    %303 = vector.extract_strided_slice %91 {offsets = [12, 0], sizes = [1, 64], strides = [1, 1]} : vector<24x64xf32> to vector<1x64xf32>
    %304 = vector.broadcast %303 : vector<1x64xf32> to vector<8x64xf32>
    %305 = arith.addf %302, %304 : vector<8x64xf32>
    %306 = vector.extract_strided_slice %301 {offsets = [0, 64], sizes = [8, 64], strides = [1, 1]} : vector<8x128xf32> to vector<8x64xf32>
    %307 = vector.extract_strided_slice %91 {offsets = [13, 0], sizes = [1, 64], strides = [1, 1]} : vector<24x64xf32> to vector<1x64xf32>
    %308 = vector.broadcast %307 : vector<1x64xf32> to vector<8x64xf32>
    %309 = arith.addf %306, %308 : vector<8x64xf32>
    %310 = arith.negf %309 : vector<8x64xf32>
    %311 = math.exp %310 : vector<8x64xf32>
    %cst_94 = arith.constant 1.000000e+00 : f32
    %312 = vector.broadcast %cst_94 : f32 to vector<8x64xf32>
    %313 = arith.addf %312, %311 : vector<8x64xf32>
    %314 = arith.divf %312, %313 : vector<8x64xf32>
    %315 = arith.mulf %305, %314 : vector<8x64xf32>
    %cst_95 = arith.constant 0.000000e+00 : f32
    %316 = vector.broadcast %cst_95 : f32 to vector<4x64xf32>
    %cst_96 = arith.constant 0.000000e+00 : f32
    %317 = vector.broadcast %cst_96 : f32 to vector<4x64xf32>
    %318 = tpu.concatenate %316, %315, %317 in 0 : vector<4x64xf32>, vector<8x64xf32>, vector<4x64xf32> -> vector<16x64xf32>
    %c0_97 = arith.constant 0 : index
    %c0_98 = arith.constant 0 : index
    %c0_99 = arith.constant 0 : index
    %319 = vector.load %arg20[%c0_97, %c0_98, %c0_99] : memref<2x9x64xf32, #tpu.memory_space<vmem>>, vector<1x9x64xf32>
    %320 = vector.shape_cast %319 : vector<1x9x64xf32> to vector<9x64xf32>
    %cst_100 = arith.constant 0.000000e+00 : f32
    %321 = vector.broadcast %cst_100 : f32 to vector<8x64xf32>
    %322 = vector.extract_strided_slice %318 {offsets = [0, 0], sizes = [8, 64], strides = [1, 1]} : vector<16x64xf32> to vector<8x64xf32>
    %323 = vector.extract_strided_slice %320 {offsets = [0, 0], sizes = [1, 64], strides = [1, 1]} : vector<9x64xf32> to vector<1x64xf32>
    %324 = vector.broadcast %323 : vector<1x64xf32> to vector<8x64xf32>
    %325 = arith.mulf %322, %324 : vector<8x64xf32>
    %326 = arith.addf %321, %325 : vector<8x64xf32>
    %327 = vector.extract_strided_slice %318 {offsets = [1, 0], sizes = [8, 64], strides = [1, 1]} : vector<16x64xf32> to vector<8x64xf32>
    %328 = vector.extract_strided_slice %320 {offsets = [1, 0], sizes = [1, 64], strides = [1, 1]} : vector<9x64xf32> to vector<1x64xf32>
    %329 = vector.broadcast %328 : vector<1x64xf32> to vector<8x64xf32>
    %330 = arith.mulf %327, %329 : vector<8x64xf32>
    %331 = arith.addf %326, %330 : vector<8x64xf32>
    %332 = vector.extract_strided_slice %318 {offsets = [2, 0], sizes = [8, 64], strides = [1, 1]} : vector<16x64xf32> to vector<8x64xf32>
    %333 = vector.extract_strided_slice %320 {offsets = [2, 0], sizes = [1, 64], strides = [1, 1]} : vector<9x64xf32> to vector<1x64xf32>
    %334 = vector.broadcast %333 : vector<1x64xf32> to vector<8x64xf32>
    %335 = arith.mulf %332, %334 : vector<8x64xf32>
    %336 = arith.addf %331, %335 : vector<8x64xf32>
    %337 = vector.extract_strided_slice %318 {offsets = [3, 0], sizes = [8, 64], strides = [1, 1]} : vector<16x64xf32> to vector<8x64xf32>
    %338 = vector.extract_strided_slice %320 {offsets = [3, 0], sizes = [1, 64], strides = [1, 1]} : vector<9x64xf32> to vector<1x64xf32>
    %339 = vector.broadcast %338 : vector<1x64xf32> to vector<8x64xf32>
    %340 = arith.mulf %337, %339 : vector<8x64xf32>
    %341 = arith.addf %336, %340 : vector<8x64xf32>
    %342 = vector.extract_strided_slice %318 {offsets = [4, 0], sizes = [8, 64], strides = [1, 1]} : vector<16x64xf32> to vector<8x64xf32>
    %343 = vector.extract_strided_slice %320 {offsets = [4, 0], sizes = [1, 64], strides = [1, 1]} : vector<9x64xf32> to vector<1x64xf32>
    %344 = vector.broadcast %343 : vector<1x64xf32> to vector<8x64xf32>
    %345 = arith.mulf %342, %344 : vector<8x64xf32>
    %346 = arith.addf %341, %345 : vector<8x64xf32>
    %347 = vector.extract_strided_slice %318 {offsets = [5, 0], sizes = [8, 64], strides = [1, 1]} : vector<16x64xf32> to vector<8x64xf32>
    %348 = vector.extract_strided_slice %320 {offsets = [5, 0], sizes = [1, 64], strides = [1, 1]} : vector<9x64xf32> to vector<1x64xf32>
    %349 = vector.broadcast %348 : vector<1x64xf32> to vector<8x64xf32>
    %350 = arith.mulf %347, %349 : vector<8x64xf32>
    %351 = arith.addf %346, %350 : vector<8x64xf32>
    %352 = vector.extract_strided_slice %318 {offsets = [6, 0], sizes = [8, 64], strides = [1, 1]} : vector<16x64xf32> to vector<8x64xf32>
    %353 = vector.extract_strided_slice %320 {offsets = [6, 0], sizes = [1, 64], strides = [1, 1]} : vector<9x64xf32> to vector<1x64xf32>
    %354 = vector.broadcast %353 : vector<1x64xf32> to vector<8x64xf32>
    %355 = arith.mulf %352, %354 : vector<8x64xf32>
    %356 = arith.addf %351, %355 : vector<8x64xf32>
    %357 = vector.extract_strided_slice %318 {offsets = [7, 0], sizes = [8, 64], strides = [1, 1]} : vector<16x64xf32> to vector<8x64xf32>
    %358 = vector.extract_strided_slice %320 {offsets = [7, 0], sizes = [1, 64], strides = [1, 1]} : vector<9x64xf32> to vector<1x64xf32>
    %359 = vector.broadcast %358 : vector<1x64xf32> to vector<8x64xf32>
    %360 = arith.mulf %357, %359 : vector<8x64xf32>
    %361 = arith.addf %356, %360 : vector<8x64xf32>
    %362 = vector.extract_strided_slice %318 {offsets = [8, 0], sizes = [8, 64], strides = [1, 1]} : vector<16x64xf32> to vector<8x64xf32>
    %363 = vector.extract_strided_slice %320 {offsets = [8, 0], sizes = [1, 64], strides = [1, 1]} : vector<9x64xf32> to vector<1x64xf32>
    %364 = vector.broadcast %363 : vector<1x64xf32> to vector<8x64xf32>
    %365 = arith.mulf %362, %364 : vector<8x64xf32>
    %366 = arith.addf %361, %365 : vector<8x64xf32>
    %367 = vector.extract_strided_slice %91 {offsets = [14, 0], sizes = [1, 64], strides = [1, 1]} : vector<24x64xf32> to vector<1x64xf32>
    %368 = vector.broadcast %367 : vector<1x64xf32> to vector<8x64xf32>
    %369 = arith.addf %366, %368 : vector<8x64xf32>
    %370 = vector.extract_strided_slice %91 {offsets = [15, 0], sizes = [1, 64], strides = [1, 1]} : vector<24x64xf32> to vector<1x64xf32>
    %371 = vector.extract_strided_slice %91 {offsets = [16, 0], sizes = [1, 64], strides = [1, 1]} : vector<24x64xf32> to vector<1x64xf32>
    %cst_101 = arith.constant dense<0.000000e+00> : vector<8xf32>
    %372 = vector.multi_reduction <add>, %369, %cst_101 [1] : vector<8x64xf32> to vector<8xf32>
    %373 = vector.shape_cast %372 : vector<8xf32> to vector<8x1xf32>
    %cst_102 = arith.constant 6.400000e+01 : f32
    %374 = vector.broadcast %cst_102 : f32 to vector<8x1xf32>
    %375 = arith.divf %373, %374 : vector<8x1xf32>
    %376 = vector.broadcast %375 : vector<8x1xf32> to vector<8x64xf32>
    %377 = arith.subf %369, %376 : vector<8x64xf32>
    %378 = arith.mulf %377, %377 : vector<8x64xf32>
    %cst_103 = arith.constant dense<0.000000e+00> : vector<8xf32>
    %379 = vector.multi_reduction <add>, %378, %cst_103 [1] : vector<8x64xf32> to vector<8xf32>
    %380 = vector.shape_cast %379 : vector<8xf32> to vector<8x1xf32>
    %cst_104 = arith.constant 6.400000e+01 : f32
    %381 = vector.broadcast %cst_104 : f32 to vector<8x1xf32>
    %382 = arith.divf %380, %381 : vector<8x1xf32>
    %cst_105 = arith.constant 9.99999974E-6 : f32
    %383 = vector.broadcast %cst_105 : f32 to vector<8x1xf32>
    %384 = arith.addf %382, %383 : vector<8x1xf32>
    %385 = math.rsqrt %384 : vector<8x1xf32>
    %386 = vector.broadcast %385 : vector<8x1xf32> to vector<8x64xf32>
    %387 = arith.mulf %377, %386 : vector<8x64xf32>
    %388 = vector.broadcast %370 : vector<1x64xf32> to vector<8x64xf32>
    %389 = arith.mulf %387, %388 : vector<8x64xf32>
    %390 = vector.broadcast %371 : vector<1x64xf32> to vector<8x64xf32>
    %391 = arith.addf %389, %390 : vector<8x64xf32>
    %392 = arith.negf %391 : vector<8x64xf32>
    %393 = math.exp %392 : vector<8x64xf32>
    %cst_106 = arith.constant 1.000000e+00 : f32
    %394 = vector.broadcast %cst_106 : f32 to vector<8x64xf32>
    %395 = arith.addf %394, %393 : vector<8x64xf32>
    %396 = arith.divf %394, %395 : vector<8x64xf32>
    %397 = arith.mulf %391, %396 : vector<8x64xf32>
    %398 = arith.truncf %397 : vector<8x64xf32> to vector<8x64xbf16>
    %c0_107 = arith.constant 0 : index
    %c0_108 = arith.constant 0 : index
    %c0_109 = arith.constant 0 : index
    %399 = vector.load %arg17[%c0_107, %c0_108, %c0_109] : memref<2x64x64xbf16, #tpu.memory_space<vmem>>, vector<1x64x64xbf16>
    %400 = vector.shape_cast %399 : vector<1x64x64xbf16> to vector<64x64xbf16>
    %cst_110 = arith.constant dense<0.000000e+00> : vector<8x64xf32>
    %401 = tpu.matmul %398, %400, %cst_110 {dimension_numbers = #tpu.dot_dimension_numbers<[1], [0], [0], [1], [0, 0, 1, 1], [], []>} : vector<8x64xbf16>, vector<64x64xbf16>, vector<8x64xf32> -> vector<8x64xf32>
    %402 = arith.addf %275, %401 : vector<8x64xf32>
    %403 = vector.extract_strided_slice %91 {offsets = [17, 0], sizes = [1, 64], strides = [1, 1]} : vector<24x64xf32> to vector<1x64xf32>
    %404 = vector.broadcast %403 : vector<1x64xf32> to vector<8x64xf32>
    %405 = arith.addf %402, %404 : vector<8x64xf32>
    %406 = vector.extract_strided_slice %91 {offsets = [18, 0], sizes = [1, 64], strides = [1, 1]} : vector<24x64xf32> to vector<1x64xf32>
    %407 = vector.extract_strided_slice %91 {offsets = [19, 0], sizes = [1, 64], strides = [1, 1]} : vector<24x64xf32> to vector<1x64xf32>
    %cst_111 = arith.constant dense<0.000000e+00> : vector<8xf32>
    %408 = vector.multi_reduction <add>, %405, %cst_111 [1] : vector<8x64xf32> to vector<8xf32>
    %409 = vector.shape_cast %408 : vector<8xf32> to vector<8x1xf32>
    %cst_112 = arith.constant 6.400000e+01 : f32
    %410 = vector.broadcast %cst_112 : f32 to vector<8x1xf32>
    %411 = arith.divf %409, %410 : vector<8x1xf32>
    %412 = vector.broadcast %411 : vector<8x1xf32> to vector<8x64xf32>
    %413 = arith.subf %405, %412 : vector<8x64xf32>
    %414 = arith.mulf %413, %413 : vector<8x64xf32>
    %cst_113 = arith.constant dense<0.000000e+00> : vector<8xf32>
    %415 = vector.multi_reduction <add>, %414, %cst_113 [1] : vector<8x64xf32> to vector<8xf32>
    %416 = vector.shape_cast %415 : vector<8xf32> to vector<8x1xf32>
    %cst_114 = arith.constant 6.400000e+01 : f32
    %417 = vector.broadcast %cst_114 : f32 to vector<8x1xf32>
    %418 = arith.divf %416, %417 : vector<8x1xf32>
    %cst_115 = arith.constant 9.99999974E-6 : f32
    %419 = vector.broadcast %cst_115 : f32 to vector<8x1xf32>
    %420 = arith.addf %418, %419 : vector<8x1xf32>
    %421 = math.rsqrt %420 : vector<8x1xf32>
    %422 = vector.broadcast %421 : vector<8x1xf32> to vector<8x64xf32>
    %423 = arith.mulf %413, %422 : vector<8x64xf32>
    %424 = vector.broadcast %406 : vector<1x64xf32> to vector<8x64xf32>
    %425 = arith.mulf %423, %424 : vector<8x64xf32>
    %426 = vector.broadcast %407 : vector<1x64xf32> to vector<8x64xf32>
    %427 = arith.addf %425, %426 : vector<8x64xf32>
    %428 = arith.truncf %427 : vector<8x64xf32> to vector<8x64xbf16>
    %c0_116 = arith.constant 0 : index
    %c0_117 = arith.constant 0 : index
    %c0_118 = arith.constant 0 : index
    %429 = vector.load %arg18[%c0_116, %c0_117, %c0_118] : memref<2x64x64xbf16, #tpu.memory_space<vmem>>, vector<1x64x64xbf16>
    %430 = vector.shape_cast %429 : vector<1x64x64xbf16> to vector<64x64xbf16>
    %cst_119 = arith.constant dense<0.000000e+00> : vector<8x64xf32>
    %431 = tpu.matmul %428, %430, %cst_119 {dimension_numbers = #tpu.dot_dimension_numbers<[1], [0], [0], [1], [0, 0, 1, 1], [], []>} : vector<8x64xbf16>, vector<64x64xbf16>, vector<8x64xf32> -> vector<8x64xf32>
    %432 = vector.extract_strided_slice %91 {offsets = [20, 0], sizes = [1, 64], strides = [1, 1]} : vector<24x64xf32> to vector<1x64xf32>
    %433 = vector.broadcast %432 : vector<1x64xf32> to vector<8x64xf32>
    %434 = arith.addf %431, %433 : vector<8x64xf32>
    %435 = arith.negf %434 : vector<8x64xf32>
    %436 = math.exp %435 : vector<8x64xf32>
    %cst_120 = arith.constant 1.000000e+00 : f32
    %437 = vector.broadcast %cst_120 : f32 to vector<8x64xf32>
    %438 = arith.addf %437, %436 : vector<8x64xf32>
    %439 = arith.divf %437, %438 : vector<8x64xf32>
    %440 = arith.mulf %434, %439 : vector<8x64xf32>
    %441 = arith.truncf %440 : vector<8x64xf32> to vector<8x64xbf16>
    %c0_121 = arith.constant 0 : index
    %c0_122 = arith.constant 0 : index
    %c0_123 = arith.constant 0 : index
    %442 = vector.load %arg19[%c0_121, %c0_122, %c0_123] : memref<2x64x64xbf16, #tpu.memory_space<vmem>>, vector<1x64x64xbf16>
    %443 = vector.shape_cast %442 : vector<1x64x64xbf16> to vector<64x64xbf16>
    %cst_124 = arith.constant dense<0.000000e+00> : vector<8x64xf32>
    %444 = tpu.matmul %441, %443, %cst_124 {dimension_numbers = #tpu.dot_dimension_numbers<[1], [0], [0], [1], [0, 0, 1, 1], [], []>} : vector<8x64xbf16>, vector<64x64xbf16>, vector<8x64xf32> -> vector<8x64xf32>
    %445 = vector.extract_strided_slice %91 {offsets = [21, 0], sizes = [1, 64], strides = [1, 1]} : vector<24x64xf32> to vector<1x64xf32>
    %446 = vector.broadcast %445 : vector<1x64xf32> to vector<8x64xf32>
    %447 = arith.addf %444, %446 : vector<8x64xf32>
    %cst_125 = arith.constant 5.000000e-01 : f32
    %448 = vector.broadcast %cst_125 : f32 to vector<8x64xf32>
    %449 = arith.mulf %448, %447 : vector<8x64xf32>
    %450 = arith.addf %405, %449 : vector<8x64xf32>
    %451 = vector.extract_strided_slice %91 {offsets = [22, 0], sizes = [1, 64], strides = [1, 1]} : vector<24x64xf32> to vector<1x64xf32>
    %452 = vector.extract_strided_slice %91 {offsets = [23, 0], sizes = [1, 64], strides = [1, 1]} : vector<24x64xf32> to vector<1x64xf32>
    %cst_126 = arith.constant dense<0.000000e+00> : vector<8xf32>
    %453 = vector.multi_reduction <add>, %450, %cst_126 [1] : vector<8x64xf32> to vector<8xf32>
    %454 = vector.shape_cast %453 : vector<8xf32> to vector<8x1xf32>
    %cst_127 = arith.constant 6.400000e+01 : f32
    %455 = vector.broadcast %cst_127 : f32 to vector<8x1xf32>
    %456 = arith.divf %454, %455 : vector<8x1xf32>
    %457 = vector.broadcast %456 : vector<8x1xf32> to vector<8x64xf32>
    %458 = arith.subf %450, %457 : vector<8x64xf32>
    %459 = arith.mulf %458, %458 : vector<8x64xf32>
    %cst_128 = arith.constant dense<0.000000e+00> : vector<8xf32>
    %460 = vector.multi_reduction <add>, %459, %cst_128 [1] : vector<8x64xf32> to vector<8xf32>
    %461 = vector.shape_cast %460 : vector<8xf32> to vector<8x1xf32>
    %cst_129 = arith.constant 6.400000e+01 : f32
    %462 = vector.broadcast %cst_129 : f32 to vector<8x1xf32>
    %463 = arith.divf %461, %462 : vector<8x1xf32>
    %cst_130 = arith.constant 9.99999974E-6 : f32
    %464 = vector.broadcast %cst_130 : f32 to vector<8x1xf32>
    %465 = arith.addf %463, %464 : vector<8x1xf32>
    %466 = math.rsqrt %465 : vector<8x1xf32>
    %467 = vector.broadcast %466 : vector<8x1xf32> to vector<8x64xf32>
    %468 = arith.mulf %458, %467 : vector<8x64xf32>
    %469 = vector.broadcast %451 : vector<1x64xf32> to vector<8x64xf32>
    %470 = arith.mulf %468, %469 : vector<8x64xf32>
    %471 = vector.broadcast %452 : vector<1x64xf32> to vector<8x64xf32>
    %472 = arith.addf %470, %471 : vector<8x64xf32>
    %c1 = arith.constant 1 : index
    %c0_131 = arith.constant 0 : index
    %c0_132 = arith.constant 0 : index
    %473 = vector.load %arg11[%c1, %c0_131, %c0_132] : memref<2x24x64xf32, #tpu.memory_space<vmem>>, vector<1x24x64xf32>
    %474 = vector.shape_cast %473 : vector<1x24x64xf32> to vector<24x64xf32>
    %475 = vector.extract_strided_slice %474 {offsets = [0, 0], sizes = [1, 64], strides = [1, 1]} : vector<24x64xf32> to vector<1x64xf32>
    %476 = vector.extract_strided_slice %474 {offsets = [1, 0], sizes = [1, 64], strides = [1, 1]} : vector<24x64xf32> to vector<1x64xf32>
    %cst_133 = arith.constant dense<0.000000e+00> : vector<8xf32>
    %477 = vector.multi_reduction <add>, %472, %cst_133 [1] : vector<8x64xf32> to vector<8xf32>
    %478 = vector.shape_cast %477 : vector<8xf32> to vector<8x1xf32>
    %cst_134 = arith.constant 6.400000e+01 : f32
    %479 = vector.broadcast %cst_134 : f32 to vector<8x1xf32>
    %480 = arith.divf %478, %479 : vector<8x1xf32>
    %481 = vector.broadcast %480 : vector<8x1xf32> to vector<8x64xf32>
    %482 = arith.subf %472, %481 : vector<8x64xf32>
    %483 = arith.mulf %482, %482 : vector<8x64xf32>
    %cst_135 = arith.constant dense<0.000000e+00> : vector<8xf32>
    %484 = vector.multi_reduction <add>, %483, %cst_135 [1] : vector<8x64xf32> to vector<8xf32>
    %485 = vector.shape_cast %484 : vector<8xf32> to vector<8x1xf32>
    %cst_136 = arith.constant 6.400000e+01 : f32
    %486 = vector.broadcast %cst_136 : f32 to vector<8x1xf32>
    %487 = arith.divf %485, %486 : vector<8x1xf32>
    %cst_137 = arith.constant 9.99999974E-6 : f32
    %488 = vector.broadcast %cst_137 : f32 to vector<8x1xf32>
    %489 = arith.addf %487, %488 : vector<8x1xf32>
    %490 = math.rsqrt %489 : vector<8x1xf32>
    %491 = vector.broadcast %490 : vector<8x1xf32> to vector<8x64xf32>
    %492 = arith.mulf %482, %491 : vector<8x64xf32>
    %493 = vector.broadcast %475 : vector<1x64xf32> to vector<8x64xf32>
    %494 = arith.mulf %492, %493 : vector<8x64xf32>
    %495 = vector.broadcast %476 : vector<1x64xf32> to vector<8x64xf32>
    %496 = arith.addf %494, %495 : vector<8x64xf32>
    %497 = arith.truncf %496 : vector<8x64xf32> to vector<8x64xbf16>
    %c1_138 = arith.constant 1 : index
    %c0_139 = arith.constant 0 : index
    %c0_140 = arith.constant 0 : index
    %498 = vector.load %arg12[%c1_138, %c0_139, %c0_140] : memref<2x64x64xbf16, #tpu.memory_space<vmem>>, vector<1x64x64xbf16>
    %499 = vector.shape_cast %498 : vector<1x64x64xbf16> to vector<64x64xbf16>
    %cst_141 = arith.constant dense<0.000000e+00> : vector<8x64xf32>
    %500 = tpu.matmul %497, %499, %cst_141 {dimension_numbers = #tpu.dot_dimension_numbers<[1], [0], [0], [1], [0, 0, 1, 1], [], []>} : vector<8x64xbf16>, vector<64x64xbf16>, vector<8x64xf32> -> vector<8x64xf32>
    %501 = vector.extract_strided_slice %474 {offsets = [2, 0], sizes = [1, 64], strides = [1, 1]} : vector<24x64xf32> to vector<1x64xf32>
    %502 = vector.broadcast %501 : vector<1x64xf32> to vector<8x64xf32>
    %503 = arith.addf %500, %502 : vector<8x64xf32>
    %504 = arith.negf %503 : vector<8x64xf32>
    %505 = math.exp %504 : vector<8x64xf32>
    %cst_142 = arith.constant 1.000000e+00 : f32
    %506 = vector.broadcast %cst_142 : f32 to vector<8x64xf32>
    %507 = arith.addf %506, %505 : vector<8x64xf32>
    %508 = arith.divf %506, %507 : vector<8x64xf32>
    %509 = arith.mulf %503, %508 : vector<8x64xf32>
    %510 = arith.truncf %509 : vector<8x64xf32> to vector<8x64xbf16>
    %c1_143 = arith.constant 1 : index
    %c0_144 = arith.constant 0 : index
    %c0_145 = arith.constant 0 : index
    %511 = vector.load %arg13[%c1_143, %c0_144, %c0_145] : memref<2x64x64xbf16, #tpu.memory_space<vmem>>, vector<1x64x64xbf16>
    %512 = vector.shape_cast %511 : vector<1x64x64xbf16> to vector<64x64xbf16>
    %cst_146 = arith.constant dense<0.000000e+00> : vector<8x64xf32>
    %513 = tpu.matmul %510, %512, %cst_146 {dimension_numbers = #tpu.dot_dimension_numbers<[1], [0], [0], [1], [0, 0, 1, 1], [], []>} : vector<8x64xbf16>, vector<64x64xbf16>, vector<8x64xf32> -> vector<8x64xf32>
    %514 = vector.extract_strided_slice %474 {offsets = [3, 0], sizes = [1, 64], strides = [1, 1]} : vector<24x64xf32> to vector<1x64xf32>
    %515 = vector.broadcast %514 : vector<1x64xf32> to vector<8x64xf32>
    %516 = arith.addf %513, %515 : vector<8x64xf32>
    %cst_147 = arith.constant 5.000000e-01 : f32
    %517 = vector.broadcast %cst_147 : f32 to vector<8x64xf32>
    %518 = arith.mulf %517, %516 : vector<8x64xf32>
    %519 = arith.addf %472, %518 : vector<8x64xf32>
    %520 = vector.extract_strided_slice %474 {offsets = [4, 0], sizes = [1, 64], strides = [1, 1]} : vector<24x64xf32> to vector<1x64xf32>
    %521 = vector.extract_strided_slice %474 {offsets = [5, 0], sizes = [1, 64], strides = [1, 1]} : vector<24x64xf32> to vector<1x64xf32>
    %cst_148 = arith.constant dense<0.000000e+00> : vector<8xf32>
    %522 = vector.multi_reduction <add>, %519, %cst_148 [1] : vector<8x64xf32> to vector<8xf32>
    %523 = vector.shape_cast %522 : vector<8xf32> to vector<8x1xf32>
    %cst_149 = arith.constant 6.400000e+01 : f32
    %524 = vector.broadcast %cst_149 : f32 to vector<8x1xf32>
    %525 = arith.divf %523, %524 : vector<8x1xf32>
    %526 = vector.broadcast %525 : vector<8x1xf32> to vector<8x64xf32>
    %527 = arith.subf %519, %526 : vector<8x64xf32>
    %528 = arith.mulf %527, %527 : vector<8x64xf32>
    %cst_150 = arith.constant dense<0.000000e+00> : vector<8xf32>
    %529 = vector.multi_reduction <add>, %528, %cst_150 [1] : vector<8x64xf32> to vector<8xf32>
    %530 = vector.shape_cast %529 : vector<8xf32> to vector<8x1xf32>
    %cst_151 = arith.constant 6.400000e+01 : f32
    %531 = vector.broadcast %cst_151 : f32 to vector<8x1xf32>
    %532 = arith.divf %530, %531 : vector<8x1xf32>
    %cst_152 = arith.constant 9.99999974E-6 : f32
    %533 = vector.broadcast %cst_152 : f32 to vector<8x1xf32>
    %534 = arith.addf %532, %533 : vector<8x1xf32>
    %535 = math.rsqrt %534 : vector<8x1xf32>
    %536 = vector.broadcast %535 : vector<8x1xf32> to vector<8x64xf32>
    %537 = arith.mulf %527, %536 : vector<8x64xf32>
    %538 = vector.broadcast %520 : vector<1x64xf32> to vector<8x64xf32>
    %539 = arith.mulf %537, %538 : vector<8x64xf32>
    %540 = vector.broadcast %521 : vector<1x64xf32> to vector<8x64xf32>
    %541 = arith.addf %539, %540 : vector<8x64xf32>
    %542 = arith.truncf %541 : vector<8x64xf32> to vector<8x64xbf16>
    %c1_153 = arith.constant 1 : index
    %c0_154 = arith.constant 0 : index
    %c0_155 = arith.constant 0 : index
    %543 = vector.load %arg14[%c1_153, %c0_154, %c0_155] : memref<2x64x192xbf16, #tpu.memory_space<vmem>>, vector<1x64x192xbf16>
    %544 = vector.shape_cast %543 : vector<1x64x192xbf16> to vector<64x192xbf16>
    %cst_156 = arith.constant dense<0.000000e+00> : vector<8x192xf32>
    %545 = tpu.matmul %542, %544, %cst_156 {dimension_numbers = #tpu.dot_dimension_numbers<[1], [0], [0], [1], [0, 0, 1, 1], [], []>} : vector<8x64xbf16>, vector<64x192xbf16>, vector<8x192xf32> -> vector<8x192xf32>
    %546 = vector.extract_strided_slice %545 {offsets = [0, 0], sizes = [8, 64], strides = [1, 1]} : vector<8x192xf32> to vector<8x64xf32>
    %547 = vector.extract_strided_slice %474 {offsets = [6, 0], sizes = [1, 64], strides = [1, 1]} : vector<24x64xf32> to vector<1x64xf32>
    %548 = vector.broadcast %547 : vector<1x64xf32> to vector<8x64xf32>
    %549 = arith.addf %546, %548 : vector<8x64xf32>
    %550 = vector.extract_strided_slice %545 {offsets = [0, 64], sizes = [8, 64], strides = [1, 1]} : vector<8x192xf32> to vector<8x64xf32>
    %551 = vector.extract_strided_slice %474 {offsets = [7, 0], sizes = [1, 64], strides = [1, 1]} : vector<24x64xf32> to vector<1x64xf32>
    %552 = vector.broadcast %551 : vector<1x64xf32> to vector<8x64xf32>
    %553 = arith.addf %550, %552 : vector<8x64xf32>
    %554 = vector.extract_strided_slice %545 {offsets = [0, 128], sizes = [8, 64], strides = [1, 1]} : vector<8x192xf32> to vector<8x64xf32>
    %555 = vector.extract_strided_slice %474 {offsets = [8, 0], sizes = [1, 64], strides = [1, 1]} : vector<24x64xf32> to vector<1x64xf32>
    %556 = vector.broadcast %555 : vector<1x64xf32> to vector<8x64xf32>
    %557 = arith.addf %554, %556 : vector<8x64xf32>
    %558 = vector.extract_strided_slice %549 {offsets = [0, 0], sizes = [8, 16], strides = [1, 1]} : vector<8x64xf32> to vector<8x16xf32>
    %559 = arith.truncf %558 : vector<8x16xf32> to vector<8x16xbf16>
    %560 = vector.extract_strided_slice %553 {offsets = [0, 0], sizes = [8, 16], strides = [1, 1]} : vector<8x64xf32> to vector<8x16xf32>
    %561 = arith.truncf %560 : vector<8x16xf32> to vector<8x16xbf16>
    %562 = vector.extract_strided_slice %557 {offsets = [0, 0], sizes = [8, 16], strides = [1, 1]} : vector<8x64xf32> to vector<8x16xf32>
    %563 = arith.truncf %562 : vector<8x16xf32> to vector<8x16xbf16>
    %cst_157 = arith.constant dense<0.000000e+00> : vector<8x8xf32>
    %564 = tpu.matmul %559, %561, %cst_157 {dimension_numbers = #tpu.dot_dimension_numbers<[1], [1], [0], [0], [0, 0, 1, 0], [], []>} : vector<8x16xbf16>, vector<8x16xbf16>, vector<8x8xf32> -> vector<8x8xf32>
    %cst_158 = arith.constant 2.500000e-01 : f32
    %565 = vector.broadcast %cst_158 : f32 to vector<8x8xf32>
    %566 = arith.mulf %564, %565 : vector<8x8xf32>
    %567 = vector.broadcast %89 : vector<1x8xf32> to vector<8x8xf32>
    %568 = arith.addf %566, %567 : vector<8x8xf32>
    %cst_159 = arith.constant dense<0xFF800000> : vector<8xf32>
    %569 = vector.multi_reduction <maximumf>, %568, %cst_159 [1] : vector<8x8xf32> to vector<8xf32>
    %570 = vector.shape_cast %569 : vector<8xf32> to vector<8x1xf32>
    %571 = vector.broadcast %570 : vector<8x1xf32> to vector<8x8xf32>
    %572 = arith.subf %568, %571 : vector<8x8xf32>
    %573 = math.exp %572 : vector<8x8xf32>
    %cst_160 = arith.constant dense<0.000000e+00> : vector<8xf32>
    %574 = vector.multi_reduction <add>, %573, %cst_160 [1] : vector<8x8xf32> to vector<8xf32>
    %575 = vector.shape_cast %574 : vector<8xf32> to vector<8x1xf32>
    %576 = tpu.reciprocal %575 {approx = true} : vector<8x1xf32> -> vector<8x1xf32>
    %577 = vector.broadcast %576 : vector<8x1xf32> to vector<8x8xf32>
    %578 = arith.mulf %573, %577 : vector<8x8xf32>
    %579 = arith.truncf %578 : vector<8x8xf32> to vector<8x8xbf16>
    %cst_161 = arith.constant dense<0.000000e+00> : vector<8x16xf32>
    %580 = tpu.matmul %579, %563, %cst_161 {dimension_numbers = #tpu.dot_dimension_numbers<[1], [0], [0], [1], [0, 0, 1, 1], [], []>} : vector<8x8xbf16>, vector<8x16xbf16>, vector<8x16xf32> -> vector<8x16xf32>
    %581 = vector.extract_strided_slice %549 {offsets = [0, 16], sizes = [8, 16], strides = [1, 1]} : vector<8x64xf32> to vector<8x16xf32>
    %582 = arith.truncf %581 : vector<8x16xf32> to vector<8x16xbf16>
    %583 = vector.extract_strided_slice %553 {offsets = [0, 16], sizes = [8, 16], strides = [1, 1]} : vector<8x64xf32> to vector<8x16xf32>
    %584 = arith.truncf %583 : vector<8x16xf32> to vector<8x16xbf16>
    %585 = vector.extract_strided_slice %557 {offsets = [0, 16], sizes = [8, 16], strides = [1, 1]} : vector<8x64xf32> to vector<8x16xf32>
    %586 = arith.truncf %585 : vector<8x16xf32> to vector<8x16xbf16>
    %cst_162 = arith.constant dense<0.000000e+00> : vector<8x8xf32>
    %587 = tpu.matmul %582, %584, %cst_162 {dimension_numbers = #tpu.dot_dimension_numbers<[1], [1], [0], [0], [0, 0, 1, 0], [], []>} : vector<8x16xbf16>, vector<8x16xbf16>, vector<8x8xf32> -> vector<8x8xf32>
    %cst_163 = arith.constant 2.500000e-01 : f32
    %588 = vector.broadcast %cst_163 : f32 to vector<8x8xf32>
    %589 = arith.mulf %587, %588 : vector<8x8xf32>
    %590 = vector.broadcast %89 : vector<1x8xf32> to vector<8x8xf32>
    %591 = arith.addf %589, %590 : vector<8x8xf32>
    %cst_164 = arith.constant dense<0xFF800000> : vector<8xf32>
    %592 = vector.multi_reduction <maximumf>, %591, %cst_164 [1] : vector<8x8xf32> to vector<8xf32>
    %593 = vector.shape_cast %592 : vector<8xf32> to vector<8x1xf32>
    %594 = vector.broadcast %593 : vector<8x1xf32> to vector<8x8xf32>
    %595 = arith.subf %591, %594 : vector<8x8xf32>
    %596 = math.exp %595 : vector<8x8xf32>
    %cst_165 = arith.constant dense<0.000000e+00> : vector<8xf32>
    %597 = vector.multi_reduction <add>, %596, %cst_165 [1] : vector<8x8xf32> to vector<8xf32>
    %598 = vector.shape_cast %597 : vector<8xf32> to vector<8x1xf32>
    %599 = tpu.reciprocal %598 {approx = true} : vector<8x1xf32> -> vector<8x1xf32>
    %600 = vector.broadcast %599 : vector<8x1xf32> to vector<8x8xf32>
    %601 = arith.mulf %596, %600 : vector<8x8xf32>
    %602 = arith.truncf %601 : vector<8x8xf32> to vector<8x8xbf16>
    %cst_166 = arith.constant dense<0.000000e+00> : vector<8x16xf32>
    %603 = tpu.matmul %602, %586, %cst_166 {dimension_numbers = #tpu.dot_dimension_numbers<[1], [0], [0], [1], [0, 0, 1, 1], [], []>} : vector<8x8xbf16>, vector<8x16xbf16>, vector<8x16xf32> -> vector<8x16xf32>
    %604 = vector.extract_strided_slice %549 {offsets = [0, 32], sizes = [8, 16], strides = [1, 1]} : vector<8x64xf32> to vector<8x16xf32>
    %605 = arith.truncf %604 : vector<8x16xf32> to vector<8x16xbf16>
    %606 = vector.extract_strided_slice %553 {offsets = [0, 32], sizes = [8, 16], strides = [1, 1]} : vector<8x64xf32> to vector<8x16xf32>
    %607 = arith.truncf %606 : vector<8x16xf32> to vector<8x16xbf16>
    %608 = vector.extract_strided_slice %557 {offsets = [0, 32], sizes = [8, 16], strides = [1, 1]} : vector<8x64xf32> to vector<8x16xf32>
    %609 = arith.truncf %608 : vector<8x16xf32> to vector<8x16xbf16>
    %cst_167 = arith.constant dense<0.000000e+00> : vector<8x8xf32>
    %610 = tpu.matmul %605, %607, %cst_167 {dimension_numbers = #tpu.dot_dimension_numbers<[1], [1], [0], [0], [0, 0, 1, 0], [], []>} : vector<8x16xbf16>, vector<8x16xbf16>, vector<8x8xf32> -> vector<8x8xf32>
    %cst_168 = arith.constant 2.500000e-01 : f32
    %611 = vector.broadcast %cst_168 : f32 to vector<8x8xf32>
    %612 = arith.mulf %610, %611 : vector<8x8xf32>
    %613 = vector.broadcast %89 : vector<1x8xf32> to vector<8x8xf32>
    %614 = arith.addf %612, %613 : vector<8x8xf32>
    %cst_169 = arith.constant dense<0xFF800000> : vector<8xf32>
    %615 = vector.multi_reduction <maximumf>, %614, %cst_169 [1] : vector<8x8xf32> to vector<8xf32>
    %616 = vector.shape_cast %615 : vector<8xf32> to vector<8x1xf32>
    %617 = vector.broadcast %616 : vector<8x1xf32> to vector<8x8xf32>
    %618 = arith.subf %614, %617 : vector<8x8xf32>
    %619 = math.exp %618 : vector<8x8xf32>
    %cst_170 = arith.constant dense<0.000000e+00> : vector<8xf32>
    %620 = vector.multi_reduction <add>, %619, %cst_170 [1] : vector<8x8xf32> to vector<8xf32>
    %621 = vector.shape_cast %620 : vector<8xf32> to vector<8x1xf32>
    %622 = tpu.reciprocal %621 {approx = true} : vector<8x1xf32> -> vector<8x1xf32>
    %623 = vector.broadcast %622 : vector<8x1xf32> to vector<8x8xf32>
    %624 = arith.mulf %619, %623 : vector<8x8xf32>
    %625 = arith.truncf %624 : vector<8x8xf32> to vector<8x8xbf16>
    %cst_171 = arith.constant dense<0.000000e+00> : vector<8x16xf32>
    %626 = tpu.matmul %625, %609, %cst_171 {dimension_numbers = #tpu.dot_dimension_numbers<[1], [0], [0], [1], [0, 0, 1, 1], [], []>} : vector<8x8xbf16>, vector<8x16xbf16>, vector<8x16xf32> -> vector<8x16xf32>
    %627 = vector.extract_strided_slice %549 {offsets = [0, 48], sizes = [8, 16], strides = [1, 1]} : vector<8x64xf32> to vector<8x16xf32>
    %628 = arith.truncf %627 : vector<8x16xf32> to vector<8x16xbf16>
    %629 = vector.extract_strided_slice %553 {offsets = [0, 48], sizes = [8, 16], strides = [1, 1]} : vector<8x64xf32> to vector<8x16xf32>
    %630 = arith.truncf %629 : vector<8x16xf32> to vector<8x16xbf16>
    %631 = vector.extract_strided_slice %557 {offsets = [0, 48], sizes = [8, 16], strides = [1, 1]} : vector<8x64xf32> to vector<8x16xf32>
    %632 = arith.truncf %631 : vector<8x16xf32> to vector<8x16xbf16>
    %cst_172 = arith.constant dense<0.000000e+00> : vector<8x8xf32>
    %633 = tpu.matmul %628, %630, %cst_172 {dimension_numbers = #tpu.dot_dimension_numbers<[1], [1], [0], [0], [0, 0, 1, 0], [], []>} : vector<8x16xbf16>, vector<8x16xbf16>, vector<8x8xf32> -> vector<8x8xf32>
    %cst_173 = arith.constant 2.500000e-01 : f32
    %634 = vector.broadcast %cst_173 : f32 to vector<8x8xf32>
    %635 = arith.mulf %633, %634 : vector<8x8xf32>
    %636 = vector.broadcast %89 : vector<1x8xf32> to vector<8x8xf32>
    %637 = arith.addf %635, %636 : vector<8x8xf32>
    %cst_174 = arith.constant dense<0xFF800000> : vector<8xf32>
    %638 = vector.multi_reduction <maximumf>, %637, %cst_174 [1] : vector<8x8xf32> to vector<8xf32>
    %639 = vector.shape_cast %638 : vector<8xf32> to vector<8x1xf32>
    %640 = vector.broadcast %639 : vector<8x1xf32> to vector<8x8xf32>
    %641 = arith.subf %637, %640 : vector<8x8xf32>
    %642 = math.exp %641 : vector<8x8xf32>
    %cst_175 = arith.constant dense<0.000000e+00> : vector<8xf32>
    %643 = vector.multi_reduction <add>, %642, %cst_175 [1] : vector<8x8xf32> to vector<8xf32>
    %644 = vector.shape_cast %643 : vector<8xf32> to vector<8x1xf32>
    %645 = tpu.reciprocal %644 {approx = true} : vector<8x1xf32> -> vector<8x1xf32>
    %646 = vector.broadcast %645 : vector<8x1xf32> to vector<8x8xf32>
    %647 = arith.mulf %642, %646 : vector<8x8xf32>
    %648 = arith.truncf %647 : vector<8x8xf32> to vector<8x8xbf16>
    %cst_176 = arith.constant dense<0.000000e+00> : vector<8x16xf32>
    %649 = tpu.matmul %648, %632, %cst_176 {dimension_numbers = #tpu.dot_dimension_numbers<[1], [0], [0], [1], [0, 0, 1, 1], [], []>} : vector<8x8xbf16>, vector<8x16xbf16>, vector<8x16xf32> -> vector<8x16xf32>
    %650 = tpu.concatenate %580, %603, %626, %649 in 1 : vector<8x16xf32>, vector<8x16xf32>, vector<8x16xf32>, vector<8x16xf32> -> vector<8x64xf32>
    %651 = arith.truncf %650 : vector<8x64xf32> to vector<8x64xbf16>
    %c1_177 = arith.constant 1 : index
    %c0_178 = arith.constant 0 : index
    %c0_179 = arith.constant 0 : index
    %652 = vector.load %arg15[%c1_177, %c0_178, %c0_179] : memref<2x64x64xbf16, #tpu.memory_space<vmem>>, vector<1x64x64xbf16>
    %653 = vector.shape_cast %652 : vector<1x64x64xbf16> to vector<64x64xbf16>
    %cst_180 = arith.constant dense<0.000000e+00> : vector<8x64xf32>
    %654 = tpu.matmul %651, %653, %cst_180 {dimension_numbers = #tpu.dot_dimension_numbers<[1], [0], [0], [1], [0, 0, 1, 1], [], []>} : vector<8x64xbf16>, vector<64x64xbf16>, vector<8x64xf32> -> vector<8x64xf32>
    %655 = arith.addf %519, %654 : vector<8x64xf32>
    %656 = vector.extract_strided_slice %474 {offsets = [9, 0], sizes = [1, 64], strides = [1, 1]} : vector<24x64xf32> to vector<1x64xf32>
    %657 = vector.broadcast %656 : vector<1x64xf32> to vector<8x64xf32>
    %658 = arith.addf %655, %657 : vector<8x64xf32>
    %659 = vector.extract_strided_slice %474 {offsets = [10, 0], sizes = [1, 64], strides = [1, 1]} : vector<24x64xf32> to vector<1x64xf32>
    %660 = vector.extract_strided_slice %474 {offsets = [11, 0], sizes = [1, 64], strides = [1, 1]} : vector<24x64xf32> to vector<1x64xf32>
    %cst_181 = arith.constant dense<0.000000e+00> : vector<8xf32>
    %661 = vector.multi_reduction <add>, %658, %cst_181 [1] : vector<8x64xf32> to vector<8xf32>
    %662 = vector.shape_cast %661 : vector<8xf32> to vector<8x1xf32>
    %cst_182 = arith.constant 6.400000e+01 : f32
    %663 = vector.broadcast %cst_182 : f32 to vector<8x1xf32>
    %664 = arith.divf %662, %663 : vector<8x1xf32>
    %665 = vector.broadcast %664 : vector<8x1xf32> to vector<8x64xf32>
    %666 = arith.subf %658, %665 : vector<8x64xf32>
    %667 = arith.mulf %666, %666 : vector<8x64xf32>
    %cst_183 = arith.constant dense<0.000000e+00> : vector<8xf32>
    %668 = vector.multi_reduction <add>, %667, %cst_183 [1] : vector<8x64xf32> to vector<8xf32>
    %669 = vector.shape_cast %668 : vector<8xf32> to vector<8x1xf32>
    %cst_184 = arith.constant 6.400000e+01 : f32
    %670 = vector.broadcast %cst_184 : f32 to vector<8x1xf32>
    %671 = arith.divf %669, %670 : vector<8x1xf32>
    %cst_185 = arith.constant 9.99999974E-6 : f32
    %672 = vector.broadcast %cst_185 : f32 to vector<8x1xf32>
    %673 = arith.addf %671, %672 : vector<8x1xf32>
    %674 = math.rsqrt %673 : vector<8x1xf32>
    %675 = vector.broadcast %674 : vector<8x1xf32> to vector<8x64xf32>
    %676 = arith.mulf %666, %675 : vector<8x64xf32>
    %677 = vector.broadcast %659 : vector<1x64xf32> to vector<8x64xf32>
    %678 = arith.mulf %676, %677 : vector<8x64xf32>
    %679 = vector.broadcast %660 : vector<1x64xf32> to vector<8x64xf32>
    %680 = arith.addf %678, %679 : vector<8x64xf32>
    %681 = arith.truncf %680 : vector<8x64xf32> to vector<8x64xbf16>
    %c1_186 = arith.constant 1 : index
    %c0_187 = arith.constant 0 : index
    %c0_188 = arith.constant 0 : index
    %682 = vector.load %arg16[%c1_186, %c0_187, %c0_188] : memref<2x64x128xbf16, #tpu.memory_space<vmem>>, vector<1x64x128xbf16>
    %683 = vector.shape_cast %682 : vector<1x64x128xbf16> to vector<64x128xbf16>
    %cst_189 = arith.constant dense<0.000000e+00> : vector<8x128xf32>
    %684 = tpu.matmul %681, %683, %cst_189 {dimension_numbers = #tpu.dot_dimension_numbers<[1], [0], [0], [1], [0, 0, 1, 1], [], []>} : vector<8x64xbf16>, vector<64x128xbf16>, vector<8x128xf32> -> vector<8x128xf32>
    %685 = vector.extract_strided_slice %684 {offsets = [0, 0], sizes = [8, 64], strides = [1, 1]} : vector<8x128xf32> to vector<8x64xf32>
    %686 = vector.extract_strided_slice %474 {offsets = [12, 0], sizes = [1, 64], strides = [1, 1]} : vector<24x64xf32> to vector<1x64xf32>
    %687 = vector.broadcast %686 : vector<1x64xf32> to vector<8x64xf32>
    %688 = arith.addf %685, %687 : vector<8x64xf32>
    %689 = vector.extract_strided_slice %684 {offsets = [0, 64], sizes = [8, 64], strides = [1, 1]} : vector<8x128xf32> to vector<8x64xf32>
    %690 = vector.extract_strided_slice %474 {offsets = [13, 0], sizes = [1, 64], strides = [1, 1]} : vector<24x64xf32> to vector<1x64xf32>
    %691 = vector.broadcast %690 : vector<1x64xf32> to vector<8x64xf32>
    %692 = arith.addf %689, %691 : vector<8x64xf32>
    %693 = arith.negf %692 : vector<8x64xf32>
    %694 = math.exp %693 : vector<8x64xf32>
    %cst_190 = arith.constant 1.000000e+00 : f32
    %695 = vector.broadcast %cst_190 : f32 to vector<8x64xf32>
    %696 = arith.addf %695, %694 : vector<8x64xf32>
    %697 = arith.divf %695, %696 : vector<8x64xf32>
    %698 = arith.mulf %688, %697 : vector<8x64xf32>
    %cst_191 = arith.constant 0.000000e+00 : f32
    %699 = vector.broadcast %cst_191 : f32 to vector<4x64xf32>
    %cst_192 = arith.constant 0.000000e+00 : f32
    %700 = vector.broadcast %cst_192 : f32 to vector<4x64xf32>
    %701 = tpu.concatenate %699, %698, %700 in 0 : vector<4x64xf32>, vector<8x64xf32>, vector<4x64xf32> -> vector<16x64xf32>
    %c1_193 = arith.constant 1 : index
    %c0_194 = arith.constant 0 : index
    %c0_195 = arith.constant 0 : index
    %702 = vector.load %arg20[%c1_193, %c0_194, %c0_195] : memref<2x9x64xf32, #tpu.memory_space<vmem>>, vector<1x9x64xf32>
    %703 = vector.shape_cast %702 : vector<1x9x64xf32> to vector<9x64xf32>
    %cst_196 = arith.constant 0.000000e+00 : f32
    %704 = vector.broadcast %cst_196 : f32 to vector<8x64xf32>
    %705 = vector.extract_strided_slice %701 {offsets = [0, 0], sizes = [8, 64], strides = [1, 1]} : vector<16x64xf32> to vector<8x64xf32>
    %706 = vector.extract_strided_slice %703 {offsets = [0, 0], sizes = [1, 64], strides = [1, 1]} : vector<9x64xf32> to vector<1x64xf32>
    %707 = vector.broadcast %706 : vector<1x64xf32> to vector<8x64xf32>
    %708 = arith.mulf %705, %707 : vector<8x64xf32>
    %709 = arith.addf %704, %708 : vector<8x64xf32>
    %710 = vector.extract_strided_slice %701 {offsets = [1, 0], sizes = [8, 64], strides = [1, 1]} : vector<16x64xf32> to vector<8x64xf32>
    %711 = vector.extract_strided_slice %703 {offsets = [1, 0], sizes = [1, 64], strides = [1, 1]} : vector<9x64xf32> to vector<1x64xf32>
    %712 = vector.broadcast %711 : vector<1x64xf32> to vector<8x64xf32>
    %713 = arith.mulf %710, %712 : vector<8x64xf32>
    %714 = arith.addf %709, %713 : vector<8x64xf32>
    %715 = vector.extract_strided_slice %701 {offsets = [2, 0], sizes = [8, 64], strides = [1, 1]} : vector<16x64xf32> to vector<8x64xf32>
    %716 = vector.extract_strided_slice %703 {offsets = [2, 0], sizes = [1, 64], strides = [1, 1]} : vector<9x64xf32> to vector<1x64xf32>
    %717 = vector.broadcast %716 : vector<1x64xf32> to vector<8x64xf32>
    %718 = arith.mulf %715, %717 : vector<8x64xf32>
    %719 = arith.addf %714, %718 : vector<8x64xf32>
    %720 = vector.extract_strided_slice %701 {offsets = [3, 0], sizes = [8, 64], strides = [1, 1]} : vector<16x64xf32> to vector<8x64xf32>
    %721 = vector.extract_strided_slice %703 {offsets = [3, 0], sizes = [1, 64], strides = [1, 1]} : vector<9x64xf32> to vector<1x64xf32>
    %722 = vector.broadcast %721 : vector<1x64xf32> to vector<8x64xf32>
    %723 = arith.mulf %720, %722 : vector<8x64xf32>
    %724 = arith.addf %719, %723 : vector<8x64xf32>
    %725 = vector.extract_strided_slice %701 {offsets = [4, 0], sizes = [8, 64], strides = [1, 1]} : vector<16x64xf32> to vector<8x64xf32>
    %726 = vector.extract_strided_slice %703 {offsets = [4, 0], sizes = [1, 64], strides = [1, 1]} : vector<9x64xf32> to vector<1x64xf32>
    %727 = vector.broadcast %726 : vector<1x64xf32> to vector<8x64xf32>
    %728 = arith.mulf %725, %727 : vector<8x64xf32>
    %729 = arith.addf %724, %728 : vector<8x64xf32>
    %730 = vector.extract_strided_slice %701 {offsets = [5, 0], sizes = [8, 64], strides = [1, 1]} : vector<16x64xf32> to vector<8x64xf32>
    %731 = vector.extract_strided_slice %703 {offsets = [5, 0], sizes = [1, 64], strides = [1, 1]} : vector<9x64xf32> to vector<1x64xf32>
    %732 = vector.broadcast %731 : vector<1x64xf32> to vector<8x64xf32>
    %733 = arith.mulf %730, %732 : vector<8x64xf32>
    %734 = arith.addf %729, %733 : vector<8x64xf32>
    %735 = vector.extract_strided_slice %701 {offsets = [6, 0], sizes = [8, 64], strides = [1, 1]} : vector<16x64xf32> to vector<8x64xf32>
    %736 = vector.extract_strided_slice %703 {offsets = [6, 0], sizes = [1, 64], strides = [1, 1]} : vector<9x64xf32> to vector<1x64xf32>
    %737 = vector.broadcast %736 : vector<1x64xf32> to vector<8x64xf32>
    %738 = arith.mulf %735, %737 : vector<8x64xf32>
    %739 = arith.addf %734, %738 : vector<8x64xf32>
    %740 = vector.extract_strided_slice %701 {offsets = [7, 0], sizes = [8, 64], strides = [1, 1]} : vector<16x64xf32> to vector<8x64xf32>
    %741 = vector.extract_strided_slice %703 {offsets = [7, 0], sizes = [1, 64], strides = [1, 1]} : vector<9x64xf32> to vector<1x64xf32>
    %742 = vector.broadcast %741 : vector<1x64xf32> to vector<8x64xf32>
    %743 = arith.mulf %740, %742 : vector<8x64xf32>
    %744 = arith.addf %739, %743 : vector<8x64xf32>
    %745 = vector.extract_strided_slice %701 {offsets = [8, 0], sizes = [8, 64], strides = [1, 1]} : vector<16x64xf32> to vector<8x64xf32>
    %746 = vector.extract_strided_slice %703 {offsets = [8, 0], sizes = [1, 64], strides = [1, 1]} : vector<9x64xf32> to vector<1x64xf32>
    %747 = vector.broadcast %746 : vector<1x64xf32> to vector<8x64xf32>
    %748 = arith.mulf %745, %747 : vector<8x64xf32>
    %749 = arith.addf %744, %748 : vector<8x64xf32>
    %750 = vector.extract_strided_slice %474 {offsets = [14, 0], sizes = [1, 64], strides = [1, 1]} : vector<24x64xf32> to vector<1x64xf32>
    %751 = vector.broadcast %750 : vector<1x64xf32> to vector<8x64xf32>
    %752 = arith.addf %749, %751 : vector<8x64xf32>
    %753 = vector.extract_strided_slice %474 {offsets = [15, 0], sizes = [1, 64], strides = [1, 1]} : vector<24x64xf32> to vector<1x64xf32>
    %754 = vector.extract_strided_slice %474 {offsets = [16, 0], sizes = [1, 64], strides = [1, 1]} : vector<24x64xf32> to vector<1x64xf32>
    %cst_197 = arith.constant dense<0.000000e+00> : vector<8xf32>
    %755 = vector.multi_reduction <add>, %752, %cst_197 [1] : vector<8x64xf32> to vector<8xf32>
    %756 = vector.shape_cast %755 : vector<8xf32> to vector<8x1xf32>
    %cst_198 = arith.constant 6.400000e+01 : f32
    %757 = vector.broadcast %cst_198 : f32 to vector<8x1xf32>
    %758 = arith.divf %756, %757 : vector<8x1xf32>
    %759 = vector.broadcast %758 : vector<8x1xf32> to vector<8x64xf32>
    %760 = arith.subf %752, %759 : vector<8x64xf32>
    %761 = arith.mulf %760, %760 : vector<8x64xf32>
    %cst_199 = arith.constant dense<0.000000e+00> : vector<8xf32>
    %762 = vector.multi_reduction <add>, %761, %cst_199 [1] : vector<8x64xf32> to vector<8xf32>
    %763 = vector.shape_cast %762 : vector<8xf32> to vector<8x1xf32>
    %cst_200 = arith.constant 6.400000e+01 : f32
    %764 = vector.broadcast %cst_200 : f32 to vector<8x1xf32>
    %765 = arith.divf %763, %764 : vector<8x1xf32>
    %cst_201 = arith.constant 9.99999974E-6 : f32
    %766 = vector.broadcast %cst_201 : f32 to vector<8x1xf32>
    %767 = arith.addf %765, %766 : vector<8x1xf32>
    %768 = math.rsqrt %767 : vector<8x1xf32>
    %769 = vector.broadcast %768 : vector<8x1xf32> to vector<8x64xf32>
    %770 = arith.mulf %760, %769 : vector<8x64xf32>
    %771 = vector.broadcast %753 : vector<1x64xf32> to vector<8x64xf32>
    %772 = arith.mulf %770, %771 : vector<8x64xf32>
    %773 = vector.broadcast %754 : vector<1x64xf32> to vector<8x64xf32>
    %774 = arith.addf %772, %773 : vector<8x64xf32>
    %775 = arith.negf %774 : vector<8x64xf32>
    %776 = math.exp %775 : vector<8x64xf32>
    %cst_202 = arith.constant 1.000000e+00 : f32
    %777 = vector.broadcast %cst_202 : f32 to vector<8x64xf32>
    %778 = arith.addf %777, %776 : vector<8x64xf32>
    %779 = arith.divf %777, %778 : vector<8x64xf32>
    %780 = arith.mulf %774, %779 : vector<8x64xf32>
    %781 = arith.truncf %780 : vector<8x64xf32> to vector<8x64xbf16>
    %c1_203 = arith.constant 1 : index
    %c0_204 = arith.constant 0 : index
    %c0_205 = arith.constant 0 : index
    %782 = vector.load %arg17[%c1_203, %c0_204, %c0_205] : memref<2x64x64xbf16, #tpu.memory_space<vmem>>, vector<1x64x64xbf16>
    %783 = vector.shape_cast %782 : vector<1x64x64xbf16> to vector<64x64xbf16>
    %cst_206 = arith.constant dense<0.000000e+00> : vector<8x64xf32>
    %784 = tpu.matmul %781, %783, %cst_206 {dimension_numbers = #tpu.dot_dimension_numbers<[1], [0], [0], [1], [0, 0, 1, 1], [], []>} : vector<8x64xbf16>, vector<64x64xbf16>, vector<8x64xf32> -> vector<8x64xf32>
    %785 = arith.addf %658, %784 : vector<8x64xf32>
    %786 = vector.extract_strided_slice %474 {offsets = [17, 0], sizes = [1, 64], strides = [1, 1]} : vector<24x64xf32> to vector<1x64xf32>
    %787 = vector.broadcast %786 : vector<1x64xf32> to vector<8x64xf32>
    %788 = arith.addf %785, %787 : vector<8x64xf32>
    %789 = vector.extract_strided_slice %474 {offsets = [18, 0], sizes = [1, 64], strides = [1, 1]} : vector<24x64xf32> to vector<1x64xf32>
    %790 = vector.extract_strided_slice %474 {offsets = [19, 0], sizes = [1, 64], strides = [1, 1]} : vector<24x64xf32> to vector<1x64xf32>
    %cst_207 = arith.constant dense<0.000000e+00> : vector<8xf32>
    %791 = vector.multi_reduction <add>, %788, %cst_207 [1] : vector<8x64xf32> to vector<8xf32>
    %792 = vector.shape_cast %791 : vector<8xf32> to vector<8x1xf32>
    %cst_208 = arith.constant 6.400000e+01 : f32
    %793 = vector.broadcast %cst_208 : f32 to vector<8x1xf32>
    %794 = arith.divf %792, %793 : vector<8x1xf32>
    %795 = vector.broadcast %794 : vector<8x1xf32> to vector<8x64xf32>
    %796 = arith.subf %788, %795 : vector<8x64xf32>
    %797 = arith.mulf %796, %796 : vector<8x64xf32>
    %cst_209 = arith.constant dense<0.000000e+00> : vector<8xf32>
    %798 = vector.multi_reduction <add>, %797, %cst_209 [1] : vector<8x64xf32> to vector<8xf32>
    %799 = vector.shape_cast %798 : vector<8xf32> to vector<8x1xf32>
    %cst_210 = arith.constant 6.400000e+01 : f32
    %800 = vector.broadcast %cst_210 : f32 to vector<8x1xf32>
    %801 = arith.divf %799, %800 : vector<8x1xf32>
    %cst_211 = arith.constant 9.99999974E-6 : f32
    %802 = vector.broadcast %cst_211 : f32 to vector<8x1xf32>
    %803 = arith.addf %801, %802 : vector<8x1xf32>
    %804 = math.rsqrt %803 : vector<8x1xf32>
    %805 = vector.broadcast %804 : vector<8x1xf32> to vector<8x64xf32>
    %806 = arith.mulf %796, %805 : vector<8x64xf32>
    %807 = vector.broadcast %789 : vector<1x64xf32> to vector<8x64xf32>
    %808 = arith.mulf %806, %807 : vector<8x64xf32>
    %809 = vector.broadcast %790 : vector<1x64xf32> to vector<8x64xf32>
    %810 = arith.addf %808, %809 : vector<8x64xf32>
    %811 = arith.truncf %810 : vector<8x64xf32> to vector<8x64xbf16>
    %c1_212 = arith.constant 1 : index
    %c0_213 = arith.constant 0 : index
    %c0_214 = arith.constant 0 : index
    %812 = vector.load %arg18[%c1_212, %c0_213, %c0_214] : memref<2x64x64xbf16, #tpu.memory_space<vmem>>, vector<1x64x64xbf16>
    %813 = vector.shape_cast %812 : vector<1x64x64xbf16> to vector<64x64xbf16>
    %cst_215 = arith.constant dense<0.000000e+00> : vector<8x64xf32>
    %814 = tpu.matmul %811, %813, %cst_215 {dimension_numbers = #tpu.dot_dimension_numbers<[1], [0], [0], [1], [0, 0, 1, 1], [], []>} : vector<8x64xbf16>, vector<64x64xbf16>, vector<8x64xf32> -> vector<8x64xf32>
    %815 = vector.extract_strided_slice %474 {offsets = [20, 0], sizes = [1, 64], strides = [1, 1]} : vector<24x64xf32> to vector<1x64xf32>
    %816 = vector.broadcast %815 : vector<1x64xf32> to vector<8x64xf32>
    %817 = arith.addf %814, %816 : vector<8x64xf32>
    %818 = arith.negf %817 : vector<8x64xf32>
    %819 = math.exp %818 : vector<8x64xf32>
    %cst_216 = arith.constant 1.000000e+00 : f32
    %820 = vector.broadcast %cst_216 : f32 to vector<8x64xf32>
    %821 = arith.addf %820, %819 : vector<8x64xf32>
    %822 = arith.divf %820, %821 : vector<8x64xf32>
    %823 = arith.mulf %817, %822 : vector<8x64xf32>
    %824 = arith.truncf %823 : vector<8x64xf32> to vector<8x64xbf16>
    %c1_217 = arith.constant 1 : index
    %c0_218 = arith.constant 0 : index
    %c0_219 = arith.constant 0 : index
    %825 = vector.load %arg19[%c1_217, %c0_218, %c0_219] : memref<2x64x64xbf16, #tpu.memory_space<vmem>>, vector<1x64x64xbf16>
    %826 = vector.shape_cast %825 : vector<1x64x64xbf16> to vector<64x64xbf16>
    %cst_220 = arith.constant dense<0.000000e+00> : vector<8x64xf32>
    %827 = tpu.matmul %824, %826, %cst_220 {dimension_numbers = #tpu.dot_dimension_numbers<[1], [0], [0], [1], [0, 0, 1, 1], [], []>} : vector<8x64xbf16>, vector<64x64xbf16>, vector<8x64xf32> -> vector<8x64xf32>
    %828 = vector.extract_strided_slice %474 {offsets = [21, 0], sizes = [1, 64], strides = [1, 1]} : vector<24x64xf32> to vector<1x64xf32>
    %829 = vector.broadcast %828 : vector<1x64xf32> to vector<8x64xf32>
    %830 = arith.addf %827, %829 : vector<8x64xf32>
    %cst_221 = arith.constant 5.000000e-01 : f32
    %831 = vector.broadcast %cst_221 : f32 to vector<8x64xf32>
    %832 = arith.mulf %831, %830 : vector<8x64xf32>
    %833 = arith.addf %788, %832 : vector<8x64xf32>
    %834 = vector.extract_strided_slice %474 {offsets = [22, 0], sizes = [1, 64], strides = [1, 1]} : vector<24x64xf32> to vector<1x64xf32>
    %835 = vector.extract_strided_slice %474 {offsets = [23, 0], sizes = [1, 64], strides = [1, 1]} : vector<24x64xf32> to vector<1x64xf32>
    %cst_222 = arith.constant dense<0.000000e+00> : vector<8xf32>
    %836 = vector.multi_reduction <add>, %833, %cst_222 [1] : vector<8x64xf32> to vector<8xf32>
    %837 = vector.shape_cast %836 : vector<8xf32> to vector<8x1xf32>
    %cst_223 = arith.constant 6.400000e+01 : f32
    %838 = vector.broadcast %cst_223 : f32 to vector<8x1xf32>
    %839 = arith.divf %837, %838 : vector<8x1xf32>
    %840 = vector.broadcast %839 : vector<8x1xf32> to vector<8x64xf32>
    %841 = arith.subf %833, %840 : vector<8x64xf32>
    %842 = arith.mulf %841, %841 : vector<8x64xf32>
    %cst_224 = arith.constant dense<0.000000e+00> : vector<8xf32>
    %843 = vector.multi_reduction <add>, %842, %cst_224 [1] : vector<8x64xf32> to vector<8xf32>
    %844 = vector.shape_cast %843 : vector<8xf32> to vector<8x1xf32>
    %cst_225 = arith.constant 6.400000e+01 : f32
    %845 = vector.broadcast %cst_225 : f32 to vector<8x1xf32>
    %846 = arith.divf %844, %845 : vector<8x1xf32>
    %cst_226 = arith.constant 9.99999974E-6 : f32
    %847 = vector.broadcast %cst_226 : f32 to vector<8x1xf32>
    %848 = arith.addf %846, %847 : vector<8x1xf32>
    %849 = math.rsqrt %848 : vector<8x1xf32>
    %850 = vector.broadcast %849 : vector<8x1xf32> to vector<8x64xf32>
    %851 = arith.mulf %841, %850 : vector<8x64xf32>
    %852 = vector.broadcast %834 : vector<1x64xf32> to vector<8x64xf32>
    %853 = arith.mulf %851, %852 : vector<8x64xf32>
    %854 = vector.broadcast %835 : vector<1x64xf32> to vector<8x64xf32>
    %855 = arith.addf %853, %854 : vector<8x64xf32>
    %856 = arith.truncf %855 : vector<8x64xf32> to vector<8x64xbf16>
    %c0_227 = arith.constant 0 : index
    %c0_228 = arith.constant 0 : index
    %857 = vector.load %arg21[%c0_227, %c0_228] : memref<64x128xbf16, #tpu.memory_space<vmem>>, vector<64x128xbf16>
    %cst_229 = arith.constant dense<0.000000e+00> : vector<8x128xf32>
    %858 = tpu.matmul %856, %857, %cst_229 {dimension_numbers = #tpu.dot_dimension_numbers<[1], [0], [0], [1], [0, 0, 1, 1], [], []>} : vector<8x64xbf16>, vector<64x128xbf16>, vector<8x128xf32> -> vector<8x128xf32>
    %c0_230 = arith.constant 0 : index
    %c0_231 = arith.constant 0 : index
    %859 = vector.load %arg22[%c0_230, %c0_231] : memref<1x128xf32, #tpu.memory_space<vmem>>, vector<1x128xf32>
    %860 = vector.broadcast %859 : vector<1x128xf32> to vector<8x128xf32>
    %861 = arith.addf %858, %860 : vector<8x128xf32>
    %cst_232 = arith.constant dense<0xFF800000> : vector<8xf32>
    %862 = vector.multi_reduction <maximumf>, %861, %cst_232 [1] : vector<8x128xf32> to vector<8xf32>
    %863 = vector.shape_cast %862 : vector<8xf32> to vector<8x1xf32>
    %864 = vector.broadcast %863 : vector<8x1xf32> to vector<8x128xf32>
    %865 = arith.subf %861, %864 : vector<8x128xf32>
    %866 = math.exp %865 : vector<8x128xf32>
    %cst_233 = arith.constant dense<0.000000e+00> : vector<8xf32>
    %867 = vector.multi_reduction <add>, %866, %cst_233 [1] : vector<8x128xf32> to vector<8xf32>
    %868 = vector.shape_cast %867 : vector<8xf32> to vector<8x1xf32>
    %869 = math.log %868 : vector<8x1xf32>
    %870 = arith.addf %863, %869 : vector<8x1xf32>
    %871 = vector.broadcast %870 : vector<8x1xf32> to vector<8x128xf32>
    %872 = arith.subf %861, %871 : vector<8x128xf32>
    %c0_234 = arith.constant 0 : index
    %c0_235 = arith.constant 0 : index
    %c0_236 = arith.constant 0 : index
    %873 = vector.load %arg23[%c0_234, %c0_235, %c0_236] : memref<1x8x128xf32, #tpu.memory_space<vmem>>, vector<1x8x128xf32>
    %874 = vector.shape_cast %873 : vector<1x8x128xf32> to vector<8x128xf32>
    %875 = vector.shape_cast %872 : vector<8x128xf32> to vector<1x8x128xf32>
    tpu.vector_store %arg23[%c0_234, %c0_235, %c0_236], %875 {strides = array<i32>} : memref<1x8x128xf32, #tpu.memory_space<vmem>>, vector<1x8x128xf32>,
    return
  }
  func.func @transform_0(%arg0: i32) -> (i32, i32, i32) {
    %c0_i32 = arith.constant 0 : i32
    %c0_i32_0 = arith.constant 0 : i32
    %c0_i32_1 = arith.constant 0 : i32
    return %arg0, %c0_i32, %c0_i32_0 : i32, i32, i32
  }
  func.func @transform_1(%arg0: i32) -> (i32, i32, i32) {
    %c0_i32 = arith.constant 0 : i32
    %c0_i32_0 = arith.constant 0 : i32
    %c0_i32_1 = arith.constant 0 : i32
    return %arg0, %c0_i32, %c0_i32_0 : i32, i32, i32
  }
  func.func @transform_2(%arg0: i32) -> (i32, i32) {
    %c0_i32 = arith.constant 0 : i32
    %c0_i32_0 = arith.constant 0 : i32
    %c0_i32_1 = arith.constant 0 : i32
    return %c0_i32, %c0_i32_0 : i32, i32
  }
  func.func @transform_3(%arg0: i32) -> (i32, i32) {
    %c0_i32 = arith.constant 0 : i32
    %c0_i32_0 = arith.constant 0 : i32
    %c0_i32_1 = arith.constant 0 : i32
    return %c0_i32, %c0_i32_0 : i32, i32
  }
  func.func @transform_4(%arg0: i32) -> (i32, i32) {
    %c0_i32 = arith.constant 0 : i32
    %c0_i32_0 = arith.constant 0 : i32
    %c0_i32_1 = arith.constant 0 : i32
    return %c0_i32, %c0_i32_0 : i32, i32
  }
  func.func @transform_5(%arg0: i32) -> (i32, i32) {
    %c0_i32 = arith.constant 0 : i32
    %c0_i32_0 = arith.constant 0 : i32
    %c0_i32_1 = arith.constant 0 : i32
    return %c0_i32, %c0_i32_0 : i32, i32
  }
  func.func @transform_6(%arg0: i32) -> (i32, i32) {
    %c0_i32 = arith.constant 0 : i32
    %c0_i32_0 = arith.constant 0 : i32
    %c0_i32_1 = arith.constant 0 : i32
    return %c0_i32, %c0_i32_0 : i32, i32
  }
  func.func @transform_7(%arg0: i32) -> (i32, i32) {
    %c0_i32 = arith.constant 0 : i32
    %c0_i32_0 = arith.constant 0 : i32
    %c0_i32_1 = arith.constant 0 : i32
    return %c0_i32, %c0_i32_0 : i32, i32
  }
  func.func @transform_8(%arg0: i32) -> (i32, i32) {
    %c0_i32 = arith.constant 0 : i32
    %c0_i32_0 = arith.constant 0 : i32
    %c0_i32_1 = arith.constant 0 : i32
    return %c0_i32, %c0_i32_0 : i32, i32
  }
  func.func @transform_9(%arg0: i32) -> (i32, i32) {
    %c0_i32 = arith.constant 0 : i32
    %c0_i32_0 = arith.constant 0 : i32
    %c0_i32_1 = arith.constant 0 : i32
    return %c0_i32, %c0_i32_0 : i32, i32
  }
  func.func @transform_10(%arg0: i32) -> (i32, i32, i32) {
    %c0_i32 = arith.constant 0 : i32
    %c0_i32_0 = arith.constant 0 : i32
    %c0_i32_1 = arith.constant 0 : i32
    %c0_i32_2 = arith.constant 0 : i32
    return %c0_i32, %c0_i32_0, %c0_i32_1 : i32, i32, i32
  }
  func.func @transform_11(%arg0: i32) -> (i32, i32, i32) {
    %c0_i32 = arith.constant 0 : i32
    %c0_i32_0 = arith.constant 0 : i32
    %c0_i32_1 = arith.constant 0 : i32
    %c0_i32_2 = arith.constant 0 : i32
    return %c0_i32, %c0_i32_0, %c0_i32_1 : i32, i32, i32
  }
  func.func @transform_12(%arg0: i32) -> (i32, i32, i32) {
    %c0_i32 = arith.constant 0 : i32
    %c0_i32_0 = arith.constant 0 : i32
    %c0_i32_1 = arith.constant 0 : i32
    %c0_i32_2 = arith.constant 0 : i32
    return %c0_i32, %c0_i32_0, %c0_i32_1 : i32, i32, i32
  }
  func.func @transform_13(%arg0: i32) -> (i32, i32, i32) {
    %c0_i32 = arith.constant 0 : i32
    %c0_i32_0 = arith.constant 0 : i32
    %c0_i32_1 = arith.constant 0 : i32
    %c0_i32_2 = arith.constant 0 : i32
    return %c0_i32, %c0_i32_0, %c0_i32_1 : i32, i32, i32
  }
  func.func @transform_14(%arg0: i32) -> (i32, i32, i32) {
    %c0_i32 = arith.constant 0 : i32
    %c0_i32_0 = arith.constant 0 : i32
    %c0_i32_1 = arith.constant 0 : i32
    %c0_i32_2 = arith.constant 0 : i32
    return %c0_i32, %c0_i32_0, %c0_i32_1 : i32, i32, i32
  }
  func.func @transform_15(%arg0: i32) -> (i32, i32, i32) {
    %c0_i32 = arith.constant 0 : i32
    %c0_i32_0 = arith.constant 0 : i32
    %c0_i32_1 = arith.constant 0 : i32
    %c0_i32_2 = arith.constant 0 : i32
    return %c0_i32, %c0_i32_0, %c0_i32_1 : i32, i32, i32
  }
  func.func @transform_16(%arg0: i32) -> (i32, i32, i32) {
    %c0_i32 = arith.constant 0 : i32
    %c0_i32_0 = arith.constant 0 : i32
    %c0_i32_1 = arith.constant 0 : i32
    %c0_i32_2 = arith.constant 0 : i32
    return %c0_i32, %c0_i32_0, %c0_i32_1 : i32, i32, i32
  }
  func.func @transform_17(%arg0: i32) -> (i32, i32, i32) {
    %c0_i32 = arith.constant 0 : i32
    %c0_i32_0 = arith.constant 0 : i32
    %c0_i32_1 = arith.constant 0 : i32
    %c0_i32_2 = arith.constant 0 : i32
    return %c0_i32, %c0_i32_0, %c0_i32_1 : i32, i32, i32
  }
  func.func @transform_18(%arg0: i32) -> (i32, i32, i32) {
    %c0_i32 = arith.constant 0 : i32
    %c0_i32_0 = arith.constant 0 : i32
    %c0_i32_1 = arith.constant 0 : i32
    %c0_i32_2 = arith.constant 0 : i32
    return %c0_i32, %c0_i32_0, %c0_i32_1 : i32, i32, i32
  }
  func.func @transform_19(%arg0: i32) -> (i32, i32, i32) {
    %c0_i32 = arith.constant 0 : i32
    %c0_i32_0 = arith.constant 0 : i32
    %c0_i32_1 = arith.constant 0 : i32
    %c0_i32_2 = arith.constant 0 : i32
    return %c0_i32, %c0_i32_0, %c0_i32_1 : i32, i32, i32
  }
  func.func @transform_20(%arg0: i32) -> (i32, i32) {
    %c0_i32 = arith.constant 0 : i32
    %c0_i32_0 = arith.constant 0 : i32
    %c0_i32_1 = arith.constant 0 : i32
    return %c0_i32, %c0_i32_0 : i32, i32
  }
  func.func @transform_21(%arg0: i32) -> (i32, i32) {
    %c0_i32 = arith.constant 0 : i32
    %c0_i32_0 = arith.constant 0 : i32
    %c0_i32_1 = arith.constant 0 : i32
    return %c0_i32, %c0_i32_0 : i32, i32
  }
  func.func @transform_22(%arg0: i32) -> (i32, i32, i32) {
    %c0_i32 = arith.constant 0 : i32
    %c0_i32_0 = arith.constant 0 : i32
    %c0_i32_1 = arith.constant 0 : i32
    return %arg0, %c0_i32, %c0_i32_0 : i32, i32, i32
  }
}

</mosaic_0001>

<bundles_post_ra>
// kernel: model_forward.1
= control target key start
LH: loop header
LB: loop body
LE: loop exit
PB: predicated region body
PF: predicated region fallthrough
CT: control target
= control target key end

     0   :  { %s7489_s0 = inlined_call_operand.vmem [shape: f32[2,50,16], index: 0, kind: input, shape index: {}]   ;;  %s7490_s1 = inlined_call_operand.vmem [shape: f32[2,1,8], index: 1, kind: input, shape index: {}]   ;;  %s7491_s2 = inlined_call_operand.hbm [shape: bf16[48,128], index: 2, kind: input, shape index: {}]   ;;  %s7492_s3 = inlined_call_operand.hbm [shape: f32[1,128], index: 3, kind: input, shape index: {}]   ;;  %s7493_s4 = inlined_call_operand.hbm [shape: bf16[48,48], index: 4, kind: input, shape index: {}]   ;;  %s7494_s5 = inlined_call_operand.vmem [shape: bf16[192,64], index: 5, kind: input, shape index: {}]   ;;  %s7495_s6 = inlined_call_operand.vmem [shape: bf16[24,16], index: 6, kind: input, shape index: {}]   ;;  %s7496_s7 = inlined_call_operand.vmem [shape: bf16[192,64], index: 7, kind: input, shape index: {}]   ;;  %s7497_s8 = inlined_call_operand.vmem [shape: bf16[64,64], index: 8, kind: input, shape index: {}]   ;;  %s7498_s9 = inlined_call_operand.hbm [shape: f32[5,64], index: 9, kind: input, shape index: {}]   ;;  %s7499_s10 = inlined_call_operand.hbm [shape: f32[2,24,64], index: 10, kind: input, shape index: {}]   ;;  %s7500_s11 = inlined_call_operand.vmem [shape: bf16[2,64,64], index: 11, kind: input, shape index: {}]   ;;  %s7501_s12 = inlined_call_operand.vmem [shape: bf16[2,64,64], index: 12, kind: input, shape index: {}]   ;;  %s7502_s13 = inlined_call_operand.vmem [shape: bf16[2,64,192], index: 13, kind: input, shape index: {}]   ;;  %s7503_s14 = inlined_call_operand.vmem [shape: bf16[2,64,64], index: 14, kind: input, shape index: {}]   ;;  %s7504_s15 = inlined_call_operand.vmem [shape: bf16[2,64,128], index: 15, kind: input, shape index: {}]   ;;  %s7505_s16 = inlined_call_operand.vmem [shape: bf16[2,64,64], index: 16, kind: input, shape index: {}]   ;;  %s7506_s17 = inlined_call_operand.vmem [shape: bf16[2,64,64], index: 17, kind: input, shape index: {}]   ;;  %s7507_s18 = inlined_call_operand.vmem [shape: bf16[2,64,64], index: 18, kind: input, shape index: {}]   ;;  %s7508_s19 = inlined_call_operand.vmem [shape: f32[2,9,64], index: 19, kind: input, shape index: {}]   ;;  %s7509_s20 = inlined_call_operand.hbm [shape: bf16[64,128], index: 20, kind: input, shape index: {}]   ;;  %s7510_s21 = inlined_call_operand.hbm [shape: f32[1,128], index: 21, kind: input, shape index: {}]   ;;  %s7511_s22 = inlined_call_operand.hbm [shape: f32[2,8,128], index: 22, kind: output, shape index: {}]  }
   0x1   :  { %7538 = sst [smem:[#allocation26_spill]] %s7489_s0 }
   0x2   :  { %7539 = sst [smem:[#allocation27_spill]] %s7490_s1 }
   0x3   :  { %7540 = sst [smem:[#allocation28_spill]] %s7491_s2 }
   0x4   :  { %7541 = sst [smem:[#allocation29_spill]] %s7492_s3 }
   0x5   :  { %7542 = sst [smem:[#allocation30_spill]] %s7493_s4 }
   0x6   :  { %7543 = sst [smem:[#allocation31_spill]] %s7494_s5 }
   0x7   :  { %7544 = sst [smem:[#allocation32_spill]] %s7495_s6 }
   0x8   :  { %7545 = sst [smem:[#allocation33_spill]] %s7498_s9 }
   0x9   :  { %7546 = sst [smem:[#allocation34_spill]] %s7509_s20 }
   0xa   :  { %27 = vsyncpa [#allocation3], 0 }
   0xb   :  { %28 = vsyncpa [#allocation6], 0 }
   0xc   :  { %29 = vsyncpa [#allocation9], 0 }
   0xd   :  { %30 = vsyncpa [#allocation12], 0 }
   0xe   :  { %31 = vsyncpa [#allocation4], 0 }
   0xf   :  { %33 = vsyncpa [#allocation4 + $0x1], 0  ;;  %s6350_s3 = smov 0   ;;  %s6352_s28 = smov 0  }
  0x10   :  { %s6354_s29 = smov 0   ;;  %s6356_s30 = smov 0  }
  0x11 LB: > { %7547 = sst [smem:[#allocation20_spill]] %s6199_s3  ;;  %s6371_s4 = sadd.s32 4294967295, %s6211_s30   ;;  %s6211_s30 = sphi %s6356_s30, %s7589_s30   ;;  %s6207_s29 = sphi %s6354_s29, %s7591_s29   ;;  %s6203_s28 = sphi %s6352_s28, %s7593_s28   ;;  %s6199_s3 = sphi %s6350_s3, %s7592_s3  }
  0x12   : > { %7548 = sst [smem:[#allocation21_spill]] %s6207_s29  ;;  %s4802_s0 = sadd.s32 4294967294, %s6211_s30  }
  0x13   : > { %7549 = sst [smem:[#allocation22_spill]] %s6211_s30  ;;  %s6375_s23 = sadd.s32 1, %s6211_s30  }
  0x14   : > { %7550 = sst [smem:[#allocation23_spill]] %s6375_s23  ;;  %s518_s1 = sadd.s32 1, %s6207_s29 }
  0x15   : > { %s515_s5 = ssub.s32 %s6211_s30, %s6375_s23  ;;  %p528_p0 = scmp.ne.s32.totalorder %s6207_s29, %s6203_s28 }
  0x16   : > { %p516_p1 = scmp.eq.s32.totalorder %s515_s5, 0  ;;  %p529_p2 = scmp.eq.s32.totalorder %s6371_s4, 1 }
  0x17   : > { %p534_p3 = scmp.ne.s32.totalorder %s6203_s28, %s6199_s3  ;;  %p535_p4 = scmp.eq.s32.totalorder %s4802_s0, 1 }
  0x18   : > { %s6386_s24 = scalar_select %p516_p1, %s6207_s29, %s518_s1  }
  0x19   : > { %p6388_p5 = por %p529_p2, %p528_p0  ;;  %p6392_p6 = por %p535_p4, %p534_p3 }
  0x1a   : > { %7551 = sst [smem:[#allocation24_spill]] %s6386_s24  ;;  %p4803_p7 = scmp.ge.s32.totalorder %s6211_s30, 1 }
  0x1b   : > { %s7552_s6 = scalar_select %p6388_p5, 1, 0 }
  0x1c   : > { %s7553_s25 = scalar_select %p6392_p6, 1, 0 }
  0x1d   : > { %p542_p8 = scmp.lt.s32.totalorder %s6211_s30, 3  ;;  %p7520_p9 = scmp.eq.s32.totalorder %s6371_s4, 0 }
  0x1e   : > { %7554 = sst [smem:[#allocation25_spill]] %s7553_s25  ;;  %s6213_s2 = smov [#allocation5]  }
  0x1f   : > { %p6399_p10 = pnand %p4803_p7, %p542_p8  ;;  %s568_s27 = sshll.u32 %s6213_s2, 4  ;;  %s569_s27 = int_to_ptr.vmem [resolvable:$true] %s568_s27 }
  0x20   : > { %s6214_s0 = smov [#allocation8]   ;;  %s6215_s24 = smov [#allocation11]  }
  0x21   : > { %s7555_s26 = scalar_select %p6399_p10, 1, 0 }
  0x22   : > { %p5558_p11 = pneg %p6399_p10  ;;  %s604_s1 = sshll.u32 %s6214_s0, 4  ;;  %s605_s1 = int_to_ptr.vmem [resolvable:$true] %s604_s1 }
  0x23   : > { %s654_s29 = sshll.u32 %s6215_s24, 4  ;;  %s5964_s2 = scalar_lea.vmem %s569_s27, 16  ;;  %s655_s29 = int_to_ptr.vmem [resolvable:$true] %s654_s29 }
  0x24   : > { %p6407_p12 = pnand %p7520_p9, %p5558_p11  ;;  %p5965_p0 = scmp.ne.s32.totalorder %s569_s27, %s5964_s2 }
  0x25   : > { %s5971_s0 = scalar_lea.vmem %s569_s27, 32  ;;  %p5972_p3 = scmp.lt.s32.totalorder %s569_s27, %s569_s27 }
  0x26   : > { %p6413_p13 = pneg %p6407_p12  ;;  %p5973_p4 = scmp.lt.s32.totalorder %s5971_s0, %s5964_s2 }
  0x28   : > { %p5967_p1 = pnand %p5965_p0, %p6413_p13  ;;  %p5974_p7 = por %p5973_p4, %p5972_p3 }
  0x2a   : > { %p5968_p2 = pneg %p5967_p1 }
  0x2c   : > { %p5975_p8 = pnand %p5974_p7, %p5968_p2 }
  0x2e   : > { %5978 = shalt.err (!%p5975_p8)
}
  0x2f   : > { %s7558_s3 = sld [smem:[#allocation29_spill]]  ;;  %s5990_s30 = scalar_lea.vmem %s605_s1, 128 }
  0x30   : > { %p5991_p11 = scmp.ne.s32.totalorder %s605_s1, %s5990_s30  ;;  %p5998_p0 = scmp.lt.s32.totalorder %s605_s1, %s605_s1 }
  0x31   : > { %p5999_p1 = scmp.lt.s32.totalorder %s5990_s30, %s5990_s30 }
  0x32   : > { %p5993_p9 = pnand %p5991_p11, %p6413_p13 }
  0x33   : > { %p6000_p5 = por %p5999_p1, %p5998_p0 }
  0x34   : > { %p5994_p6 = pneg %p5993_p9 }
  0x35   : > { %5564 = dma.hbm_to_vmem [thread:$0]  (!%p6407_p12), %s7558_s3, 16, %s569_s27, [#allocation6]  }
  0x36   : > { %p6001_p10 = pnand %p6000_p5, %p5994_p6 }
  0x38   : > { %6004 = shalt.err (!%p6001_p10)
}
  0x39   : > { %s7559_s9 = sld [smem:[#allocation33_spill]]  ;;  %s6016_s25 = scalar_lea.vmem %s655_s29, 512 }
  0x3a   : > { %p6017_p2 = scmp.ne.s32.totalorder %s655_s29, %s6016_s25  ;;  %p6024_p7 = scmp.lt.s32.totalorder %s655_s29, %s655_s29 }
  0x3b   : > { %p6025_p9 = scmp.lt.s32.totalorder %s6016_s25, %s6016_s25 }
  0x3c   : > { %p6019_p3 = pnand %p6017_p2, %p6413_p13 }
  0x3d   : > { %p6026_p8 = por %p6025_p9, %p6024_p7 }
  0x3e   : > { %p6020_p4 = pneg %p6019_p3 }
  0x3f   : > { %5570 = dma.hbm_to_vmem [thread:$0]  (!%p6407_p12), %s7559_s9, 128, %s605_s1, [#allocation9]  }
  0x40   : > { %p6027_p11 = pnand %p6026_p8, %p6020_p4 }
  0x42   : > { %6030 = shalt.err (!%p6027_p11)
}
  0x43   : > { %s6216_s3 = smov 64   ;;  %s6217_s30 = smov 4  }
  0x44   : > { %s7560_s20 = sld [smem:[#allocation34_spill]]  ;;  %s6218_s24 = smov [#allocation2]  }
  0x45   : > { %s554_s2 = sshll.u32 %s6218_s24, 4  ;;  %s6219_s0 = smov [#allocation7]   ;;  %s555_s2 = int_to_ptr.vmem [resolvable:$true] %s554_s2 }
  0x46   : > { %s578_s25 = sshll.u32 %s6219_s0, 4  ;;  %s6042_s9 = scalar_lea.vmem %s555_s2, 384  ;;  %s579_s25 = int_to_ptr.vmem [resolvable:$true] %s578_s25 }
  0x47   : > { %p6043_p5 = scmp.ne.s32.totalorder %s555_s2, %s6042_s9  ;;  %p6050_p0 = scmp.lt.s32.totalorder %s555_s2, %s555_s2 }
  0x48   : > { %p6051_p1 = scmp.lt.s32.totalorder %s6042_s9, %s6042_s9 }
  0x49   : > { %p6045_p6 = pnand %p6043_p5, %p6413_p13 }
  0x4a   : > { %5576 = dma.hbm_to_vmem [thread:$0]  (!%p6407_p12), %s7560_s20, 512, %s655_s29, [#allocation12], %s6216_s3, %s6216_s3, %s6217_s30  }
  0x4b   : > { %p6046_p10 = pneg %p6045_p6  ;;  %p6052_p2 = por %p6051_p1, %p6050_p0 }
  0x4d   : > { %p6053_p3 = pnand %p6052_p2, %p6046_p10 }
  0x4f   : > { %6056 = shalt.err (!%p6053_p3)
}
  0x50   : > { %s7561_s1 = sld [smem:[#allocation28_spill]]  ;;  %s6068_s24 = scalar_lea.vmem %s579_s25, 384 }
  0x51   : > { %p6069_p4 = scmp.ne.s32.totalorder %s579_s25, %s6068_s24  ;;  %p6076_p8 = scmp.lt.s32.totalorder %s579_s25, %s579_s25 }
  0x52   : > { %p6077_p11 = scmp.lt.s32.totalorder %s6068_s24, %s6068_s24 }
  0x53   : > { %p6071_p7 = pnand %p6069_p4, %p6413_p13 }
  0x54   : > { %p6078_p5 = por %p6077_p11, %p6076_p8 }
  0x55   : > { %p6072_p9 = pneg %p6071_p7 }
  0x56   : > { %5561 = dma.hbm_to_vmem [thread:$0]  (!%p6407_p12), %s7561_s1, 384, %s555_s2, [#allocation3], %s6216_s3, %s6216_s3, %s6217_s30  }
  0x57   : > { %p6079_p6 = pnand %p6078_p5, %p6072_p9 }
  0x59   : > { %6082 = shalt.err (!%p6079_p6)
}
  0x5a   : > { %s7562_s29 = sld [smem:[#allocation30_spill]]  ;;  %s6220_s2 = smov [#allocation10]  }
  0x5b   : > { %s614_s27 = sshll.u32 %s6220_s2, 4  ;;  %s615_s27 = int_to_ptr.vmem [resolvable:$true] %s614_s27 }
  0x5c   : > { %s6094_s1 = scalar_lea.vmem %s615_s27, 768  ;;  %p6102_p2 = scmp.lt.s32.totalorder %s615_s27, %s615_s27 }
  0x5d   : > { %p6095_p10 = scmp.ne.s32.totalorder %s615_s27, %s6094_s1  ;;  %p6103_p3 = scmp.lt.s32.totalorder %s6094_s1, %s6094_s1 }
  0x5f   : > { %p6097_p0 = pnand %p6095_p10, %p6413_p13  ;;  %p6104_p4 = por %p6103_p3, %p6102_p2 }
  0x60   : > { %5567 = dma.hbm_to_vmem [thread:$0]  (!%p6407_p12), %s7562_s29, 384, %s579_s25, [#allocation6], %s6216_s3, %s6216_s3, %s6217_s30  }
  0x61   : > { %p6098_p1 = pneg %p6097_p0 }
  0x63   : > { %p6105_p7 = pnand %p6104_p4, %p6098_p1 }
  0x65   : > { %6108 = shalt.err (!%p6105_p7)
}
  0x66   : > { %s6221_s24 = smov 128   ;;  %s6222_s20 = smov 8  }
  0x67   : > { %5573 = dma.hbm_to_vmem [thread:$0]  (!%p6407_p12), %s7499_s10, 768, %s615_s27, [#allocation9], %s6221_s24, %s6221_s24, %s6222_s20  }
  0x68   : > { %s6223_s30 = smov [#allocation13]  }
  0x69   : > { %s668_s25 = sshll.u32 %s6223_s30, 4  ;;  %s669_s25 = int_to_ptr.vmem [resolvable:$true] %s668_s25 }
  0x6a   : > { %s6120_s0 = scalar_lea.vmem %s669_s25, 16  ;;  %s6127_s29 = scalar_lea.vmem %s669_s25, 32 }
  0x6b   : > { %p6121_p9 = scmp.ne.s32.totalorder %s669_s25, %s6120_s0  ;;  %p6128_p5 = scmp.lt.s32.totalorder %s669_s25, %s669_s25 }
  0x6c   : > { %p6129_p6 = scmp.lt.s32.totalorder %s6127_s29, %s6120_s0 }
  0x6d   : > { %p6123_p8 = pnand %p6121_p9, %p6413_p13 }
  0x6e   : > { %p6130_p10 = por %p6129_p6, %p6128_p5 }
  0x6f   : > { %p6124_p11 = pneg %p6123_p8 }
  0x71   : > { %p6131_p0 = pnand %p6130_p10, %p6124_p11 }
  0x73   : > { %6134 = shalt.err (!%p6131_p0)
}
  0x74   : > { %5579 = dma.hbm_to_vmem [thread:$0]  (!%p6407_p12), %s7510_s21, 16, %s669_s25, [#allocation12]  }
  0x75   : > { %p7563_p1 = scmp.ne.s32.totalorder %s7555_s26, 0 }
  0x76   : > { %p7564_p2 = scmp.eq.s32.totalorder (!%p7563_p1), %s6371_s4, 0 }
  0x77   : > { %695 = sbr.rel (%p7563_p1) target bundleno = 12233 (0x2fc9), region = 108 }
  0x7c   : > { %6178 = dma.done.wait (%p7564_p2), [#allocation3], 384   ;;  %p7565_p13 = pmov %p7564_p2 }
  0x7d   : > { %p7566_p3 = pmov %p7564_p2 }
  0x7e   : > { %6180 = vsyncadd (%p7565_p13), [#allocation3], 4294966912 }
  0x7f   : > { %6182 = dma.done.wait (%p7566_p3), [#allocation6], 400   ;;  %p7567_p4 = pmov %p7564_p2 }
  0x80   : > { %p7568_p7 = pmov %p7564_p2 }
  0x81   : > { %6184 = vsyncadd (%p7567_p4), [#allocation6], 4294966896 }
  0x82   : > { %6186 = dma.done.wait (%p7568_p7), [#allocation9], 896   ;;  %p7569_p12 = pmov %p7564_p2 }
  0x83   : > { %p7570_p9 = pmov %p7564_p2 }
  0x84   : > { %6188 = vsyncadd (%p7569_p12), [#allocation9], 4294966400 }
  0x85   : > { %6190 = dma.done.wait (%p7570_p9), [#allocation12], 528   ;;  %p7571_p8 = pmov %p7564_p2 }
  0x86   : > { %p784_p11 = scmp.lt.s32.totalorder %s6371_s4, 1  ;;  %v6224_v0 = vmov 0.0   ;;  %s7572_s27 = sld [smem:[#allocation26_spill]]  ;;  %vm808_vm0 = vcmask 1046528   ;;  %vm840_vm1 = vcmask 1045504   ;;  %vm6225_vm2 = vmmov 0  }
  0x87   : > { %6192 = vsyncadd (%p7571_p8), [#allocation12], 4294966768  ;;  %5197 = vmatprep.subr.bf16.mxu0 %v6224_v0  ;;  %5215 = vmatprep.subr.bf16.mxu1 %v6224_v0  ;;  %v5702_v15 = vld [vmem:[#allocation2 + $0x10] sm:$0xff]   ;;  %v5703_v28 = vld [vmem:[#allocation2 + $0x8] sm:$0xff]   ;;  %s7523_s9 = smov 16   ;;  %s7525_s3 = smov 32  }
  0x88   : > { %s6495_s20 = scalar_select %p784_p11, %s6371_s4, 1  ;;  %5203 = vmatprep.mubr.msk.bf16.mxu0 %vm6225_vm2, %v6224_v0  ;;  %5221 = vmatprep.mubr.msk.bf16.mxu1 %vm6225_vm2, %v6224_v0  ;;  %v5704_v35 = vld [vmem:[#allocation2] sm:$0xff]   ;;  %vm872_vm3 = vcmask 130048   ;;  %vm879_vm4 = vcmask 261120   ;;  %vm920_vm5 = vcmask 392192   ;;  %vm1157_vm6 = vcmask 523264  }
  0x89   : > { %5198 = vmatpush3.bf16.msra.mxu0 %v5702_v15  ;;  %s7535_s30 = smov 64   ;;  %s7573_s29 = sld [smem:[#allocation31_spill]]  ;;  %vm2054_vm7 = vcmask 1043456   ;;  %vm2038_vm8 = vcmask 64512   ;;  %vm2704_vm9 = vcmask 1044480   ;;  %vm2731_vm10 = vcmask 1042432  }
  0x8a   : > { %s5527_s23 = smul.u32 56, %s6495_s20  ;;  %5199 = vmatprep.subr.bf16.mxu0 %v6224_v0  ;;  %s7575_s25 = sld [smem:[#allocation32_spill]]  ;;  %vm2745_vm11 = vcmask 1041408   ;;  %vm2759_vm12 = vcmask 1040384  }
  0x8b   : > { %s7529_s0 = smov 96   ;;  %s7527_s1 = smov 80  }
  0x8c   : > { %s788_s24 = scalar_lea.vmem %s7572_s27, %s5527_s23  ;;  %s7577_s23 = smov 16  }
  0x8d   : > { %v6503_v1 = vld [vmem:[%s788_s24] sm:$0xff]  ;;  %v6505_v2 = vld [vmem:[%s788_s24 + $0x8] sm:$0xff]  ;;  %v6507_v3 = vld [vmem:[%s788_s24 + $0x10] sm:$0xff]  ;;  %5200 = vmatpush3.bf16.msra.mxu0 %v5703_v28  ;;  %s7578_s27 = sld [smem:[#allocation27_spill]]  ;;  %s7583_s5 = smov 80  }
  0x8e   : > { %v809_v4 = vrot.slane %v6503_v1, 1  ;;  %v810_v5 = vrot.slane %v6505_v2, 1  ;;  %v812_v6 = vrot.slane %v6507_v3, 1  ;;  %v841_v7 = vrot.slane %v6503_v1, 2  ;;  %v6513_v8 = vld [vmem:[%s788_s24 + $0x18] sm:$0xff]  ;;  %v6515_v9 = vld [vmem:[%s788_s24 + $0x20] sm:$0xff]  ;;  %5201 = vmatprep.subr.bf16.mxu0 %v6224_v0 }
  0x8f   : > { %v842_v10 = vrot.slane %v6505_v2, 2  ;;  %v844_v11 = vrot.slane %v6507_v3, 2  ;;  %v814_v12 = vrot.slane %v6513_v8, 1  ;;  %v816_v13 = vrot.slane %v6515_v9, 1  ;;  %v6525_v14 = vld [vmem:[%s788_s24 + $0x28] sm:$0xff]  ;;  %s7574_s2 = smov %s7573_s29  ;;  %p7584_p6 = scmp.ne.s32.totalorder %s7552_s6, 0 }
  0x90   : > { %v811_v16 = vsel %vm808_vm0, %v809_v4, %v810_v5  ;;  %v813_v17 = vsel %vm808_vm0, %v810_v5, %v812_v6  ;;  %v846_v18 = vrot.slane %v6513_v8, 2  ;;  %v848_v19 = vrot.slane %v6515_v9, 2  ;;  %v800_v20 = vld [vmem:[%s788_s24 + $0x30] sm:$0x3]  ;;  %s6234_s26 = smov [#allocation14]  }
  0x91   : > { %v5652_v21 = vpack.i.bf16 %v813_v17, %v811_v16  ;;  %v843_v22 = vsel %vm840_vm1, %v841_v7, %v842_v10  ;;  %v845_v23 = vsel %vm840_vm1, %v842_v10, %v844_v11  ;;  %v815_v24 = vsel %vm808_vm0, %v812_v6, %v814_v12  ;;  %5202 = vmatpush3.bf16.msra.mxu0 %v5704_v35 }
  0x92   : > { %v817_v25 = vsel %vm808_vm0, %v814_v12, %v816_v13  ;;  %v847_v26 = vsel %vm840_vm1, %v844_v11, %v846_v18  ;;  %v849_v27 = vsel %vm840_vm1, %v846_v18, %v848_v19  ;;  %v5657_v29 = vpack.i.bf16 %v845_v23, %v843_v22 }
  0x93   : > { %5653 = vrot.lane.b32.xlu0 %v5652_v21, %s7523_s9  ;;  %v5662_v30 = vpack.i.bf16 %v817_v25, %v815_v24  ;;  %v818_v31 = vrot.slane %v6525_v14, 1  ;;  %v820_v32 = vrot.slane %v800_v20, 1  ;;  %v850_v33 = vrot.slane %v6525_v14, 2  ;;  %s6900_s24 = scalar_lea.vmem %s7578_s27, %s6495_s20 }
  0x94   : > { %v852_v34 = vrot.slane %v800_v20, 2  ;;  %v5667_v36 = vpack.i.bf16 %v849_v27, %v847_v26 }
  0x95   : > { %5663 = vrot.lane.b32.xlu1 %v5662_v30, %s7523_s9  ;;  %v819_v37 = vsel %vm808_vm0, %v816_v13, %v818_v31  ;;  %v821_v38 = vsel %vm808_vm0, %v818_v31, %v820_v32  ;;  %v851_v39 = vsel %vm840_vm1, %v848_v19, %v850_v33 }
  0x96   : > { %v853_v40 = vsel %vm840_vm1, %v850_v33, %v852_v34  ;;  %v5672_v41 = vpack.i.bf16 %v821_v38, %v819_v37 }
  0x97   : > { %5658 = vrot.lane.b32.xlu0 %v5657_v29, %s7525_s3  ;;  %v5677_v42 = vpack.i.bf16 %v853_v40, %v851_v39 }
  0x99   : > { %5668 = vrot.lane.b32.xlu1 %v5667_v36, %s7525_s3 }
  0x9b   : > { %5673 = vrot.lane.b32.xlu0 %v5672_v41, %s7523_s9  ;;  %s7533_s9 = smov 112  }
  0x9d   : > { %5678 = vrot.lane.b32.xlu1 %v5677_v42, %s7525_s3  ;;  %s7531_s3 = smov 48  }
 0x105   : > { %v5654_v43 = vpop.permute.xlu0 %5653 }
 0x106   : > { %v5656_v44 = vunpack.i.h.bf16 %v5654_v43  ;;  %v5655_v45 = vunpack.i.l.bf16 %v5654_v43 }
 0x107   : > { %v5664_v46 = vpop.permute.xlu1 %5663 }
 0x108   : > { %v874_v50 = vsel %vm872_vm3, %v6505_v2, %v5656_v44  ;;  %v873_v51 = vsel %vm872_vm3, %v6503_v1, %v5655_v45  ;;  %v5666_v52 = vunpack.i.h.bf16 %v5664_v46  ;;  %v5665_v53 = vunpack.i.l.bf16 %v5664_v46 }
 0x109   : > { %v5659_v47 = vpop.permute.xlu0 %5658 }
 0x10a   : > { %v5661_v48 = vunpack.i.h.bf16 %v5659_v47  ;;  %v5660_v49 = vunpack.i.l.bf16 %v5659_v47  ;;  %v876_v61 = vsel %vm872_vm3, %v6513_v8, %v5666_v52  ;;  %v875_v62 = vsel %vm872_vm3, %v6507_v3, %v5665_v53 }
 0x10b   : > { %v5669_v54 = vpop.permute.xlu1 %5668 }
 0x10c   : > { %v880_v55 = vsel %vm879_vm4, %v873_v51, %v5660_v49  ;;  %v881_v56 = vsel %vm879_vm4, %v874_v50, %v5661_v48  ;;  %v5671_v58 = vunpack.i.h.bf16 %v5669_v54  ;;  %v5670_v59 = vunpack.i.l.bf16 %v5669_v54 }
 0x10d   : > { %v886_v57 = vpack.c.bf16 %v881_v56, %v880_v55  ;;  %v5674_v60 = vpop.permute.xlu0 %5673 }
 0x10e   : > { %v5676_v63 = vunpack.i.h.bf16 %v5674_v60  ;;  %v5675_v1 = vunpack.i.l.bf16 %v5674_v60  ;;  %v882_v4 = vsel %vm879_vm4, %v875_v62, %v5670_v59  ;;  %v883_v5 = vsel %vm879_vm4, %v876_v61, %v5671_v58 }
 0x10f   : > { %5204 = vmatmul.mubr.msk.bf16.vlgmr.msra.gmra.mxu0 %vm920_vm5, %v886_v57  ;;  %v5679_v2 = vpop.permute.xlu1 %5678  ;;  %v887_v10 = vpack.c.bf16 %v883_v5, %v882_v4 }
 0x110   : > { %5207 = vmatprep.mubr.msk.bf16.mxu0 %vm6225_vm2, %v6224_v0  ;;  %v5681_v6 = vunpack.i.h.bf16 %v5679_v2  ;;  %v5680_v7 = vunpack.i.l.bf16 %v5679_v2  ;;  %v878_v8 = vsel %vm872_vm3, %v6525_v14, %v5676_v63  ;;  %v877_v3 = vsel %vm872_vm3, %v6515_v9, %v5675_v1  ;;  %v4822_v14 = vld [vmem:[#allocation5] ss:$0 sm:$0xff] }
 0x112   : > { %v884_v11 = vsel %vm879_vm4, %v877_v3, %v5680_v7  ;;  %v885_v12 = vsel %vm879_vm4, %v878_v8, %v5681_v6 }
 0x113   : > { %v888_v13 = vpack.c.bf16 %v885_v12, %v884_v11 }
 0x117   : > { %5208 = vmatmul.mubr.msk.bf16.gmra.mxu0 %vm920_vm5, %v887_v10 }
 0x118   : > { %5211 = vmatprep.mubr.msk.bf16.mxu0 %vm6225_vm2, %v6224_v0 }
 0x11f   : > { %5212 = vmatmul.mubr.msk.bf16.gmra.mxu0 %vm920_vm5, %v888_v13 }
 0x1cf   : > { %v964_v15 = vpop.f32.mrf.mxu0 }
 0x1d0   : > { %v965_v27 = vadd.f32 %v4822_v14, %v964_v15 }
 0x1d1   : > { %v5205_v16 = vpop.f32.mrf.mxu0 }
 0x1d2   : > { %v4829_v33 = vmul.f32 -1.442695, %v965_v27 }
 0x1d3   : > { %v967_v17 = vpop.f32.mrf.mxu0 }
 0x1d4   : > { %v968_v23 = vadd.f32 %v4822_v14, %v967_v17 }
 0x1d5   : > { %v5206_v18 = vpop.f32.mrf.mxu0 }
 0x1d6   : > { %v4830_v29 = vmul.f32 -1.442695, %v968_v23 }
 0x1d7   : > { %v972_v19 = vpop.f32.mrf.mxu0 }
 0x1d8   : > { %v973_v20 = vadd.f32 %v4822_v14, %v972_v19 }
 0x1d9   : > { %v5209_v9 = vpop.f32.mrf.mxu0 }
 0x1da   : > { %v4831_v21 = vmul.f32 -1.442695, %v973_v20  ;;  %v5705_v9 = vld [vmem:[#allocation7] sm:$0xff]  }
 0x1db   : > { %v975_v22 = vpop.f32.mrf.mxu0 }
 0x1dc   : > { %5822 = vpow2.f32 %v4831_v21  ;;  %v976_v24 = vadd.f32 %v4822_v14, %v975_v22  ;;  %v5706_v21 = vld [vmem:[#allocation7 + $0x8] sm:$0xff]   ;;  %v5707_v22 = vld [vmem:[#allocation7 + $0x10] sm:$0xff]  }
 0x1dd   : > { %v5210_v25 = vpop.f32.mrf.mxu0 }
 0x1de   : > { %v4832_v26 = vmul.f32 -1.442695, %v976_v24  ;;  %v5709_v25 = vld [vmem:[%s7574_s2 + $0x30] sm:$0xff]  }
 0x1df   : > { %v980_v28 = vpop.f32.mrf.mxu0 }
 0x1e0   : > { %5824 = vpow2.f32 %v4832_v26  ;;  %v981_v30 = vadd.f32 %v4822_v14, %v980_v28  ;;  %v5710_v26 = vld [vmem:[%s7574_s2 + $0x28] sm:$0xff]   ;;  %v5712_v28 = vld [vmem:[%s7574_s2 + $0x18] sm:$0xff]  }
 0x1e1   : > { %v5213_v31 = vpop.f32.mrf.mxu0  ;;  %5826 = vpow2.f32 %v4830_v29  ;;  %v5713_v29 = vld [vmem:[%s7574_s2 + $0x10] sm:$0xff]  }
 0x1e2   : > { %v4833_v32 = vmul.f32 -1.442695, %v981_v30  ;;  %v5715_v31 = vld [vmem:[%s7574_s2] sm:$0xff]  }
 0x1e3   : > { %v983_v34 = vpop.f32.mrf.mxu0 }
 0x1e4   : > { %v984_v35 = vadd.f32 %v4822_v14, %v983_v34  ;;  %5828 = vpow2.f32 %v4833_v32  ;;  %v5716_v32 = vld [vmem:[%s7574_s2 + $0x58] sm:$0xff]   ;;  %v5718_v34 = vld [vmem:[%s7574_s2 + $0x48] sm:$0xff]  }
 0x1e5   : > { %v5214_v36 = vpop.f32.mrf.mxu0  ;;  %5830 = vpow2.f32 %v4829_v33  ;;  %v5717_v33 = vld [vmem:[%s7574_s2 + $0x50] sm:$0xff]  }
 0x1e6   : > { %v4834_v37 = vmul.f32 -1.442695, %v984_v35 }
 0x1e8   : > { %5832 = vpow2.f32 %v4834_v37  ;;  %v5719_v37 = vld [vmem:[%s7574_s2 + $0x40] sm:$0xff]  }
 0x1e9   : > { %v5823_v38 = vpop.eup %5822 }
 0x1ea   : > { %v1007_v39 = vadd.f32 1.0, %v5823_v38 }
 0x1ec   : > { %5834 = vrcp.f32 %v1007_v39 }
 0x1ed   : > { %v5825_v40 = vpop.eup %5824 }
 0x1ee   : > { %v1008_v41 = vadd.f32 1.0, %v5825_v40  ;;  %v5827_v42 = vpop.eup %5826 }
 0x1ef   : > { %v1006_v46 = vadd.f32 1.0, %v5827_v42 }
 0x1f0   : > { %5836 = vrcp.f32 %v1008_v41 }
 0x1f1   : > { %v5829_v43 = vpop.eup %5828 }
 0x1f2   : > { %v1009_v44 = vadd.f32 1.0, %v5829_v43  ;;  %v5831_v45 = vpop.eup %5830 }
 0x1f3   : > { %v1005_v48 = vadd.f32 1.0, %v5831_v45 }
 0x1f4   : > { %5838 = vrcp.f32 %v1009_v44 }
 0x1f5   : > { %v5833_v47 = vpop.eup %5832  ;;  %5840 = vrcp.f32 %v1006_v46 }
 0x1f6   : > { %v1010_v49 = vadd.f32 1.0, %v5833_v47 }
 0x1f8   : > { %5842 = vrcp.f32 %v1010_v49 }
 0x1f9   : > { %v5835_v50 = vpop.eup %5834  ;;  %5844 = vrcp.f32 %v1005_v48 }
 0x1fa   : > { %v1025_v52 = vmul.f32 %v5835_v50, %v973_v20 }
 0x1fd   : > { %v5837_v51 = vpop.eup %5836 }
 0x1fe   : > { %v1026_v53 = vmul.f32 %v5837_v51, %v976_v24  ;;  %v6229_v24 = vmov 0  }
 0x1ff   : > { %1265 = vmatprep.subr.bf16.mxu0 %v6229_v24 }
 0x200   : > { %v5687_v54 = vpack.i.bf16 %v1026_v53, %v1025_v52 }
 0x201   : > { %v5839_v55 = vpop.eup %5838 }
 0x202   : > { %5688 = vrot.lane.b32.xlu1 %v5687_v54, %s7535_s30  ;;  %v5841_v56 = vpop.eup %5840  ;;  %v1027_v58 = vmul.f32 %v5839_v55, %v981_v30  ;;  %v5714_v30 = vld [vmem:[%s7574_s2 + $0x8] sm:$0xff]  }
 0x203   : > { %v1024_v61 = vmul.f32 %v5841_v56, %v968_v23  ;;  %v5708_v23 = vld [vmem:[%s7573_s29 + $0x38] sm:$0xff]   ;;  %v5720_v56 = vld [vmem:[%s7575_s25] sm:$0xff]   ;;  %s7576_s29 = smov 32  }
 0x204   : > { %1266 = vmatpush1.bf16.msra.mxu0 %v5708_v23  ;;  %v5728_v23 = vld [vmem:[%s7496_s7 + $0x8] sm:$0xff]  }
 0x205   : > { %v5843_v57 = vpop.eup %5842  ;;  %1267 = vmatprep.subr.bf16.mxu0 %v6229_v24 }
 0x206   : > { %v1028_v59 = vmul.f32 %v5843_v57, %v984_v35  ;;  %v5845_v60 = vpop.eup %5844  ;;  %v1186_v57 = vlaneseq }
 0x207   : > { %v1023_v63 = vmul.f32 %v5845_v60, %v965_v27  ;;  %v5711_v27 = vld [vmem:[%s7574_s2 + $0x20] sm:$0xff]   ;;  %v6652_v60 = vld [vmem:[#allocation8] sm:$0x1f]  ;;  %s7580_s2 = smov 112  }
 0x208   : > { %v5682_v62 = vpack.i.bf16 %v1028_v59, %v1027_v58  ;;  %1268 = vmatpush1.bf16.msra.mxu0 %v5709_v25  ;;  %v5729_v25 = vld [vmem:[%s7496_s7] sm:$0xff]  }
 0x209   : > { %v5692_v1 = vpack.i.bf16 %v1024_v61, %v1023_v63  ;;  %1269 = vmatprep.subr.bf16.mxu0 %v6229_v24 }
 0x20a   : > { %5683 = vrot.lane.b32.xlu0 %v5682_v62, %s7535_s30 }
 0x20c   : > { %1270 = vmatpush1.bf16.msra.mxu0 %v5710_v26  ;;  %v5730_v26 = vld [vmem:[%s7496_s7 + $0x58] sm:$0xff]  }
 0x20d   : > { %1271 = vmatprep.subr.bf16.mxu0 %v6229_v24 }
 0x20e   : > { %5693 = vrot.lane.b32.xlu0 %v5692_v1, %s7535_s30 }
 0x210   : > { %1272 = vmatpush1.bf16.msra.mxu0 %v5711_v27  ;;  %v5731_v27 = vld [vmem:[%s7496_s7 + $0x50] sm:$0xff]  }
 0x211   : > { %1273 = vmatprep.subr.bf16.mxu0 %v6229_v24 }
 0x214   : > { %1274 = vmatpush1.bf16.msra.mxu0 %v5712_v28  ;;  %v5732_v28 = vld [vmem:[%s7496_s7 + $0x48] sm:$0xff]  }
 0x215   : > { %1275 = vmatprep.subr.bf16.mxu0 %v6229_v24 }
 0x218   : > { %1276 = vmatpush1.bf16.msra.mxu0 %v5713_v29  ;;  %v5733_v29 = vld [vmem:[%s7496_s7 + $0x40] sm:$0xff]  }
 0x219   : > { %1277 = vmatprep.subr.bf16.mxu0 %v6229_v24 }
 0x21c   : > { %1278 = vmatpush1.bf16.msra.mxu0 %v5714_v30 }
 0x21d   : > { %1279 = vmatprep.subr.bf16.mxu0 %v6229_v24 }
 0x220   : > { %1280 = vmatpush1.bf16.msra.mxu0 %v5715_v31 }
 0x221   : > { %1289 = vmatprep.subr.bf16.mxu0 %v6229_v24 }
 0x224   : > { %1290 = vmatpush2.bf16.msra.mxu0 %v5716_v32 }
 0x225   : > { %1291 = vmatprep.subr.bf16.mxu0 %v6229_v24 }
 0x228   : > { %1292 = vmatpush2.bf16.msra.mxu0 %v5717_v33 }
 0x229   : > { %1293 = vmatprep.subr.bf16.mxu0 %v6229_v24 }
 0x22c   : > { %1294 = vmatpush2.bf16.msra.mxu0 %v5718_v34 }
 0x22d   : > { %1295 = vmatprep.subr.bf16.mxu0 %v6229_v24 }
 0x230   : > { %1296 = vmatpush2.bf16.msra.mxu0 %v5719_v37 }
 0x231   : > { %5239 = vmatprep.subr.bf16.mxu0 %v6224_v0 }
 0x274   : > { %v5689_v2 = vpop.permute.xlu1 %5688 }
 0x275   : > { %v5691_v4 = vunpack.i.h.bf16 %v5689_v2  ;;  %v5690_v6 = vunpack.i.l.bf16 %v5689_v2 }
 0x277   : > { %v1056_v11 = vmax.f32 %v1026_v53, %v5691_v4  ;;  %v1055_v13 = vmax.f32 %v1025_v52, %v5690_v6 }
 0x279   : > { %v1066_v19 = vpack.c.bf16 %v1056_v11, %v1055_v13 }
 0x27c   : > { %v5684_v5 = vpop.permute.xlu0 %5683 }
 0x27d   : > { %v5686_v7 = vunpack.i.h.bf16 %v5684_v5  ;;  %v5685_v10 = vunpack.i.l.bf16 %v5684_v5 }
 0x27f   : > { %v1057_v8 = vmax.f32 %v1027_v58, %v5685_v10  ;;  %v1058_v3 = vmax.f32 %v1028_v59, %v5686_v7  ;;  %v6647_v58 = vshrl.u32 %v1186_v57, 7 }
 0x280   : > { %v5694_v12 = vpop.permute.xlu0 %5693 }
 0x281   : > { %v5696_v15 = vunpack.i.h.bf16 %v5694_v12  ;;  %v5695_v16 = vunpack.i.l.bf16 %v5694_v12  ;;  %v1067_v17 = vpack.c.bf16 %v1058_v3, %v1057_v8  ;;  %v6650_v59 = vsub.s32 0, %v6647_v58 }
 0x283   : > { %5216 = vmatpush3.bf16.msra.mxu1 %v1067_v17  ;;  %v1054_v18 = vmax.f32 %v1024_v61, %v5696_v15  ;;  %v1053_v14 = vmax.f32 %v1023_v63, %v5695_v16  ;;  %v1189_v61 = vrot.slane %v6652_v60, %v6650_v59 }
 0x284   : > { %5217 = vmatprep.subr.bf16.mxu1 %v6224_v0 }
 0x285   : > { %v1065_v20 = vpack.c.bf16 %v1054_v18, %v1053_v14  ;;  %v5721_v18 = vld [vmem:[%s7575_s25 + $0x8] ss:$0 sps:$4 sm:$0xff]   ;;  %v5722_v14 = vld [vmem:[%s7496_s7 + $0x38] sm:$0xff]  }
 0x287   : > { %5218 = vmatpush3.bf16.msra.mxu1 %v1066_v19  ;;  %v5723_v19 = vld [vmem:[%s7496_s7 + $0x30] sm:$0xff]  }
 0x288   : > { %5219 = vmatprep.subr.bf16.mxu1 %v6224_v0 }
 0x28b   : > { %5220 = vmatpush3.bf16.msra.mxu1 %v1065_v20  ;;  %v5724_v20 = vld [vmem:[%s7496_s7 + $0x28] sm:$0xff]  }
 0x28e   : > { %5222 = vmatmul.mubr.msk.bf16.vlgmr.msra.gmra.mxu1 %vm920_vm5, %v5705_v9  ;;  %v5725_v9 = vld [vmem:[%s7496_s7 + $0x20] sm:$0xff]  }
 0x28f   : > { %5225 = vmatprep.mubr.msk.bf16.mxu1 %vm6225_vm2, %v6224_v0 }
 0x296   : > { %5226 = vmatmul.mubr.msk.bf16.gmra.mxu1 %vm920_vm5, %v5706_v21  ;;  %v5726_v21 = vld [vmem:[%s7496_s7 + $0x18] sm:$0xff]  }
 0x297   : > { %5229 = vmatprep.mubr.msk.bf16.mxu1 %vm6225_vm2, %v6224_v0 }
 0x29e   : > { %5230 = vmatmul.mubr.msk.bf16.gmra.mxu1 %vm920_vm5, %v5707_v22  ;;  %v5727_v22 = vld [vmem:[%s7496_s7 + $0x10] sm:$0xff]  }
 0x29f   : > { %5235 = vmatprep.mubr.msk.bf16.mxu1 %vm872_vm3, %v5720_v56 }
 0x34e   : > { %v1126_v35 = vpop.f32.mrf.mxu1 }
 0x350   : > { %v5223_v36 = vpop.f32.mrf.mxu1 }
 0x352   : > { %v1129_v38 = vpop.f32.mrf.mxu1 }
 0x354   : > { %v5224_v39 = vpop.f32.mrf.mxu1 }
 0x355   : > { %v5735_v39 = vld [vmem:[%s7497_s8 + $0x10] sm:$0xff]  }
 0x356   : > { %v1134_v40 = vpop.f32.mrf.mxu1 }
 0x358   : > { %v5227_v41 = vpop.f32.mrf.mxu1 }
 0x359   : > { %v5737_v41 = vld [vmem:[%s7497_s8] sm:$0xff]  }
 0x35a   : > { %v1137_v42 = vpop.f32.mrf.mxu1 }
 0x35b   : > { %v5697_v43 = vpack.i.bf16 %v1137_v42, %v1134_v40  ;;  %v5736_v40 = vld [vmem:[%s7497_s8 + $0x8] sm:$0xff]   ;;  %v6731_v42 = vsub.s32 1, %v6647_v58 }
 0x35c   : > { %v5228_v44 = vpop.f32.mrf.mxu1 }
 0x35d   : > { %5698 = vrot.lane.b32.xlu1 %v5697_v43, %s7535_s30  ;;  %v1420_v43 = vrot.slane %v6652_v60, %v6731_v42 }
 0x35e   : > { %v1142_v45 = vpop.f32.mrf.mxu1 }
 0x360   : > { %v5231_v46 = vpop.f32.mrf.mxu1 }
 0x362   : > { %v1145_v47 = vpop.f32.mrf.mxu1 }
 0x363   : > { %v1161_v48 = vpack.c.bf16 %v1145_v47, %v1142_v45 }
 0x364   : > { %v5232_v49 = vpop.f32.mrf.mxu1 }
 0x365   : > { %4853 = vmatprep.mubr.msk.bf16.mxu0 %vm1157_vm6, %v1161_v48 }
 0x3cf   : > { %v5699_v50 = vpop.permute.xlu1 %5698 }
 0x3d0   : > { %v5701_v51 = vunpack.i.h.bf16 %v5699_v50  ;;  %v5700_v52 = vunpack.i.l.bf16 %v5699_v50 }
 0x3d2   : > { %v1159_v53 = vsel %vm1157_vm6, %v1129_v38, %v5701_v51  ;;  %v1158_v54 = vsel %vm1157_vm6, %v1126_v35, %v5700_v52  ;;  %v5734_v38 = vld [vmem:[%s7497_s8 + $0x18] sm:$0xff]  }
 0x3d3   : > { %v1160_v55 = vpack.c.bf16 %v1159_v53, %v1158_v54 }
 0x3d5   : > { %1298 = vmatmul.mubr.bf16.vlgmr.msra.gmra.mxu0 %v1160_v55  ;;  %v6739_v55 = vsub.s32 2, %v6647_v58 }
 0x3d6   : > { %5247 = vmatprep.mubr.msk.bf16.mxu0 %vm6225_vm2, %v6224_v0  ;;  %5240 = vmatpush3.bf16.msra.mxu0 %v5734_v38 }
 0x3d7   : > { %5241 = vmatprep.subr.bf16.mxu0 %v6224_v0  ;;  %v1555_v56 = vrot.slane %v6652_v60, %v6739_v55 }
 0x3da   : > { %5242 = vmatpush3.bf16.msra.mxu0 %v5735_v39 }
 0x3db   : > { %5243 = vmatprep.subr.bf16.mxu0 %v6224_v0 }
 0x3de   : > { %5244 = vmatpush3.bf16.msra.mxu0 %v5736_v40  ;;  %v5742_v40 = vld [vmem:[%s7501_s12 + $0x18] sm:$0xff]  }
 0x3df   : > { %5245 = vmatprep.subr.bf16.mxu0 %v6224_v0 }
 0x3e2   : > { %5246 = vmatpush3.bf16.msra.mxu0 %v5737_v41  ;;  %v5743_v41 = vld [vmem:[%s7501_s12 + $0x10] sm:$0xff]  }
 0x3e3   : > { %5251 = vmatprep.subr.bf16.mxu0 %v6224_v0 }
 0x495   : > { %v1299_v62 = vpop.f32.mrf.mxu0 }
 0x496   : > { %v1300_v63 = vadd.f32 %v1299_v62, %v1189_v61 }
 0x497   : > { %v1301_v1 = vpop.f32.mrf.mxu0 }
 0x498   : > { %v4854_v2 = vmul.f32 -1.442695, %v1300_v63 }
 0x499   : > { %v1302_v4 = vpop.f32.mrf.mxu0 }
 0x49a   : > { %5846 = vpow2.f32 %v4854_v2  ;;  %v1303_v5 = vadd.f32 %v1302_v4, %v1189_v61 }
 0x49b   : > { %v1304_v6 = vpop.f32.mrf.mxu0 }
 0x49c   : > { %v4855_v7 = vmul.f32 -1.442695, %v1303_v5 }
 0x49e   : > { %5848 = vpow2.f32 %v4855_v7 }
 0x4a7   : > { %v5847_v10 = vpop.eup %5846 }
 0x4a8   : > { %v1312_v8 = vadd.f32 1.0, %v5847_v10 }
 0x4aa   : > { %5850 = vrcp.f32 %v1312_v8 }
 0x4ab   : > { %v5849_v3 = vpop.eup %5848 }
 0x4ac   : > { %v1313_v11 = vadd.f32 1.0, %v5849_v3 }
 0x4ae   : > { %5852 = vrcp.f32 %v1313_v11 }
 0x4b7   : > { %v5851_v12 = vpop.eup %5850 }
 0x4b8   : > { %v1318_v15 = vmul.f32 %v5851_v12, %v1300_v63  ;;  %v6746_v12 = vsub.s32 3, %v6647_v58 }
 0x4bb   : > { %v5853_v13 = vpop.eup %5852 }
 0x4bc   : > { %v1319_v16 = vmul.f32 %v5853_v13, %v1303_v5  ;;  %v6749_v13 = vsub.s32 4, %v6647_v58 }
 0x4be   : > { %v1323_v17 = vpack.c.bf16 %v1319_v16, %v1318_v15  ;;  %v1640_v15 = vrot.slane %v6652_v60, %v6746_v12 }
 0x4c0   : > { %5233 = vmatprep.subr.bf16.mxu1 %v1323_v17 }
 0x4c1   : > { %5234 = vmatpush3.bf16.msra.mxu1 %v1323_v17 }
 0x4c2   : > { %1496 = vmatprep.subr.bf16.mxu1 %v6229_v24 }
 0x4c4   : > { %5236 = vmatmul.mubr.msk.bf16.vlgmr.msra.gmra.mxu1 %vm872_vm3, %v5721_v18  ;;  %v1645_v18 = vrot.slane %v6652_v60, %v6749_v13  ;;  %v5739_v60 = vld [vmem:[%s7500_s11 + $0x10] sm:$0xff]  }
 0x4c5   : > { %1497 = vmatpush1.bf16.msra.mxu1 %v5722_v14 }
 0x4c6   : > { %1498 = vmatprep.subr.bf16.mxu1 %v6229_v24 }
 0x4c9   : > { %1499 = vmatpush1.bf16.msra.mxu1 %v5723_v19 }
 0x4ca   : > { %1500 = vmatprep.subr.bf16.mxu1 %v6229_v24 }
 0x4cd   : > { %1501 = vmatpush1.bf16.msra.mxu1 %v5724_v20 }
 0x4ce   : > { %1502 = vmatprep.subr.bf16.mxu1 %v6229_v24 }
 0x4d1   : > { %1503 = vmatpush1.bf16.msra.mxu1 %v5725_v9 }
 0x4d2   : > { %1504 = vmatprep.subr.bf16.mxu1 %v6229_v24 }
 0x4d5   : > { %1505 = vmatpush1.bf16.msra.mxu1 %v5726_v21 }
 0x4d6   : > { %1506 = vmatprep.subr.bf16.mxu1 %v6229_v24 }
 0x4d9   : > { %1507 = vmatpush1.bf16.msra.mxu1 %v5727_v22 }
 0x4da   : > { %1508 = vmatprep.subr.bf16.mxu1 %v6229_v24 }
 0x4dd   : > { %1509 = vmatpush1.bf16.msra.mxu1 %v5728_v23 }
 0x4de   : > { %1510 = vmatprep.subr.bf16.mxu1 %v6229_v24 }
 0x4e1   : > { %1511 = vmatpush1.bf16.msra.mxu1 %v5729_v25 }
 0x4e2   : > { %1520 = vmatprep.subr.bf16.mxu1 %v6229_v24 }
 0x4e5   : > { %1521 = vmatpush2.bf16.msra.mxu1 %v5730_v26  ;;  %v5738_v26 = vld [vmem:[%s7500_s11 + $0x18] sm:$0xff]  }
 0x4e6   : > { %1522 = vmatprep.subr.bf16.mxu1 %v6229_v24 }
 0x4e9   : > { %1523 = vmatpush2.bf16.msra.mxu1 %v5731_v27  ;;  %v5740_v27 = vld [vmem:[%s7500_s11 + $0x8] sm:$0xff]  }
 0x4ea   : > { %1524 = vmatprep.subr.bf16.mxu1 %v6229_v24 }
 0x4ed   : > { %1525 = vmatpush2.bf16.msra.mxu1 %v5732_v28  ;;  %v5741_v28 = vld [vmem:[%s7500_s11] sm:$0xff]  }
 0x4ee   : > { %1526 = vmatprep.subr.bf16.mxu1 %v6229_v24 }
 0x4f1   : > { %1527 = vmatpush2.bf16.msra.mxu1 %v5733_v29 }
 0x4f2   : > { %5263 = vmatprep.subr.bf16.mxu1 %v6224_v0 }
 0x584   : > { %v5237_v30 = vpop.f32.mrf.mxu1 }
 0x585   : > { %v1392_v31 = vpack.c.bf16 %v5237_v30, %v5237_v30 }
 0x586   : > { %v1372_v32 = vpop.f32.mrf.mxu1 }
 0x587   : > { %4872 = vmatprep.mubr.msk.bf16.mxu1 %vm1157_vm6, %v1392_v31 }
 0x588   : > { %v5238_v33 = vpop.f32.mrf.mxu1 }
 0x58a   : > { %v1375_v34 = vpop.f32.mrf.mxu1 }
 0x58b   : > { %1387 = vrot.lane.b32.xlu0 %v1375_v34, %s7535_s30 }
 0x5fd   : > { %v1388_v35 = vpop.permute.xlu0 %1387 }
 0x5fe   : > { %v1390_v36 = vsel %vm1157_vm6, %v1372_v32, %v1388_v35  ;;  %v6776_v32 = vld [vmem:[#allocation10] sm:$0xff] }
 0x5ff   : > { %v1391_v37 = vpack.c.bf16 %v1390_v36, %v1390_v36  ;;  %v1667_v33 = vrot.slane %v6776_v32, %v6650_v59  ;;  %v1672_v36 = vrot.slane %v6776_v32, %v6731_v42 }
 0x601   : > { %1529 = vmatmul.mubr.bf16.vlgmr.msra.gmra.mxu1 %v1391_v37 }
 0x602   : > { %5271 = vmatprep.mubr.msk.bf16.mxu1 %vm6225_vm2, %v6224_v0  ;;  %5264 = vmatpush3.bf16.msra.mxu1 %v5742_v40 }
 0x603   : > { %5265 = vmatprep.subr.bf16.mxu1 %v6224_v0 }
 0x606   : > { %5266 = vmatpush3.bf16.msra.mxu1 %v5743_v41 }
 0x607   : > { %5267 = vmatprep.subr.bf16.mxu1 %v6224_v0 }
 0x6c1   : > { %v1530_v44 = vpop.f32.mrf.mxu1 }
 0x6c2   : > { %v1531_v45 = vadd.f32 %v1530_v44, %v1420_v43  ;;  %v5744_v43 = vld [vmem:[%s7501_s12 + $0x8] sm:$0xff]   ;;  %v5745_v44 = vld [vmem:[%s7501_s12] sm:$0xff]  }
 0x6c3   : > { %v1532_v46 = vpop.f32.mrf.mxu1  ;;  %5268 = vmatpush3.bf16.msra.mxu1 %v5744_v43 }
 0x6c4   : > { %v4873_v47 = vmul.f32 -1.442695, %v1531_v45  ;;  %5269 = vmatprep.subr.bf16.mxu1 %v6224_v0 }
 0x6c5   : > { %v1533_v48 = vpop.f32.mrf.mxu1 }
 0x6c6   : > { %5854 = vpow2.f32 %v4873_v47 }
 0x6c7   : > { %v1534_v49 = vpop.f32.mrf.mxu1  ;;  %5270 = vmatpush3.bf16.msra.mxu1 %v5745_v44 }
 0x6c8   : > { %5275 = vmatprep.subr.bf16.mxu1 %v6224_v0 }
 0x6d3   : > { %v5855_v50 = vpop.eup %5854 }
 0x6d4   : > { %v1539_v51 = vadd.f32 1.0, %v5855_v50 }
 0x6d6   : > { %5856 = vrcp.f32 %v1539_v51 }
 0x6e3   : > { %v5857_v52 = vpop.eup %5856 }
 0x6e4   : > { %v1542_v53 = vmul.f32 %v5857_v52, %v1531_v45  ;;  %v1686_v45 = vrot.slane %v6776_v32, %v6739_v55 }
 0x6e6   : > { %v1543_v54 = vpack.c.bf16 %v1542_v53, %v1542_v53 }
 0x6e8   : > { %5248 = vmatmul.mubr.msk.bf16.vlgmr.msra.gmra.mxu0 %vm1157_vm6, %v1543_v54 }
 0x6e9   : > { %5259 = vmatprep.mubr.msk.bf16.mxu0 %vm6225_vm2, %v6224_v0  ;;  %5252 = vmatpush3.bf16.msra.mxu0 %v5738_v26 }
 0x6ea   : > { %5253 = vmatprep.subr.bf16.mxu0 %v6224_v0 }
 0x6ed   : > { %5254 = vmatpush3.bf16.msra.mxu0 %v5739_v60 }
 0x6ee   : > { %5255 = vmatprep.subr.bf16.mxu0 %v6224_v0 }
 0x6f1   : > { %5256 = vmatpush3.bf16.msra.mxu0 %v5740_v27  ;;  %v6846_v27 = vsub.s32 5, %v6647_v58 }
 0x6f2   : > { %5257 = vmatprep.subr.bf16.mxu0 %v6224_v0 }
 0x6f5   : > { %5258 = vmatpush3.bf16.msra.mxu0 %v5741_v28  ;;  %v1859_v28 = vrot.slane %v6776_v32, %v6749_v13 }
 0x7a8   : > { %v1617_v57 = vpop.f32.mrf.mxu0 }
 0x7a9   : > { %v1618_v61 = vadd.f32 %v1617_v57, %v1555_v56 }
 0x7aa   : > { %v5249_v62 = vpop.f32.mrf.mxu0 }
 0x7ab   : > { %v1623_v63 = vsel %vm1157_vm6, %v1618_v61, 0.0 }
 0x7ac   : > { %1624 = vadd.xlane.f32.xlu1 %v1623_v63  ;;  %v1620_v1 = vpop.f32.mrf.mxu0 }
 0x7ae   : > { %v5250_v2 = vpop.f32.mrf.mxu0 }
 0x835   : > { %v1625_v4 = vpop.xlane.xlu1 %1624 }
 0x836   : > { %v1627_v5 = vmul.f32 0.015625, %v1625_v4 }
 0x838   : > { %v1628_v6 = vsub.f32 %v1618_v61, %v1627_v5  ;;  %v1773_v61 = vrot.slane %v6776_v32, %v6746_v12 }
 0x83a   : > { %v1629_v7 = vmul.f32 %v1628_v6, %v1628_v6 }
 0x83c   : > { %v1630_v10 = vsel %vm1157_vm6, %v1629_v7, 0.0 }
 0x83d   : > { %1631 = vadd.xlane.f32.xlu0 %v1630_v10 }
 0x8c6   : > { %v1632_v8 = vpop.xlane.xlu0 %1631 }
 0x8c7   : > { %v1633_v3 = vmul.f32 0.015625, %v1632_v8 }
 0x8c9   : > { %v1634_v11 = vadd.f32 1e-05, %v1633_v3 }
 0x8cb   : > { %5858 = vrsqrt.f32 %v1634_v11 }
 0x8d8   : > { %v5859_v16 = vpop.eup %5858 }
 0x8d9   : > { %v1636_v17 = vmul.f32 %v5859_v16, %v1628_v6  ;;  %v5748_v16 = vld [vmem:[%s7502_s13 + $0x34] ss:$8 sps:$4 sm:$0xff]  }
 0x8da   : > { %1926 = vmatprep.subr.bf16.mxu0 %v5748_v16 }
 0x8db   : > { %v1641_v14 = vmul.f32 %v1640_v15, %v1636_v17  ;;  %v5746_v17 = vld [vmem:[%s7502_s13 + $0x30] ss:$8 sps:$4 sm:$0xff]  }
 0x8dd   : > { %v6755_v19 = vadd.f32 %v1645_v18, %v1641_v14  ;;  %v5751_v18 = vld [vmem:[%s7502_s13 + $0x24] ss:$8 sps:$4 sm:$0xff]   ;;  %v5749_v14 = vld [vmem:[%s7502_s13 + $0x20] ss:$8 sps:$4 sm:$0xff]  }
 0x8df   : > { %v1651_v20 = vsel %vm1157_vm6, %v6755_v19, 0.0 }
 0x8e0   : > { %1652 = vadd.xlane.f32.xlu0 %v1651_v20  ;;  %v5752_v20 = vld [vmem:[%s7502_s13 + $0x10] ss:$8 sps:$4 sm:$0xff]  }
 0x969   : > { %v1653_v9 = vpop.xlane.xlu0 %1652 }
 0x96a   : > { %v1654_v21 = vmul.f32 0.015625, %v1653_v9  ;;  %v5757_v9 = vld [vmem:[%s7502_s13 + $0x4] ss:$8 sps:$4 sm:$0xff]  }
 0x96c   : > { %v1655_v22 = vsub.f32 %v6755_v19, %v1654_v21  ;;  %v5755_v21 = vld [vmem:[%s7502_s13] ss:$8 sps:$4 sm:$0xff]  }
 0x96e   : > { %v1656_v23 = vmul.f32 %v1655_v22, %v1655_v22 }
 0x970   : > { %v1657_v25 = vsel %vm1157_vm6, %v1656_v23, 0.0 }
 0x971   : > { %1658 = vadd.xlane.f32.xlu1 %v1657_v25 }
 0x9fa   : > { %v1659_v29 = vpop.xlane.xlu1 %1658 }
 0x9fb   : > { %v1660_v30 = vmul.f32 0.015625, %v1659_v29 }
 0x9fd   : > { %v1661_v31 = vadd.f32 1e-05, %v1660_v30 }
 0x9ff   : > { %5860 = vrsqrt.f32 %v1661_v31  ;;  %v1864_v31 = vrot.slane %v6776_v32, %v6846_v27 }
 0xa0c   : > { %v5861_v34 = vpop.eup %5860 }
 0xa0d   : > { %v1663_v35 = vmul.f32 %v5861_v34, %v1655_v22  ;;  %v6840_v22 = vsub.s32 7, %v6647_v58 }
 0xa0f   : > { %v1668_v37 = vmul.f32 %v1667_v33, %v1663_v35  ;;  %v1967_v23 = vrot.slane %v6776_v32, %v6840_v22 }
 0xa11   : > { %v1673_v38 = vadd.f32 %v1672_v36, %v1668_v37  ;;  %v6856_v36 = vsub.s32 6, %v6647_v58  ;;  %v6858_v37 = vld [vmem:[#allocation10 + $0x8] sm:$0xff] }
 0xa12   : > { %v1976_v40 = vrot.slane %v6858_v37, %v6650_v59 }
 0xa13   : > { %v1674_v39 = vpack.c.bf16 %v1673_v38, %v1673_v38  ;;  %v1962_v38 = vrot.slane %v6776_v32, %v6856_v36 }
 0xa15   : > { %5260 = vmatmul.mubr.msk.bf16.vlgmr.msra.gmra.mxu0 %vm1157_vm6, %v1674_v39 }
 0xa16   : > { %1950 = vmatprep.mubr.bf16.mxu0 %v6229_v24  ;;  %1927 = vmatpush1.bf16.msra.mxu0 %v5746_v17 }
 0xa17   : > { %1928 = vmatprep.subr.bf16.mxu0 %v5751_v18 }
 0xa1a   : > { %1929 = vmatpush1.bf16.msra.mxu0 %v5749_v14 }
 0xad5   : > { %v1748_v46 = vpop.f32.mrf.mxu0 }
 0xad6   : > { %v1749_v47 = vadd.f32 %v1748_v46, %v1686_v45 }
 0xad7   : > { %v5261_v48 = vpop.f32.mrf.mxu0 }
 0xad8   : > { %v4884_v49 = vmul.f32 -1.442695, %v1749_v47 }
 0xad9   : > { %v1751_v50 = vpop.f32.mrf.mxu0 }
 0xada   : > { %5862 = vpow2.f32 %v4884_v49 }
 0xadb   : > { %v5262_v51 = vpop.f32.mrf.mxu0 }
 0xae7   : > { %v5863_v52 = vpop.eup %5862 }
 0xae8   : > { %v1757_v53 = vadd.f32 1.0, %v5863_v52 }
 0xaea   : > { %5864 = vrcp.f32 %v1757_v53 }
 0xaf7   : > { %v5865_v54 = vpop.eup %5864 }
 0xaf8   : > { %v1760_v56 = vmul.f32 %v5865_v54, %v1749_v47 }
 0xafa   : > { %v1761_v57 = vpack.c.bf16 %v1760_v56, %v1760_v56 }
 0xafc   : > { %5272 = vmatmul.mubr.msk.bf16.vlgmr.msra.gmra.mxu1 %vm1157_vm6, %v1761_v57 }
 0xafd   : > { %5277 = vmatprep.mubr.msk.bf16.mxu1 %vm6225_vm2, %v6224_v0 }
 0xbbc   : > { %v1835_v62 = vpop.f32.mrf.mxu1 }
 0xbbd   : > { %v1836_v63 = vadd.f32 %v1835_v62, %v1773_v61 }
 0xbbe   : > { %v5273_v1 = vpop.f32.mrf.mxu1 }
 0xbbf   : > { %v1841_v2 = vmul.f32 0.5, %v1836_v63 }
 0xbc0   : > { %v1838_v4 = vpop.f32.mrf.mxu1 }
 0xbc1   : > { %v6808_v5 = vadd.f32 %v1841_v2, %v6755_v19  ;;  %v5754_v19 = vld [vmem:[%s7502_s13 + $0x14] ss:$8 sps:$4 sm:$0xff]  }
 0xbc2   : > { %v5274_v6 = vpop.f32.mrf.mxu1  ;;  %1930 = vmatprep.subr.bf16.mxu0 %v5754_v19 }
 0xbc3   : > { %v1843_v7 = vsel %vm1157_vm6, %v6808_v5, 0.0  ;;  %1931 = vmatpush1.bf16.msra.mxu0 %v5752_v20  ;;  %v4900_v6 = vld [vmem:[%s6900_s24] ss:$0 sm:$0xff] }
 0xbc4   : > { %1844 = vadd.xlane.f32.xlu0 %v1843_v7  ;;  %1932 = vmatprep.subr.bf16.mxu0 %v5757_v9 }
 0xbc7   : > { %1933 = vmatpush1.bf16.msra.mxu0 %v5755_v21 }
 0xbc8   : > { %5281 = vmatprep.subr.bf16.mxu0 %v6224_v0 }
 0xbda   : > { %1969 = vrot.lane.b32.xlu0 %v1967_v23, %s7535_s30 }
 0xc4d   : > { %v1845_v10 = vpop.xlane.xlu0 %1844 }
 0xc4e   : > { %v1846_v8 = vmul.f32 0.015625, %v1845_v10 }
 0xc50   : > { %v1847_v3 = vsub.f32 %v6808_v5, %v1846_v8 }
 0xc51   : > { %v1970_v39 = vpop.permute.xlu0 %1969 }
 0xc52   : > { %v1848_v11 = vmul.f32 %v1847_v3, %v1847_v3 }
 0xc54   : > { %v1849_v15 = vsel %vm1157_vm6, %v1848_v11, 0.0 }
 0xc55   : > { %1850 = vadd.xlane.f32.xlu1 %v1849_v15 }
 0xcde   : > { %v1851_v25 = vpop.xlane.xlu1 %1850 }
 0xcdf   : > { %v1852_v26 = vmul.f32 0.015625, %v1851_v25 }
 0xce1   : > { %v1853_v60 = vadd.f32 1e-05, %v1852_v26 }
 0xce3   : > { %5866 = vrsqrt.f32 %v1853_v60 }
 0xcf0   : > { %v5867_v29 = vpop.eup %5866 }
 0xcf1   : > { %v1855_v30 = vmul.f32 %v5867_v29, %v1847_v3 }
 0xcf3   : > { %v1860_v33 = vmul.f32 %v1859_v28, %v1855_v30 }
 0xcf5   : > { %v1865_v34 = vadd.f32 %v1864_v31, %v1860_v33 }
 0xcf7   : > { %v1866_v35 = vpack.c.bf16 %v1865_v34, %v1865_v34 }
 0xcf9   : > { %4898 = vmatmul.mubr.msk.bf16.vlgmr.msra.gmra.mxu0 %vm1157_vm6, %v1866_v35 }
 0xcfa   : > { %5283 = vmatprep.mubr.msk.bf16.mxu0 %vm6225_vm2, %v6224_v0 }
 0xdb9   : > { %v1952_v41 = vpop.f32.mrf.mxu0 }
 0xdba   : > { %v1963_v43 = vadd.f32 %v1962_v38, %v1952_v41  ;;  %v1972_v44 = vadd.f32 %v1970_v39, %v1952_v41 }
 0xdbb   : > { %v1954_v45 = vpop.f32.mrf.mxu0 }
 0xdbc   : > { %v1978_v46 = vpack.c.bf16 %v1963_v43, %v1963_v43  ;;  %v1979_v47 = vpack.c.bf16 %v1972_v44, %v1972_v44  ;;  %v1977_v48 = vadd.f32 %v1976_v40, %v1954_v45 }
 0xdbd   : > { %v1956_v49 = vpop.f32.mrf.mxu0 }
 0xdbe   : > { %v6864_v58 = vpack.c.bf16 %v1977_v48, %v1977_v48  ;;  %1982 = vrot.lane.b32.xlu1 %v1979_v47, %s7535_s30  ;;  %2099 = vrot.lane.b32.xlu0 %v1978_v46, %s7533_s9 }
 0xdbf   : > { %v1957_v32 = vpop.f32.mrf.mxu0 }
 0xdc0   : > { %v2056_v50 = vsel %vm2054_vm7, %v6864_v58, 0 }
 0xdc1   : > { %5282 = vmatpush3.bf16.msra.mxu0 %v2056_v50 }
 0xdc2   : > { %2101 = vrot.lane.b32.xlu1 %v1979_v47, %s7531_s3  ;;  %2212 = vrot.lane.b32.xlu0 %v1978_v46, %s7529_s0 }
 0xdc3   : > { %5293 = vmatprep.subr.bf16.mxu0 %v6224_v0 }
 0xdc6   : > { %2214 = vrot.lane.b32.xlu1 %v1979_v47, %s7576_s29  ;;  %2324 = vrot.lane.b32.xlu0 %v1978_v46, %s7527_s1 }
 0xdca   : > { %2326 = vrot.lane.b32.xlu1 %v1979_v47, %s7577_s23 }
 0xe30   : > { %v1983_v51 = vpop.permute.xlu1 %1982  ;;  %v2100_v57 = vpop.permute.xlu0 %2099 }
 0xe31   : > { %v1988_v52 = vsel %vm872_vm3, %v1983_v51, 0 }
 0xe32   : > { %5276 = vmatpush3.bf16.xpose.msra.mxu1 %v1988_v52 }
 0xe33   : > { %5287 = vmatprep.subr.bf16.mxu1 %v6224_v0 }
 0xe34   : > { %v2102_v53 = vpop.permute.xlu1 %2101  ;;  %v2213_v63 = vpop.permute.xlu0 %2212 }
 0xe35   : > { %v2107_v54 = vsel %vm872_vm3, %v2102_v53, 0 }
 0xe38   : > { %v2215_v56 = vpop.permute.xlu1 %2214  ;;  %v2325_v2 = vpop.permute.xlu0 %2324 }
 0xe39   : > { %5278 = vmatmul.mubr.msk.bf16.vlgmr.msra.gmra.mxu1 %vm872_vm3, %v1978_v46  ;;  %v2220_v61 = vsel %vm872_vm3, %v2215_v56, 0 }
 0xe3a   : > { %5288 = vmatpush3.bf16.xpose.msra.mxu1 %v2107_v54  ;;  %5289 = vmatprep.mubr.msk.bf16.mxu1 %vm6225_vm2, %v6224_v0 }
 0xe3b   : > { %5299 = vmatprep.subr.bf16.mxu1 %v6224_v0 }
 0xe3c   : > { %v2327_v62 = vpop.permute.xlu1 %2326 }
 0xe3d   : > { %v2332_v1 = vsel %vm872_vm3, %v2327_v62, 0 }
 0xe41   : > { %5290 = vmatmul.mubr.msk.bf16.vlgmr.msra.gmra.mxu1 %vm872_vm3, %v2100_v57 }
 0xe42   : > { %5300 = vmatpush3.bf16.xpose.msra.mxu1 %v2220_v61  ;;  %5301 = vmatprep.mubr.msk.bf16.mxu1 %vm6225_vm2, %v6224_v0 }
 0xe43   : > { %5311 = vmatprep.subr.bf16.mxu1 %v6224_v0 }
 0xe49   : > { %5302 = vmatmul.mubr.msk.bf16.vlgmr.msra.gmra.mxu1 %vm872_vm3, %v2213_v63 }
 0xe4a   : > { %5312 = vmatpush3.bf16.xpose.msra.mxu1 %v2332_v1  ;;  %5313 = vmatprep.mubr.msk.bf16.mxu1 %vm6225_vm2, %v6224_v0 }
 0xe4b   : > { %5323 = vmatprep.subr.bf16.mxu1 %v6224_v0 }
 0xe51   : > { %5314 = vmatmul.mubr.msk.bf16.vlgmr.msra.gmra.mxu1 %vm872_vm3, %v2325_v2 }
 0xe52   : > { %5331 = vmatprep.mubr.msk.bf16.mxu1 %vm6225_vm2, %v6224_v0 }
 0xef9   : > { %v2024_v4 = vpop.f32.mrf.mxu1 }
 0xefa   : > { %v2030_v7 = vmul.f32 0.25, %v2024_v4 }
 0xefb   : > { %v5279_v10 = vpop.f32.mrf.mxu1 }
 0xefc   : > { %v2037_v8 = vadd.f32 %v4900_v6, %v2030_v7 }
 0xefd   : > { %v2027_v3 = vpop.f32.mrf.mxu1 }
 0xefe   : > { %v2039_v11 = vsel %vm2038_vm8, %v2037_v8, -inf }
 0xeff   : > { %2040 = vmax.xlane.f32.xlu1 %v2039_v11  ;;  %v5280_v15 = vpop.f32.mrf.mxu1 }
 0xf01   : > { %v2143_v16 = vpop.f32.mrf.mxu1 }
 0xf02   : > { %v2149_v17 = vmul.f32 0.25, %v2143_v16 }
 0xf03   : > { %v5291_v18 = vpop.f32.mrf.mxu1 }
 0xf04   : > { %v2150_v14 = vadd.f32 %v4900_v6, %v2149_v17 }
 0xf05   : > { %v2146_v19 = vpop.f32.mrf.mxu1 }
 0xf06   : > { %v2151_v20 = vsel %vm2038_vm8, %v2150_v14, -inf }
 0xf07   : > { %2152 = vmax.xlane.f32.xlu0 %v2151_v20  ;;  %v5292_v9 = vpop.f32.mrf.mxu1 }
 0xf09   : > { %v2256_v21 = vpop.f32.mrf.mxu1 }
 0xf0a   : > { %v2262_v23 = vmul.f32 0.25, %v2256_v21 }
 0xf0b   : > { %v5303_v25 = vpop.f32.mrf.mxu1 }
 0xf0c   : > { %v2263_v26 = vadd.f32 %v4900_v6, %v2262_v23 }
 0xf0d   : > { %v2259_v60 = vpop.f32.mrf.mxu1 }
 0xf0e   : > { %v2264_v28 = vsel %vm2038_vm8, %v2263_v26, -inf }
 0xf0f   : > { %2265 = vmax.xlane.f32.xlu0 %v2264_v28  ;;  %v5304_v29 = vpop.f32.mrf.mxu1 }
 0xf11   : > { %v2368_v30 = vpop.f32.mrf.mxu1 }
 0xf12   : > { %v2374_v31 = vmul.f32 0.25, %v2368_v30  ;;  %v5758_v30 = vld [vmem:[%s7503_s14 + $0x18] sm:$0xff]  }
 0xf13   : > { %v5315_v33 = vpop.f32.mrf.mxu1  ;;  %5324 = vmatpush3.bf16.msra.mxu1 %v5758_v30 }
 0xf14   : > { %v2375_v34 = vadd.f32 %v4900_v6, %v2374_v31  ;;  %v5759_v33 = vld [vmem:[%s7503_s14 + $0x10] sm:$0xff]   ;;  %5325 = vmatprep.subr.bf16.mxu1 %v6224_v0 }
 0xf15   : > { %v2371_v35 = vpop.f32.mrf.mxu1 }
 0xf16   : > { %v2376_v38 = vsel %vm2038_vm8, %v2375_v34, -inf }
 0xf17   : > { %2377 = vmax.xlane.f32.xlu1 %v2376_v38  ;;  %v5316_v39 = vpop.f32.mrf.mxu1  ;;  %5326 = vmatpush3.bf16.msra.mxu1 %v5759_v33  ;;  %v5760_v38 = vld [vmem:[%s7503_s14 + $0x8] sm:$0xff]  }
 0xf18   : > { %5327 = vmatprep.subr.bf16.mxu1 %v6224_v0 }
 0xf1b   : > { %5328 = vmatpush3.bf16.msra.mxu1 %v5760_v38 }
 0xf1c   : > { %5329 = vmatprep.subr.bf16.mxu1 %v6224_v0 }
 0xf88   : > { %v2041_v40 = vpop.xlane.xlu1 %2040 }
 0xf89   : > { %v2042_v41 = vsub.f32 %v2037_v8, %v2041_v40 }
 0xf8b   : > { %v2043_v43 = vmul.f32 1.442695, %v2042_v41 }
 0xf8d   : > { %5868 = vpow2.f32 %v2043_v43 }
 0xf90   : > { %v2153_v44 = vpop.xlane.xlu0 %2152 }
 0xf91   : > { %v2154_v45 = vsub.f32 %v2150_v14, %v2153_v44 }
 0xf93   : > { %v2155_v46 = vmul.f32 1.442695, %v2154_v45 }
 0xf95   : > { %5870 = vpow2.f32 %v2155_v46  ;;  %v5761_v46 = vld [vmem:[%s7503_s14] sm:$0xff]  }
 0xf96   : > { %5330 = vmatpush3.bf16.msra.mxu1 %v5761_v46 }
 0xf97   : > { %5347 = vmatprep.subr.bf16.mxu1 %v6224_v0 }
 0xf98   : > { %v2266_v47 = vpop.xlane.xlu0 %2265 }
 0xf99   : > { %v2267_v48 = vsub.f32 %v2263_v26, %v2266_v47 }
 0xf9a   : > { %v5869_v49 = vpop.eup %5868 }
 0xf9b   : > { %v2268_v32 = vmul.f32 1.442695, %v2267_v48  ;;  %v2045_v50 = vsel %vm2038_vm8, %v5869_v49, 0.0 }
 0xf9c   : > { %2046 = vadd.xlane.f32.xlu0 %v2045_v50 }
 0xf9d   : > { %5872 = vpow2.f32 %v2268_v32 }
 0xfa0   : > { %v2378_v56 = vpop.xlane.xlu1 %2377 }
 0xfa1   : > { %v2379_v57 = vsub.f32 %v2375_v34, %v2378_v56 }
 0xfa2   : > { %v5871_v51 = vpop.eup %5870 }
 0xfa3   : > { %v2157_v52 = vsel %vm2038_vm8, %v5871_v51, 0.0  ;;  %v2380_v61 = vmul.f32 1.442695, %v2379_v57 }
 0xfa4   : > { %2158 = vadd.xlane.f32.xlu1 %v2157_v52 }
 0xfa5   : > { %5874 = vpow2.f32 %v2380_v61  ;;  %v2531_v61 = vrot.slane %v6858_v37, %v6731_v42 }
 0xfaa   : > { %v5873_v53 = vpop.eup %5872 }
 0xfab   : > { %v2270_v54 = vsel %vm2038_vm8, %v5873_v53, 0.0 }
 0xfac   : > { %2271 = vadd.xlane.f32.xlu0 %v2270_v54 }
 0xfb2   : > { %v5875_v62 = vpop.eup %5874 }
 0xfb3   : > { %v2382_v63 = vsel %vm2038_vm8, %v5875_v62, 0.0 }
 0xfb5   : > { %2276 = vrot.lane.b32.xlu1 %v6864_v58, %s7529_s0  ;;  %s7581_s0 = smov 48  }
 0xfc2   : > { %2164 = vrot.lane.b32.xlu0 %v6864_v58, %s7533_s9  ;;  %s6139_s9 = sshll.u32 %s6234_s26, 4  ;;  %s6140_s9 = int_to_ptr.vmem [resolvable:$false] %s6139_s9 }
 0xfd9   : > { %2383 = vadd.xlane.f32.xlu1 %v2382_v63 }
 0xfea   : > { %2388 = vrot.lane.b32.xlu1 %v6864_v58, %s7527_s1  ;;  %s7582_s1 = smov 96  }
0x1025   : > { %v2047_v1 = vpop.xlane.xlu0 %2046 }
0x1026   : > { %5876 = vrcp.f32 %v2047_v1 }
0x102d   : > { %v2159_v2 = vpop.xlane.xlu1 %2158 }
0x102e   : > { %5878 = vrcp.f32 %v2159_v2 }
0x1031   : > { %v2277_v15 = vpop.permute.xlu1 %2276 }
0x1032   : > { %v2282_v17 = vsel %vm2054_vm7, %v2277_v15, 0  ;;  %v5763_v15 = vld [vmem:[%s7504_s15 + $0x10] sm:$0xff]  }
0x1033   : > { %v5877_v4 = vpop.eup %5876 }
0x1034   : > { %v2049_v6 = vmul.f32 %v5877_v4, %v5869_v49 }
0x1035   : > { %v2272_v7 = vpop.xlane.xlu0 %2271 }
0x1036   : > { %5880 = vrcp.f32 %v2272_v7  ;;  %v2050_v10 = vpack.c.bf16 %v2049_v6, %v2049_v6 }
0x1038   : > { %5284 = vmatmul.mubr.msk.bf16.vlgmr.msra.gmra.mxu0 %vm2038_vm8, %v2050_v10 }
0x1039   : > { %v2165_v8 = vpop.permute.xlu0 %2164  ;;  %5295 = vmatprep.mubr.msk.bf16.mxu0 %vm6225_vm2, %v6224_v0 }
0x103a   : > { %v2170_v3 = vsel %vm2054_vm7, %v2165_v8, 0 }
0x103b   : > { %v5879_v11 = vpop.eup %5878  ;;  %5294 = vmatpush3.bf16.msra.mxu0 %v2170_v3 }
0x103c   : > { %5305 = vmatprep.subr.bf16.mxu0 %v6224_v0  ;;  %v2161_v58 = vmul.f32 %v5879_v11, %v5871_v51 }
0x103e   : > { %v2162_v16 = vpack.c.bf16 %v2161_v58, %v2161_v58 }
0x1040   : > { %5296 = vmatmul.mubr.msk.bf16.vlgmr.msra.gmra.mxu0 %vm2038_vm8, %v2162_v16  ;;  %v5764_v16 = vld [vmem:[%s7504_s15 + $0x8] sm:$0xff]  }
0x1041   : > { %5306 = vmatpush3.bf16.msra.mxu0 %v2282_v17  ;;  %5307 = vmatprep.mubr.msk.bf16.mxu0 %vm6225_vm2, %v6224_v0  ;;  %v5765_v17 = vld [vmem:[%s7504_s15] sm:$0xff]  }
0x1042   : > { %5317 = vmatprep.subr.bf16.mxu0 %v6224_v0 }
0x1043   : > { %v5881_v18 = vpop.eup %5880 }
0x1044   : > { %v2274_v14 = vmul.f32 %v5881_v18, %v5873_v53  ;;  %v2640_v18 = vrot.slane %v6858_v37, %v6846_v27 }
0x1046   : > { %v2275_v19 = vpack.c.bf16 %v2274_v14, %v2274_v14 }
0x1048   : > { %5308 = vmatmul.mubr.msk.bf16.vlgmr.msra.gmra.mxu0 %vm2038_vm8, %v2275_v19 }
0x1049   : > { %5319 = vmatprep.mubr.msk.bf16.mxu0 %vm6225_vm2, %v6224_v0 }
0x1062   : > { %v2384_v20 = vpop.xlane.xlu1 %2383 }
0x1063   : > { %5882 = vrcp.f32 %v2384_v20 }
0x1066   : > { %v2389_v9 = vpop.permute.xlu1 %2388 }
0x1067   : > { %v2394_v21 = vsel %vm2054_vm7, %v2389_v9, 0  ;;  %v2549_v9 = vrot.slane %v6858_v37, %v6739_v55 }
0x1068   : > { %5318 = vmatpush3.bf16.msra.mxu0 %v2394_v21 }
0x1069   : > { %5335 = vmatprep.subr.bf16.mxu0 %v6224_v0 }
0x1070   : > { %v5883_v23 = vpop.eup %5882 }
0x1071   : > { %v2386_v25 = vmul.f32 %v5883_v23, %v5875_v62 }
0x1073   : > { %v2387_v26 = vpack.c.bf16 %v2386_v25, %v2386_v25  ;;  %v2554_v25 = vrot.slane %v6858_v37, %v6746_v12 }
0x1075   : > { %5320 = vmatmul.mubr.msk.bf16.vlgmr.msra.gmra.mxu0 %vm2038_vm8, %v2387_v26 }
0x1076   : > { %5343 = vmatprep.mubr.msk.bf16.mxu0 %vm6225_vm2, %v6224_v0 }
0x10f8   : > { %v2092_v60 = vpop.f32.mrf.mxu0 }
0x10fa   : > { %v5285_v28 = vpop.f32.mrf.mxu0 }
0x10fc   : > { %v2095_v29 = vpop.f32.mrf.mxu0 }
0x10fe   : > { %v5286_v31 = vpop.f32.mrf.mxu0 }
0x1100   : > { %v2206_v34 = vpop.f32.mrf.mxu0 }
0x1101   : > { %2437 = vrot.lane.b32.xlu0 %v2206_v34, %s7577_s23 }
0x1102   : > { %v5297_v35 = vpop.f32.mrf.mxu0 }
0x1104   : > { %v2209_v39 = vpop.f32.mrf.mxu0 }
0x1106   : > { %v5298_v40 = vpop.f32.mrf.mxu0 }
0x1108   : > { %v2318_v41 = vpop.f32.mrf.mxu0 }
0x1109   : > { %2441 = vrot.lane.b32.xlu1 %v2318_v41, %s7576_s29 }
0x110a   : > { %v5309_v43 = vpop.f32.mrf.mxu0 }
0x110b   : > { %v2635_v43 = vrot.slane %v6858_v37, %v6749_v13 }
0x110c   : > { %v2321_v44 = vpop.f32.mrf.mxu0 }
0x110e   : > { %v5310_v45 = vpop.f32.mrf.mxu0 }
0x110f   : > { %v2662_v45 = vld [vmem:[%s7508_s19] sm:$0xff] }
0x1135   : > { %v2430_v47 = vpop.f32.mrf.mxu0 }
0x1136   : > { %2445 = vrot.lane.b32.xlu0 %v2430_v47, %s7531_s3 }
0x1137   : > { %v5321_v48 = vpop.f32.mrf.mxu0 }
0x1138   : > { %v2673_v48 = vrot.slane %v2662_v45, %v6731_v42 }
0x1139   : > { %v2433_v49 = vpop.f32.mrf.mxu0 }
0x113a   : > { %v2686_v49 = vrot.slane %v2662_v45, %v6739_v55 }
0x113b   : > { %v5322_v32 = vpop.f32.mrf.mxu0 }
0x113c   : > { %v2699_v32 = vrot.slane %v2662_v45, %v6746_v12 }
0x1173   : > { %v2438_v50 = vpop.permute.xlu0 %2437 }
0x1174   : > { %v2448_v52 = vsel %vm872_vm3, %v2092_v60, %v2438_v50 }
0x117b   : > { %v2442_v51 = vpop.permute.xlu1 %2441 }
0x117c   : > { %v2449_v53 = vsel %vm879_vm4, %v2448_v52, %v2442_v51  ;;  %v2713_v51 = vrot.slane %v2662_v45, %v6749_v13  ;;  %v2667_v52 = vrot.slane %v2662_v45, %v6650_v59 }
0x11a8   : > { %v2446_v54 = vpop.permute.xlu0 %2445 }
0x11a9   : > { %v2450_v56 = vsel %vm920_vm5, %v2449_v53, %v2446_v54 }
0x11aa   : > { %v2451_v57 = vpack.c.bf16 %v2450_v56, %v2450_v56  ;;  %v2726_v56 = vrot.slane %v2662_v45, %v6846_v27 }
0x11ac   : > { %5332 = vmatmul.mubr.msk.bf16.vlgmr.msra.gmra.mxu1 %vm1157_vm6, %v2451_v57  ;;  %v2740_v57 = vrot.slane %v2662_v45, %v6856_v36 }
0x11ad   : > { %5355 = vmatprep.mubr.msk.bf16.mxu1 %vm6225_vm2, %v6224_v0 }
0x126c   : > { %v2521_v62 = vpop.f32.mrf.mxu1 }
0x126d   : > { %v2527_v63 = vadd.f32 %v2521_v62, %v6808_v5  ;;  %v5762_v5 = vld [vmem:[%s7504_s15 + $0x18] sm:$0xff]  }
0x126e   : > { %v5333_v1 = vpop.f32.mrf.mxu1  ;;  %5336 = vmatpush3.bf16.msra.mxu0 %v5762_v5 }
0x126f   : > { %v6963_v2 = vadd.f32 %v2531_v61, %v2527_v63  ;;  %5337 = vmatprep.subr.bf16.mxu0 %v6224_v0 }
0x1270   : > { %v2524_v4 = vpop.f32.mrf.mxu1 }
0x1271   : > { %v2533_v6 = vsel %vm1157_vm6, %v6963_v2, 0.0 }
0x1272   : > { %2534 = vadd.xlane.f32.xlu1 %v2533_v6  ;;  %v5334_v7 = vpop.f32.mrf.mxu1  ;;  %5338 = vmatpush3.bf16.msra.mxu0 %v5763_v15 }
0x1273   : > { %5339 = vmatprep.subr.bf16.mxu0 %v6224_v0 }
0x1276   : > { %5340 = vmatpush3.bf16.msra.mxu0 %v5764_v16 }
0x1277   : > { %5341 = vmatprep.subr.bf16.mxu0 %v6224_v0 }
0x127a   : > { %5342 = vmatpush3.bf16.msra.mxu0 %v5765_v17 }
0x127b   : > { %5359 = vmatprep.subr.bf16.mxu0 %v6224_v0 }
0x12fb   : > { %v2535_v10 = vpop.xlane.xlu1 %2534 }
0x12fc   : > { %v2536_v8 = vmul.f32 0.015625, %v2535_v10 }
0x12fe   : > { %v2537_v3 = vsub.f32 %v6963_v2, %v2536_v8 }
0x1300   : > { %v2538_v11 = vmul.f32 %v2537_v3, %v2537_v3 }
0x1302   : > { %v2539_v58 = vsel %vm1157_vm6, %v2538_v11, 0.0 }
0x1303   : > { %2540 = vadd.xlane.f32.xlu0 %v2539_v58 }
0x1319   : > { %2642 = vrot.lane.b32.xlu0 %v2640_v18, %s7535_s30 }
0x138c   : > { %v2541_v14 = vpop.xlane.xlu0 %2540 }
0x138d   : > { %v2542_v19 = vmul.f32 0.015625, %v2541_v14 }
0x138f   : > { %v2543_v20 = vadd.f32 1e-05, %v2542_v19  ;;  %v2754_v19 = vrot.slane %v2662_v45, %v6840_v22 }
0x1390   : > { %v2643_v29 = vpop.permute.xlu0 %2642 }
0x1391   : > { %5884 = vrsqrt.f32 %v2543_v20 }
0x139e   : > { %v5885_v21 = vpop.eup %5884 }
0x139f   : > { %v2545_v23 = vmul.f32 %v5885_v21, %v2537_v3 }
0x13a1   : > { %v2550_v26 = vmul.f32 %v2549_v9, %v2545_v23 }
0x13a3   : > { %v2555_v60 = vadd.f32 %v2554_v25, %v2550_v26 }
0x13a5   : > { %v2556_v28 = vpack.c.bf16 %v2555_v60, %v2555_v60 }
0x13a7   : > { %5344 = vmatmul.mubr.msk.bf16.vlgmr.msra.gmra.mxu0 %vm1157_vm6, %v2556_v28 }
0x13a8   : > { %5367 = vmatprep.mubr.msk.bf16.mxu0 %vm6225_vm2, %v6224_v0 }
0x1467   : > { %v2626_v30 = vpop.f32.mrf.mxu0 }
0x1468   : > { %v2645_v31 = vadd.f32 %v2643_v29, %v2626_v30  ;;  %v2636_v44 = vadd.f32 %v2635_v43, %v2626_v30 }
0x1469   : > { %v5345_v33 = vpop.f32.mrf.mxu0 }
0x146a   : > { %v4918_v34 = vmul.f32 -1.442695, %v2645_v31 }
0x146b   : > { %v2629_v35 = vpop.f32.mrf.mxu0 }
0x146c   : > { %5886 = vpow2.f32 %v4918_v34 }
0x146d   : > { %v5346_v38 = vpop.f32.mrf.mxu0 }
0x1479   : > { %v5887_v39 = vpop.eup %5886 }
0x147a   : > { %v2649_v40 = vadd.f32 1.0, %v5887_v39 }
0x147c   : > { %5888 = vrcp.f32 %v2649_v40 }
0x1489   : > { %v5889_v41 = vpop.eup %5888 }
0x148a   : > { %2653 = vrot.lane.b32.xlu1 %v5889_v41, %s7535_s30  ;;  %s7579_s30 = smov 64  }
0x14fc   : > { %v2654_v46 = vpop.permute.xlu1 %2653 }
0x14fd   : > { %v2656_v47 = vmul.f32 %v2654_v46, %v2636_v44  ;;  %v4919_v46 = vld [vmem:[%s7508_s19 + $0x8] ss:$0 sm:$0xff] }
0x14ff   : > { %v2658_v50 = vrot.slane %v2656_v47, 4 }
0x1501   : > { %v2660_v53 = vsel %vm2054_vm7, 0.0, %v2658_v50  ;;  %v2661_v54 = vsel %vm2054_vm7, %v2658_v50, 0.0 }
0x1502   : > { %v2674_v61 = vmul.f32 %v2673_v48, %v2660_v53  ;;  %v2675_v62 = vmul.f32 %v2673_v48, %v2661_v54  ;;  %v2687_v63 = vmul.f32 %v2686_v49, %v2660_v53  ;;  %v2688_v1 = vmul.f32 %v2686_v49, %v2661_v54 }
0x1503   : > { %v2700_v4 = vmul.f32 %v2699_v32, %v2660_v53  ;;  %v2701_v6 = vmul.f32 %v2699_v32, %v2661_v54  ;;  %v2714_v7 = vmul.f32 %v2713_v51, %v2660_v53  ;;  %v2715_v11 = vmul.f32 %v2713_v51, %v2661_v54 }
0x1504   : > { %v2678_v10 = vrot.slane %v2674_v61, 1  ;;  %v2679_v8 = vrot.slane %v2675_v62, 1  ;;  %v2691_v3 = vrot.slane %v2687_v63, 2  ;;  %v2668_v58 = vmul.f32 %v2667_v52, %v2660_v53 }
0x1505   : > { %v2692_v5 = vrot.slane %v2688_v1, 2  ;;  %v2705_v15 = vrot.slane %v2700_v4, 3  ;;  %v2706_v16 = vrot.slane %v2701_v6, 3  ;;  %v2727_v18 = vmul.f32 %v2726_v56, %v2660_v53  ;;  %v5766_v4 = vld [vmem:[%s7505_s16 + $0x18] sm:$0xff]   ;;  %v5768_v6 = vld [vmem:[%s7505_s16 + $0x8] sm:$0xff]  }
0x1506   : > { %v2680_v17 = vsel %vm808_vm0, %v2678_v10, %v2679_v8  ;;  %v2728_v14 = vmul.f32 %v2726_v56, %v2661_v54  ;;  %v2718_v9 = vrot.slane %v2714_v7, 4  ;;  %v2719_v23 = vrot.slane %v2715_v11, 4  ;;  %5348 = vmatpush3.bf16.msra.mxu1 %v5766_v4  ;;  %v5769_v7 = vld [vmem:[%s7505_s16] sm:$0xff]   ;;  %v7041_v11 = vld [vmem:[#allocation10 + $0x10] sm:$0xff] }
0x1507   : > { %v2682_v20 = vadd.f32 %v2680_v17, %v2668_v58  ;;  %v2693_v21 = vsel %vm840_vm1, %v2691_v3, %v2692_v5  ;;  %v2741_v25 = vmul.f32 %v2740_v57, %v2660_v53  ;;  %v2742_v26 = vmul.f32 %v2740_v57, %v2661_v54  ;;  %5349 = vmatprep.subr.bf16.mxu1 %v6224_v0 }
0x1508   : > { %v2707_v28 = vsel %vm2704_vm9, %v2705_v15, %v2706_v16  ;;  %v2732_v29 = vrot.slane %v2727_v18, 5  ;;  %v2733_v30 = vrot.slane %v2728_v14, 5  ;;  %v2755_v31 = vmul.f32 %v2754_v19, %v2660_v53 }
0x1509   : > { %v2695_v60 = vadd.f32 %v2693_v21, %v2682_v20  ;;  %v2756_v33 = vmul.f32 %v2754_v19, %v2661_v54  ;;  %v2720_v35 = vsel %vm2054_vm7, %v2718_v9, %v2719_v23  ;;  %v2746_v38 = vrot.slane %v2741_v25, 6 }
0x150a   : > { %v2747_v39 = vrot.slane %v2742_v26, 6  ;;  %v2734_v41 = vsel %vm2731_vm10, %v2732_v29, %v2733_v30  ;;  %v2760_v43 = vrot.slane %v2755_v31, 7  ;;  %v2769_v50 = vmul.f32 %v4919_v46, %v2661_v54  ;;  %v5767_v54 = vld [vmem:[%s7505_s16 + $0x10] sm:$0xff]  }
0x150b   : > { %v2709_v34 = vadd.f32 %v2707_v28, %v2695_v60  ;;  %v2761_v44 = vrot.slane %v2756_v33, 7  ;;  %v2774_v51 = vrot.slane %v6858_v37, %v6856_v36  ;;  %5350 = vmatpush3.bf16.msra.mxu1 %v5767_v54  ;;  %v2792_v58 = vrot.slane %v6858_v37, %v6840_v22 }
0x150c   : > { %v2748_v47 = vsel %vm2745_vm11, %v2746_v38, %v2747_v39  ;;  %5351 = vmatprep.subr.bf16.mxu1 %v6224_v0  ;;  %v2797_v16 = vrot.slane %v7041_v11, %v6650_v59  ;;  %v2886_v37 = vrot.slane %v7041_v11, %v6731_v42 }
0x150d   : > { %v2722_v40 = vadd.f32 %v2720_v35, %v2709_v34  ;;  %v2762_v49 = vsel %vm2759_vm12, %v2760_v43, %v2761_v44  ;;  %v5773_v43 = vld [vmem:[%s7506_s17] sm:$0xff]  }
0x150f   : > { %v2736_v45 = vadd.f32 %v2734_v41, %v2722_v40  ;;  %5352 = vmatpush3.bf16.msra.mxu1 %v5768_v6  ;;  %v5771_v40 = vld [vmem:[%s7506_s17 + $0x10] sm:$0xff]   ;;  %v5772_v41 = vld [vmem:[%s7506_s17 + $0x8] sm:$0xff]  }
0x1510   : > { %5353 = vmatprep.subr.bf16.mxu1 %v6224_v0 }
0x1511   : > { %v2750_v48 = vadd.f32 %v2748_v47, %v2736_v45  ;;  %v2904_v47 = vrot.slane %v7041_v11, %v6739_v55 }
0x1513   : > { %v2764_v32 = vadd.f32 %v2762_v49, %v2750_v48  ;;  %5354 = vmatpush3.bf16.msra.mxu1 %v5769_v7 }
0x1514   : > { %5371 = vmatprep.subr.bf16.mxu1 %v6224_v0 }
0x1515   : > { %v2770_v52 = vadd.f32 %v2769_v50, %v2764_v32  ;;  %v2909_v32 = vrot.slane %v7041_v11, %v6746_v12 }
0x1517   : > { %v2775_v53 = vadd.f32 %v2774_v51, %v2770_v52 }
0x1519   : > { %v2776_v56 = vsel %vm1157_vm6, %v2775_v53, 0.0 }
0x151a   : > { %2777 = vadd.xlane.f32.xlu1 %v2776_v56  ;;  %v5775_v56 = vld [vmem:[%s7507_s18 + $0x10] sm:$0xff]  }
0x15a3   : > { %v2778_v57 = vpop.xlane.xlu1 %2777 }
0x15a4   : > { %v2779_v61 = vmul.f32 0.015625, %v2778_v57  ;;  %v5776_v57 = vld [vmem:[%s7507_s18 + $0x8] sm:$0xff]  }
0x15a6   : > { %v2780_v62 = vsub.f32 %v2775_v53, %v2779_v61  ;;  %v5774_v53 = vld [vmem:[%s7507_s18 + $0x18] sm:$0xff]   ;;  %v5777_v61 = vld [vmem:[%s7507_s18] sm:$0xff]  }
0x15a8   : > { %v2781_v63 = vmul.f32 %v2780_v62, %v2780_v62 }
0x15aa   : > { %v2782_v1 = vsel %vm1157_vm6, %v2781_v63, 0.0 }
0x15ab   : > { %2783 = vadd.xlane.f32.xlu0 %v2782_v1 }
0x1634   : > { %v2784_v10 = vpop.xlane.xlu0 %2783 }
0x1635   : > { %v2785_v8 = vmul.f32 0.015625, %v2784_v10 }
0x1637   : > { %v2786_v3 = vadd.f32 1e-05, %v2785_v8 }
0x1639   : > { %5890 = vrsqrt.f32 %v2786_v3 }
0x1646   : > { %v5891_v5 = vpop.eup %5890 }
0x1647   : > { %v2788_v15 = vmul.f32 %v5891_v5, %v2780_v62  ;;  %v2923_v62 = vrot.slane %v7041_v11, %v6749_v13 }
0x1649   : > { %v2793_v17 = vmul.f32 %v2792_v58, %v2788_v15  ;;  %v3010_v15 = vrot.slane %v7041_v11, %v6846_v27 }
0x164b   : > { %v2798_v18 = vadd.f32 %v2797_v16, %v2793_v17 }
0x164d   : > { %v4920_v14 = vmul.f32 -1.442695, %v2798_v18 }
0x164f   : > { %5892 = vpow2.f32 %v4920_v14 }
0x165c   : > { %v5893_v19 = vpop.eup %5892 }
0x165d   : > { %v2802_v20 = vadd.f32 1.0, %v5893_v19 }
0x165f   : > { %5894 = vrcp.f32 %v2802_v20 }
0x166c   : > { %v5895_v9 = vpop.eup %5894 }
0x166d   : > { %v2805_v21 = vmul.f32 %v5895_v9, %v2798_v18 }
0x166f   : > { %v2806_v23 = vpack.c.bf16 %v2805_v21, %v2805_v21 }
0x1671   : > { %5356 = vmatmul.mubr.msk.bf16.vlgmr.msra.gmra.mxu1 %vm1157_vm6, %v2806_v23 }
0x1672   : > { %5379 = vmatprep.mubr.msk.bf16.mxu1 %vm6225_vm2, %v6224_v0  ;;  %5372 = vmatpush3.bf16.msra.mxu1 %v5774_v53 }
0x1673   : > { %5373 = vmatprep.subr.bf16.mxu1 %v6224_v0 }
0x1676   : > { %5374 = vmatpush3.bf16.msra.mxu1 %v5775_v56 }
0x1677   : > { %5375 = vmatprep.subr.bf16.mxu1 %v6224_v0 }
0x167a   : > { %5376 = vmatpush3.bf16.msra.mxu1 %v5776_v57 }
0x167b   : > { %5377 = vmatprep.subr.bf16.mxu1 %v6224_v0 }
0x167e   : > { %5378 = vmatpush3.bf16.msra.mxu1 %v5777_v61 }
0x167f   : > { %5395 = vmatprep.subr.bf16.mxu1 %v6224_v0 }
0x1731   : > { %v2876_v25 = vpop.f32.mrf.mxu1 }
0x1732   : > { %v2882_v26 = vadd.f32 %v2876_v25, %v6963_v2  ;;  %v5770_v2 = vld [vmem:[%s7506_s17 + $0x18] sm:$0xff]  }
0x1733   : > { %v5357_v60 = vpop.f32.mrf.mxu1  ;;  %5360 = vmatpush3.bf16.msra.mxu0 %v5770_v2 }
0x1734   : > { %v7053_v28 = vadd.f32 %v2886_v37, %v2882_v26  ;;  %5361 = vmatprep.subr.bf16.mxu0 %v6224_v0 }
0x1735   : > { %v2879_v29 = vpop.f32.mrf.mxu1 }
0x1736   : > { %v2888_v30 = vsel %vm1157_vm6, %v7053_v28, 0.0 }
0x1737   : > { %2889 = vadd.xlane.f32.xlu0 %v2888_v30  ;;  %v5358_v31 = vpop.f32.mrf.mxu1  ;;  %5362 = vmatpush3.bf16.msra.mxu0 %v5771_v40 }
0x1738   : > { %5363 = vmatprep.subr.bf16.mxu0 %v6224_v0 }
0x173b   : > { %5364 = vmatpush3.bf16.msra.mxu0 %v5772_v41 }
0x173c   : > { %5365 = vmatprep.subr.bf16.mxu0 %v6224_v0 }
0x173f   : > { %5366 = vmatpush3.bf16.msra.mxu0 %v5773_v43 }
0x1740   : > { %5383 = vmatprep.subr.bf16.mxu0 %v6224_v0 }
0x17c0   : > { %v2890_v33 = vpop.xlane.xlu0 %2889 }
0x17c1   : > { %v2891_v34 = vmul.f32 0.015625, %v2890_v33  ;;  %v3096_v33 = vrot.slane %v7041_v11, %v6856_v36 }
0x17c3   : > { %v2892_v35 = vsub.f32 %v7053_v28, %v2891_v34 }
0x17c5   : > { %v2893_v38 = vmul.f32 %v2892_v35, %v2892_v35 }
0x17c7   : > { %v2894_v39 = vsel %vm1157_vm6, %v2893_v38, 0.0 }
0x17c8   : > { %2895 = vadd.xlane.f32.xlu1 %v2894_v39 }
0x1851   : > { %v2896_v44 = vpop.xlane.xlu1 %2895 }
0x1852   : > { %v2897_v45 = vmul.f32 0.015625, %v2896_v44 }
0x1854   : > { %v2898_v46 = vadd.f32 1e-05, %v2897_v45 }
0x1856   : > { %5896 = vrsqrt.f32 %v2898_v46  ;;  %v5778_v46 = vld [vmem:[%s7500_s11 + $0x38] sm:$0xff]  }
0x1863   : > { %v5897_v48 = vpop.eup %5896 }
0x1864   : > { %v2900_v49 = vmul.f32 %v5897_v48, %v2892_v35  ;;  %v3101_v35 = vrot.slane %v7041_v11, %v6840_v22  ;;  %v5779_v11 = vld [vmem:[%s7500_s11 + $0x30] sm:$0xff]   ;;  %v5781_v48 = vld [vmem:[%s7500_s11 + $0x20] sm:$0xff]  }
0x1866   : > { %v2905_v50 = vmul.f32 %v2904_v47, %v2900_v49  ;;  %v5780_v47 = vld [vmem:[%s7500_s11 + $0x28] sm:$0xff]  }
0x1868   : > { %v2910_v51 = vadd.f32 %v2909_v32, %v2905_v50 }
0x186a   : > { %v2911_v52 = vpack.c.bf16 %v2910_v51, %v2910_v51  ;;  %v7133_v51 = vld [vmem:[#allocation10 + $0x18] sm:$0xff] }
0x186b   : > { %v3128_v57 = vrot.slane %v7133_v51, %v6731_v42 }
0x186c   : > { %5368 = vmatmul.mubr.msk.bf16.vlgmr.msra.gmra.mxu0 %vm1157_vm6, %v2911_v52  ;;  %v3123_v52 = vrot.slane %v7133_v51, %v6650_v59 }
0x186d   : > { %5391 = vmatprep.mubr.msk.bf16.mxu0 %vm6225_vm2, %v6224_v0  ;;  %5384 = vmatpush3.bf16.msra.mxu0 %v5778_v46 }
0x186e   : > { %5385 = vmatprep.subr.bf16.mxu0 %v6224_v0 }
0x1871   : > { %5386 = vmatpush3.bf16.msra.mxu0 %v5779_v11 }
0x1872   : > { %5387 = vmatprep.subr.bf16.mxu0 %v6224_v0 }
0x1875   : > { %5388 = vmatpush3.bf16.msra.mxu0 %v5780_v47  ;;  %v3317_v47 = vrot.slane %v7133_v51, %v6749_v13 }
0x1876   : > { %5389 = vmatprep.subr.bf16.mxu0 %v6224_v0 }
0x1879   : > { %5390 = vmatpush3.bf16.msra.mxu0 %v5781_v48 }
0x192c   : > { %v2985_v63 = vpop.f32.mrf.mxu0 }
0x192d   : > { %v2986_v1 = vadd.f32 %v2985_v63, %v2923_v62 }
0x192e   : > { %v5369_v4 = vpop.f32.mrf.mxu0 }
0x192f   : > { %v4931_v54 = vmul.f32 -1.442695, %v2986_v1  ;;  %v5783_v4 = vld [vmem:[%s7501_s12 + $0x30] sm:$0xff]  }
0x1930   : > { %v2988_v6 = vpop.f32.mrf.mxu0 }
0x1931   : > { %5898 = vpow2.f32 %v4931_v54  ;;  %v5784_v54 = vld [vmem:[%s7501_s12 + $0x28] sm:$0xff]   ;;  %v3143_v6 = vrot.slane %v7133_v51, %v6739_v55 }
0x1932   : > { %v5370_v7 = vpop.f32.mrf.mxu0 }
0x193e   : > { %v5899_v10 = vpop.eup %5898 }
0x193f   : > { %v2994_v8 = vadd.f32 1.0, %v5899_v10 }
0x1941   : > { %5900 = vrcp.f32 %v2994_v8 }
0x194e   : > { %v5901_v3 = vpop.eup %5900 }
0x194f   : > { %v2997_v58 = vmul.f32 %v5901_v3, %v2986_v1  ;;  %v5782_v1 = vld [vmem:[%s7501_s12 + $0x38] sm:$0xff]  }
0x1951   : > { %v2998_v5 = vpack.c.bf16 %v2997_v58, %v2997_v58 }
0x1953   : > { %5380 = vmatmul.mubr.msk.bf16.vlgmr.msra.gmra.mxu1 %vm1157_vm6, %v2998_v5 }
0x1954   : > { %5403 = vmatprep.mubr.msk.bf16.mxu1 %vm6225_vm2, %v6224_v0  ;;  %5396 = vmatpush3.bf16.msra.mxu1 %v5782_v1 }
0x1955   : > { %5397 = vmatprep.subr.bf16.mxu1 %v6224_v0 }
0x1958   : > { %5398 = vmatpush3.bf16.msra.mxu1 %v5783_v4 }
0x1959   : > { %5399 = vmatprep.subr.bf16.mxu1 %v6224_v0 }
0x195c   : > { %5400 = vmatpush3.bf16.msra.mxu1 %v5784_v54 }
0x195d   : > { %5401 = vmatprep.subr.bf16.mxu1 %v6224_v0 }
0x1a13   : > { %v3072_v16 = vpop.f32.mrf.mxu1 }
0x1a14   : > { %v3073_v17 = vadd.f32 %v3072_v16, %v3010_v15 }
0x1a15   : > { %v5381_v18 = vpop.f32.mrf.mxu1 }
0x1a16   : > { %v3078_v14 = vmul.f32 0.5, %v3073_v17 }
0x1a17   : > { %v3075_v19 = vpop.f32.mrf.mxu1 }
0x1a18   : > { %v3079_v20 = vadd.f32 %v3078_v14, %v7053_v28  ;;  %v3231_v19 = vrot.slane %v7133_v51, %v6746_v12 }
0x1a19   : > { %v5382_v9 = vpop.f32.mrf.mxu1 }
0x1a1a   : > { %v3080_v21 = vsel %vm1157_vm6, %v3079_v20, 0.0 }
0x1a1b   : > { %3081 = vadd.xlane.f32.xlu0 %v3080_v21 }
0x1aa4   : > { %v3082_v23 = vpop.xlane.xlu0 %3081 }
0x1aa5   : > { %v3083_v37 = vmul.f32 0.015625, %v3082_v23 }
0x1aa7   : > { %v3084_v25 = vsub.f32 %v3079_v20, %v3083_v37 }
0x1aa9   : > { %v3085_v26 = vmul.f32 %v3084_v25, %v3084_v25 }
0x1aab   : > { %v3086_v60 = vsel %vm1157_vm6, %v3085_v26, 0.0 }
0x1aac   : > { %3087 = vadd.xlane.f32.xlu1 %v3086_v60 }
0x1b35   : > { %v3088_v29 = vpop.xlane.xlu1 %3087 }
0x1b36   : > { %v3089_v30 = vmul.f32 0.015625, %v3088_v29 }
0x1b38   : > { %v3090_v31 = vadd.f32 1e-05, %v3089_v30 }
0x1b3a   : > { %5902 = vrsqrt.f32 %v3090_v31 }
0x1b47   : > { %v5903_v34 = vpop.eup %5902 }
0x1b48   : > { %v3092_v28 = vmul.f32 %v5903_v34, %v3084_v25 }
0x1b4a   : > { %v3097_v38 = vmul.f32 %v3096_v33, %v3092_v28  ;;  %v5788_v28 = vld [vmem:[%s7502_s13 + $0x74] ss:$8 sps:$4 sm:$0xff]  }
0x1b4b   : > { %3385 = vmatprep.subr.bf16.mxu0 %v5788_v28 }
0x1b4c   : > { %v7112_v39 = vadd.f32 %v3101_v35, %v3097_v38  ;;  %v5786_v35 = vld [vmem:[%s7502_s13 + $0x70] ss:$8 sps:$4 sm:$0xff]   ;;  %v5791_v38 = vld [vmem:[%s7502_s13 + $0x64] ss:$8 sps:$4 sm:$0xff]  }
0x1b4e   : > { %v3107_v2 = vsel %vm1157_vm6, %v7112_v39, 0.0 }
0x1b4f   : > { %3108 = vadd.xlane.f32.xlu0 %v3107_v2  ;;  %v5794_v2 = vld [vmem:[%s7502_s13 + $0x54] ss:$8 sps:$4 sm:$0xff]  }
0x1bd8   : > { %v3109_v40 = vpop.xlane.xlu0 %3108 }
0x1bd9   : > { %v3110_v41 = vmul.f32 0.015625, %v3109_v40  ;;  %v5792_v40 = vld [vmem:[%s7502_s13 + $0x50] ss:$8 sps:$4 sm:$0xff]  }
0x1bdb   : > { %v3111_v43 = vsub.f32 %v7112_v39, %v3110_v41  ;;  %v5797_v41 = vld [vmem:[%s7502_s13 + $0x44] ss:$8 sps:$4 sm:$0xff]  }
0x1bdd   : > { %v3112_v44 = vmul.f32 %v3111_v43, %v3111_v43 }
0x1bdf   : > { %v3113_v45 = vsel %vm1157_vm6, %v3112_v44, 0.0  ;;  %v5795_v44 = vld [vmem:[%s7502_s13 + $0x40] ss:$8 sps:$4 sm:$0xff]  }
0x1be0   : > { %3114 = vadd.xlane.f32.xlu1 %v3113_v45 }
0x1c69   : > { %v3115_v49 = vpop.xlane.xlu1 %3114 }
0x1c6a   : > { %v3116_v32 = vmul.f32 0.015625, %v3115_v49 }
0x1c6c   : > { %v3117_v50 = vadd.f32 1e-05, %v3116_v32  ;;  %v3322_v32 = vrot.slane %v7133_v51, %v6846_v27 }
0x1c6e   : > { %5904 = vrsqrt.f32 %v3117_v50 }
0x1c7b   : > { %v5905_v53 = vpop.eup %5904 }
0x1c7c   : > { %v3119_v56 = vmul.f32 %v5905_v53, %v3111_v43  ;;  %v3426_v43 = vrot.slane %v7133_v51, %v6840_v22 }
0x1c7e   : > { %v3124_v61 = vmul.f32 %v3123_v52, %v3119_v56  ;;  %v7206_v56 = vld [vmem:[#allocation10 + $0x20] sm:$0xff] }
0x1c80   : > { %v3129_v62 = vadd.f32 %v3128_v57, %v3124_v61  ;;  %v3421_v57 = vrot.slane %v7133_v51, %v6856_v36 }
0x1c82   : > { %v3130_v63 = vpack.c.bf16 %v3129_v62, %v3129_v62  ;;  %v3435_v62 = vrot.slane %v7206_v56, %v6650_v59 }
0x1c84   : > { %5392 = vmatmul.mubr.msk.bf16.vlgmr.msra.gmra.mxu0 %vm1157_vm6, %v3130_v63 }
0x1c85   : > { %3409 = vmatprep.mubr.bf16.mxu0 %v6229_v24  ;;  %v5785_v24 = vld [vmem:[%s7501_s12 + $0x20] sm:$0xff]   ;;  %3386 = vmatpush1.bf16.msra.mxu0 %v5786_v35 }
0x1c86   : > { %5402 = vmatpush3.bf16.msra.mxu1 %v5785_v24  ;;  %3387 = vmatprep.subr.bf16.mxu0 %v5791_v38 }
0x1c87   : > { %5407 = vmatprep.subr.bf16.mxu1 %v6224_v0 }
0x1d44   : > { %v3205_v7 = vpop.f32.mrf.mxu0 }
0x1d45   : > { %v3206_v10 = vadd.f32 %v3205_v7, %v3143_v6 }
0x1d46   : > { %v5393_v8 = vpop.f32.mrf.mxu0 }
0x1d47   : > { %v4950_v3 = vmul.f32 -1.442695, %v3206_v10 }
0x1d48   : > { %v3208_v58 = vpop.f32.mrf.mxu0 }
0x1d49   : > { %5906 = vpow2.f32 %v4950_v3 }
0x1d4a   : > { %v5394_v5 = vpop.f32.mrf.mxu0 }
0x1d56   : > { %v5907_v15 = vpop.eup %5906 }
0x1d57   : > { %v3214_v16 = vadd.f32 1.0, %v5907_v15 }
0x1d59   : > { %5908 = vrcp.f32 %v3214_v16 }
0x1d66   : > { %v5909_v17 = vpop.eup %5908 }
0x1d67   : > { %v3217_v18 = vmul.f32 %v5909_v17, %v3206_v10 }
0x1d69   : > { %v3218_v14 = vpack.c.bf16 %v3217_v18, %v3217_v18 }
0x1d6b   : > { %5404 = vmatmul.mubr.msk.bf16.vlgmr.msra.gmra.mxu1 %vm1157_vm6, %v3218_v14 }
0x1d6c   : > { %5409 = vmatprep.mubr.msk.bf16.mxu1 %vm6225_vm2, %v6224_v0 }
0x1e2b   : > { %v3293_v20 = vpop.f32.mrf.mxu1 }
0x1e2c   : > { %v3294_v9 = vadd.f32 %v3293_v20, %v3231_v19 }
0x1e2d   : > { %v5405_v21 = vpop.f32.mrf.mxu1 }
0x1e2e   : > { %v3299_v23 = vmul.f32 0.5, %v3294_v9 }
0x1e2f   : > { %v3296_v37 = vpop.f32.mrf.mxu1 }
0x1e30   : > { %v7165_v25 = vadd.f32 %v3299_v23, %v7112_v39  ;;  %v5789_v39 = vld [vmem:[%s7502_s13 + $0x60] ss:$8 sps:$4 sm:$0xff]  }
0x1e31   : > { %v5406_v26 = vpop.f32.mrf.mxu1  ;;  %3388 = vmatpush1.bf16.msra.mxu0 %v5789_v39 }
0x1e32   : > { %v3301_v60 = vsel %vm1157_vm6, %v7165_v25, 0.0  ;;  %3389 = vmatprep.subr.bf16.mxu0 %v5794_v2 }
0x1e33   : > { %3302 = vadd.xlane.f32.xlu0 %v3301_v60  ;;  %v5952_v60 = vld [vmem:[%s6900_s24] ss:$0 sm:$0xff] }
0x1e35   : > { %3390 = vmatpush1.bf16.msra.mxu0 %v5792_v40 }
0x1e36   : > { %3391 = vmatprep.subr.bf16.mxu0 %v5797_v41 }
0x1e39   : > { %3392 = vmatpush1.bf16.msra.mxu0 %v5795_v44 }
0x1e3a   : > { %5413 = vmatprep.subr.bf16.mxu0 %v6224_v0 }
0x1e49   : > { %3428 = vrot.lane.b32.xlu0 %v3426_v43, %s7579_s30 }
0x1ebc   : > { %v3303_v29 = vpop.xlane.xlu0 %3302 }
0x1ebd   : > { %v3304_v30 = vmul.f32 0.015625, %v3303_v29 }
0x1ebf   : > { %v3305_v31 = vsub.f32 %v7165_v25, %v3304_v30 }
0x1ec0   : > { %v3429_v61 = vpop.permute.xlu0 %3428 }
0x1ec1   : > { %v3306_v33 = vmul.f32 %v3305_v31, %v3305_v31 }
0x1ec3   : > { %v3307_v34 = vsel %vm1157_vm6, %v3306_v33, 0.0 }
0x1ec4   : > { %3308 = vadd.xlane.f32.xlu1 %v3307_v34 }
0x1f4d   : > { %v3309_v45 = vpop.xlane.xlu1 %3308 }
0x1f4e   : > { %v3310_v46 = vmul.f32 0.015625, %v3309_v45 }
0x1f50   : > { %v3311_v11 = vadd.f32 1e-05, %v3310_v46 }
0x1f52   : > { %5910 = vrsqrt.f32 %v3311_v11 }
0x1f5f   : > { %v5911_v48 = vpop.eup %5910 }
0x1f60   : > { %v3313_v49 = vmul.f32 %v5911_v48, %v3305_v31 }
0x1f62   : > { %v3318_v50 = vmul.f32 %v3317_v47, %v3313_v49 }
0x1f64   : > { %v3323_v52 = vadd.f32 %v3322_v32, %v3318_v50 }
0x1f66   : > { %v3324_v53 = vpack.c.bf16 %v3323_v52, %v3323_v52 }
0x1f68   : > { %4980 = vmatmul.mubr.msk.bf16.vlgmr.msra.gmra.mxu0 %vm1157_vm6, %v3324_v53 }
0x1f69   : > { %5415 = vmatprep.mubr.msk.bf16.mxu0 %vm6225_vm2, %v6224_v0 }
0x2028   : > { %v3411_v63 = vpop.f32.mrf.mxu0 }
0x2029   : > { %v3422_v1 = vadd.f32 %v3421_v57, %v3411_v63  ;;  %v3431_v4 = vadd.f32 %v3429_v61, %v3411_v63 }
0x202a   : > { %v3413_v54 = vpop.f32.mrf.mxu0 }
0x202b   : > { %v3437_v24 = vpack.c.bf16 %v3422_v1, %v3422_v1  ;;  %v3438_v6 = vpack.c.bf16 %v3431_v4, %v3431_v4  ;;  %v3436_v7 = vadd.f32 %v3435_v62, %v3413_v54 }
0x202c   : > { %v3415_v10 = vpop.f32.mrf.mxu0 }
0x202d   : > { %v7212_v8 = vpack.c.bf16 %v3436_v7, %v3436_v7  ;;  %3441 = vrot.lane.b32.xlu1 %v3438_v6, %s7579_s30  ;;  %3550 = vrot.lane.b32.xlu0 %v3437_v24, %s7580_s2 }
0x202e   : > { %v3416_v3 = vpop.f32.mrf.mxu0 }
0x202f   : > { %v3507_v51 = vsel %vm2054_vm7, %v7212_v8, 0 }
0x2030   : > { %5414 = vmatpush3.bf16.msra.mxu0 %v3507_v51 }
0x2031   : > { %3552 = vrot.lane.b32.xlu1 %v3438_v6, %s7581_s0  ;;  %3663 = vrot.lane.b32.xlu0 %v3437_v24, %s7582_s1 }
0x2032   : > { %5425 = vmatprep.subr.bf16.mxu0 %v6224_v0 }
0x2035   : > { %3665 = vrot.lane.b32.xlu1 %v3438_v6, %s7576_s29  ;;  %3775 = vrot.lane.b32.xlu0 %v3437_v24, %s7583_s5 }
0x2039   : > { %3777 = vrot.lane.b32.xlu1 %v3438_v6, %s7577_s23 }
0x209f   : > { %v3442_v58 = vpop.permute.xlu1 %3441  ;;  %v3551_v18 = vpop.permute.xlu0 %3550 }
0x20a0   : > { %v3447_v5 = vsel %vm872_vm3, %v3442_v58, 0 }
0x20a1   : > { %5408 = vmatpush3.bf16.xpose.msra.mxu1 %v3447_v5 }
0x20a2   : > { %5419 = vmatprep.subr.bf16.mxu1 %v6224_v0 }
0x20a3   : > { %v3553_v15 = vpop.permute.xlu1 %3552  ;;  %v3664_v20 = vpop.permute.xlu0 %3663 }
0x20a4   : > { %v3558_v16 = vsel %vm872_vm3, %v3553_v15, 0 }
0x20a7   : > { %v3666_v17 = vpop.permute.xlu1 %3665  ;;  %v3776_v21 = vpop.permute.xlu0 %3775 }
0x20a8   : > { %5410 = vmatmul.mubr.msk.bf16.vlgmr.msra.gmra.mxu1 %vm872_vm3, %v3437_v24  ;;  %v3671_v14 = vsel %vm872_vm3, %v3666_v17, 0 }
0x20a9   : > { %5420 = vmatpush3.bf16.xpose.msra.mxu1 %v3558_v16  ;;  %5421 = vmatprep.mubr.msk.bf16.mxu1 %vm6225_vm2, %v6224_v0 }
0x20aa   : > { %5431 = vmatprep.subr.bf16.mxu1 %v6224_v0 }
0x20ab   : > { %v3778_v19 = vpop.permute.xlu1 %3777 }
0x20ac   : > { %v3783_v9 = vsel %vm872_vm3, %v3778_v19, 0 }
0x20b0   : > { %5422 = vmatmul.mubr.msk.bf16.vlgmr.msra.gmra.mxu1 %vm872_vm3, %v3551_v18 }
0x20b1   : > { %5432 = vmatpush3.bf16.xpose.msra.mxu1 %v3671_v14  ;;  %5433 = vmatprep.mubr.msk.bf16.mxu1 %vm6225_vm2, %v6224_v0 }
0x20b2   : > { %5443 = vmatprep.subr.bf16.mxu1 %v6224_v0 }
0x20b8   : > { %5434 = vmatmul.mubr.msk.bf16.vlgmr.msra.gmra.mxu1 %vm872_vm3, %v3664_v20 }
0x20b9   : > { %5444 = vmatpush3.bf16.xpose.msra.mxu1 %v3783_v9  ;;  %5445 = vmatprep.mubr.msk.bf16.mxu1 %vm6225_vm2, %v6224_v0 }
0x20ba   : > { %5455 = vmatprep.subr.bf16.mxu1 %v6224_v0 }
0x20c0   : > { %5446 = vmatmul.mubr.msk.bf16.vlgmr.msra.gmra.mxu1 %vm872_vm3, %v3776_v21 }
0x20c1   : > { %5463 = vmatprep.mubr.msk.bf16.mxu1 %vm6225_vm2, %v6224_v0 }
0x2168   : > { %v3483_v23 = vpop.f32.mrf.mxu1 }
0x2169   : > { %v3489_v37 = vmul.f32 0.25, %v3483_v23 }
0x216a   : > { %v5411_v26 = vpop.f32.mrf.mxu1 }
0x216b   : > { %v3490_v29 = vadd.f32 %v5952_v60, %v3489_v37 }
0x216c   : > { %v3486_v30 = vpop.f32.mrf.mxu1 }
0x216d   : > { %v3491_v31 = vsel %vm2038_vm8, %v3490_v29, -inf }
0x216e   : > { %3492 = vmax.xlane.f32.xlu1 %v3491_v31  ;;  %v5412_v33 = vpop.f32.mrf.mxu1 }
0x2170   : > { %v3594_v34 = vpop.f32.mrf.mxu1 }
0x2171   : > { %v3600_v28 = vmul.f32 0.25, %v3594_v34 }
0x2172   : > { %v5423_v35 = vpop.f32.mrf.mxu1 }
0x2173   : > { %v3601_v38 = vadd.f32 %v5952_v60, %v3600_v28 }
0x2174   : > { %v3597_v39 = vpop.f32.mrf.mxu1 }
0x2175   : > { %v3602_v2 = vsel %vm2038_vm8, %v3601_v38, -inf }
0x2176   : > { %3603 = vmax.xlane.f32.xlu0 %v3602_v2  ;;  %v5424_v40 = vpop.f32.mrf.mxu1 }
0x2178   : > { %v3707_v41 = vpop.f32.mrf.mxu1 }
0x2179   : > { %v3713_v43 = vmul.f32 0.25, %v3707_v41 }
0x217a   : > { %v5435_v44 = vpop.f32.mrf.mxu1 }
0x217b   : > { %v3714_v45 = vadd.f32 %v5952_v60, %v3713_v43 }
0x217c   : > { %v3710_v46 = vpop.f32.mrf.mxu1 }
0x217d   : > { %v3715_v11 = vsel %vm2038_vm8, %v3714_v45, -inf }
0x217e   : > { %3716 = vmax.xlane.f32.xlu0 %v3715_v11  ;;  %v5436_v47 = vpop.f32.mrf.mxu1 }
0x217f   : > { %v5798_v47 = vld [vmem:[%s7503_s14 + $0x38] sm:$0xff]  }
0x2180   : > { %v3819_v48 = vpop.f32.mrf.mxu1  ;;  %5456 = vmatpush3.bf16.msra.mxu1 %v5798_v47 }
0x2181   : > { %v3825_v49 = vmul.f32 0.25, %v3819_v48  ;;  %5457 = vmatprep.subr.bf16.mxu1 %v6224_v0 }
0x2182   : > { %v5447_v32 = vpop.f32.mrf.mxu1 }
0x2183   : > { %v3826_v50 = vadd.f32 %v5952_v60, %v3825_v49  ;;  %v5799_v49 = vld [vmem:[%s7503_s14 + $0x30] sm:$0xff]  }
0x2184   : > { %v3822_v52 = vpop.f32.mrf.mxu1  ;;  %5458 = vmatpush3.bf16.msra.mxu1 %v5799_v49 }
0x2185   : > { %v3827_v53 = vsel %vm2038_vm8, %v3826_v50, -inf  ;;  %v5800_v52 = vld [vmem:[%s7503_s14 + $0x28] sm:$0xff]   ;;  %5459 = vmatprep.subr.bf16.mxu1 %v6224_v0 }
0x2186   : > { %3828 = vmax.xlane.f32.xlu1 %v3827_v53  ;;  %v5448_v57 = vpop.f32.mrf.mxu1 }
0x2188   : > { %5460 = vmatpush3.bf16.msra.mxu1 %v5800_v52 }
0x2189   : > { %5461 = vmatprep.subr.bf16.mxu1 %v6224_v0 }
0x21f7   : > { %v3493_v61 = vpop.xlane.xlu1 %3492 }
0x21f8   : > { %v3494_v62 = vsub.f32 %v3490_v29, %v3493_v61 }
0x21fa   : > { %v3495_v63 = vmul.f32 1.442695, %v3494_v62 }
0x21fc   : > { %5912 = vpow2.f32 %v3495_v63 }
0x21ff   : > { %v3604_v1 = vpop.xlane.xlu0 %3603 }
0x2200   : > { %v3605_v4 = vsub.f32 %v3601_v38, %v3604_v1 }
0x2202   : > { %v3606_v54 = vmul.f32 1.442695, %v3605_v4  ;;  %v5801_v4 = vld [vmem:[%s7503_s14 + $0x20] sm:$0xff]  }
0x2203   : > { %5462 = vmatpush3.bf16.msra.mxu1 %v5801_v4 }
0x2204   : > { %5914 = vpow2.f32 %v3606_v54  ;;  %5479 = vmatprep.subr.bf16.mxu1 %v6224_v0 }
0x2207   : > { %v3717_v24 = vpop.xlane.xlu0 %3716 }
0x2208   : > { %v3718_v6 = vsub.f32 %v3714_v45, %v3717_v24 }
0x2209   : > { %v5913_v7 = vpop.eup %5912 }
0x220a   : > { %v3719_v10 = vmul.f32 1.442695, %v3718_v6  ;;  %v3497_v3 = vsel %vm2038_vm8, %v5913_v7, 0.0 }
0x220b   : > { %3498 = vadd.xlane.f32.xlu0 %v3497_v3 }
0x220c   : > { %5916 = vpow2.f32 %v3719_v10 }
0x220f   : > { %v3829_v16 = vpop.xlane.xlu1 %3828 }
0x2210   : > { %v3830_v17 = vsub.f32 %v3826_v50, %v3829_v16 }
0x2211   : > { %v5915_v51 = vpop.eup %5914 }
0x2212   : > { %v3608_v58 = vsel %vm2038_vm8, %v5915_v51, 0.0  ;;  %v3831_v18 = vmul.f32 1.442695, %v3830_v17  ;;  %v3983_v17 = vrot.slane %v7206_v56, %v6731_v42 }
0x2213   : > { %3609 = vadd.xlane.f32.xlu1 %v3608_v58 }
0x2214   : > { %5918 = vpow2.f32 %v3831_v18 }
0x2219   : > { %v5917_v5 = vpop.eup %5916 }
0x221a   : > { %v3721_v15 = vsel %vm2038_vm8, %v5917_v5, 0.0 }
0x221b   : > { %3722 = vadd.xlane.f32.xlu0 %v3721_v15 }
0x2221   : > { %v5919_v14 = vpop.eup %5918 }
0x2222   : > { %v3833_v19 = vsel %vm2038_vm8, %v5919_v14, 0.0 }
0x2224   : > { %3727 = vrot.lane.b32.xlu1 %v7212_v8, %s7582_s1 }
0x2231   : > { %3615 = vrot.lane.b32.xlu0 %v7212_v8, %s7580_s2  ;;  %s5067_s2 = sshll.u32 %s6371_s4, 7  ;;  %s6141_s4 = scalar_lea.vmem %s6140_s9, 256 }
0x2232   : > { %s4663_s24 = scalar_lea.hbm %s7511_s22, %s5067_s2 }
0x2248   : > { %3834 = vadd.xlane.f32.xlu1 %v3833_v19 }
0x2259   : > { %3839 = vrot.lane.b32.xlu1 %v7212_v8, %s7583_s5 }
0x2294   : > { %v3499_v20 = vpop.xlane.xlu0 %3498 }
0x2295   : > { %5920 = vrcp.f32 %v3499_v20 }
0x229c   : > { %v3610_v9 = vpop.xlane.xlu1 %3609 }
0x229d   : > { %5922 = vrcp.f32 %v3610_v9 }
0x22a0   : > { %v3728_v31 = vpop.permute.xlu1 %3727 }
0x22a1   : > { %v3733_v34 = vsel %vm2054_vm7, %v3728_v31, 0  ;;  %v5804_v31 = vld [vmem:[%s7504_s15 + $0x28] sm:$0xff]  }
0x22a2   : > { %v5921_v21 = vpop.eup %5920 }
0x22a3   : > { %v3501_v23 = vmul.f32 %v5921_v21, %v5913_v7 }
0x22a4   : > { %v3723_v37 = vpop.xlane.xlu0 %3722 }
0x22a5   : > { %5924 = vrcp.f32 %v3723_v37  ;;  %v3502_v26 = vpack.c.bf16 %v3501_v23, %v3501_v23 }
0x22a7   : > { %5416 = vmatmul.mubr.msk.bf16.vlgmr.msra.gmra.mxu0 %vm2038_vm8, %v3502_v26 }
0x22a8   : > { %v3616_v60 = vpop.permute.xlu0 %3615  ;;  %5427 = vmatprep.mubr.msk.bf16.mxu0 %vm6225_vm2, %v6224_v0 }
0x22a9   : > { %v3621_v29 = vsel %vm2054_vm7, %v3616_v60, 0 }
0x22aa   : > { %v5923_v30 = vpop.eup %5922  ;;  %5426 = vmatpush3.bf16.msra.mxu0 %v3621_v29 }
0x22ab   : > { %5437 = vmatprep.subr.bf16.mxu0 %v6224_v0  ;;  %v3612_v8 = vmul.f32 %v5923_v30, %v5915_v51 }
0x22ad   : > { %v3613_v33 = vpack.c.bf16 %v3612_v8, %v3612_v8  ;;  %v5803_v8 = vld [vmem:[%s7504_s15 + $0x30] sm:$0xff]  }
0x22af   : > { %5428 = vmatmul.mubr.msk.bf16.vlgmr.msra.gmra.mxu0 %vm2038_vm8, %v3613_v33  ;;  %v4093_v33 = vrot.slane %v7206_v56, %v6846_v27 }
0x22b0   : > { %5438 = vmatpush3.bf16.msra.mxu0 %v3733_v34  ;;  %5439 = vmatprep.mubr.msk.bf16.mxu0 %vm6225_vm2, %v6224_v0  ;;  %v5805_v34 = vld [vmem:[%s7504_s15 + $0x20] sm:$0xff]  }
0x22b1   : > { %5449 = vmatprep.subr.bf16.mxu0 %v6224_v0 }
0x22b2   : > { %v5925_v28 = vpop.eup %5924 }
0x22b3   : > { %v3725_v35 = vmul.f32 %v5925_v28, %v5917_v5 }
0x22b5   : > { %v3726_v38 = vpack.c.bf16 %v3725_v35, %v3725_v35 }
0x22b7   : > { %5440 = vmatmul.mubr.msk.bf16.vlgmr.msra.gmra.mxu0 %vm2038_vm8, %v3726_v38 }
0x22b8   : > { %5451 = vmatprep.mubr.msk.bf16.mxu0 %vm6225_vm2, %v6224_v0 }
0x22d1   : > { %v3835_v39 = vpop.xlane.xlu1 %3834 }
0x22d2   : > { %5926 = vrcp.f32 %v3835_v39  ;;  %v4001_v39 = vrot.slane %v7206_v56, %v6739_v55 }
0x22d5   : > { %v3840_v2 = vpop.permute.xlu1 %3839 }
0x22d6   : > { %v3845_v40 = vsel %vm2054_vm7, %v3840_v2, 0 }
0x22d7   : > { %5450 = vmatpush3.bf16.msra.mxu0 %v3845_v40 }
0x22d8   : > { %5467 = vmatprep.subr.bf16.mxu0 %v6224_v0 }
0x22df   : > { %v5927_v41 = vpop.eup %5926 }
0x22e0   : > { %v3837_v43 = vmul.f32 %v5927_v41, %v5919_v14  ;;  %v4006_v41 = vrot.slane %v7206_v56, %v6746_v12 }
0x22e2   : > { %v3838_v44 = vpack.c.bf16 %v3837_v43, %v3837_v43 }
0x22e4   : > { %5452 = vmatmul.mubr.msk.bf16.vlgmr.msra.gmra.mxu0 %vm2038_vm8, %v3838_v44 }
0x22e5   : > { %5475 = vmatprep.mubr.msk.bf16.mxu0 %vm6225_vm2, %v6224_v0 }
0x2367   : > { %v3543_v45 = vpop.f32.mrf.mxu0 }
0x2369   : > { %v5417_v46 = vpop.f32.mrf.mxu0 }
0x236b   : > { %v3546_v11 = vpop.f32.mrf.mxu0 }
0x236d   : > { %v5418_v48 = vpop.f32.mrf.mxu0 }
0x236f   : > { %v3657_v32 = vpop.f32.mrf.mxu0 }
0x2370   : > { %3888 = vrot.lane.b32.xlu0 %v3657_v32, %s7577_s23 }
0x2371   : > { %v5429_v50 = vpop.f32.mrf.mxu0 }
0x2373   : > { %v3660_v53 = vpop.f32.mrf.mxu0 }
0x2375   : > { %v5430_v57 = vpop.f32.mrf.mxu0 }
0x2377   : > { %v3769_v61 = vpop.f32.mrf.mxu0 }
0x2378   : > { %3892 = vrot.lane.b32.xlu1 %v3769_v61, %s7576_s29  ;;  %v4088_v61 = vrot.slane %v7206_v56, %v6749_v13 }
0x2379   : > { %v5441_v62 = vpop.f32.mrf.mxu0 }
0x237b   : > { %v3772_v63 = vpop.f32.mrf.mxu0 }
0x237c   : > { %v5016_v63 = vld [vmem:[%s7508_s19 + $0x10] sm:$0xff] }
0x237d   : > { %v5442_v1 = vpop.f32.mrf.mxu0 }
0x23a4   : > { %v3881_v54 = vpop.f32.mrf.mxu0 }
0x23a5   : > { %3896 = vrot.lane.b32.xlu0 %v3881_v54, %s7581_s0  ;;  %v4127_v54 = vrot.slane %v5016_v63, %v6731_v42 }
0x23a6   : > { %v5453_v24 = vpop.f32.mrf.mxu0 }
0x23a7   : > { %v4140_v24 = vrot.slane %v5016_v63, %v6739_v55 }
0x23a8   : > { %v3884_v6 = vpop.f32.mrf.mxu0 }
0x23a9   : > { %v4153_v6 = vrot.slane %v5016_v63, %v6746_v12 }
0x23aa   : > { %v5454_v7 = vpop.f32.mrf.mxu0 }
0x23e2   : > { %v3889_v10 = vpop.permute.xlu0 %3888 }
0x23e3   : > { %v3899_v51 = vsel %vm872_vm3, %v3543_v45, %v3889_v10  ;;  %v4166_v10 = vrot.slane %v5016_v63, %v6749_v13 }
0x23ea   : > { %v3893_v3 = vpop.permute.xlu1 %3892 }
0x23eb   : > { %v3900_v58 = vsel %vm879_vm4, %v3899_v51, %v3893_v3  ;;  %v4121_v3 = vrot.slane %v5016_v63, %v6650_v59 }
0x2417   : > { %v3897_v5 = vpop.permute.xlu0 %3896 }
0x2418   : > { %v3901_v15 = vsel %vm920_vm5, %v3900_v58, %v3897_v5  ;;  %v4179_v5 = vrot.slane %v5016_v63, %v6846_v27 }
0x2419   : > { %v3902_v16 = vpack.c.bf16 %v3901_v15, %v3901_v15 }
0x241b   : > { %5464 = vmatmul.mubr.msk.bf16.vlgmr.msra.gmra.mxu1 %vm1157_vm6, %v3902_v16 }
0x241c   : > { %5487 = vmatprep.mubr.msk.bf16.mxu1 %vm6225_vm2, %v6224_v0 }
0x24db   : > { %v3973_v18 = vpop.f32.mrf.mxu1 }
0x24dc   : > { %v3979_v14 = vadd.f32 %v3973_v18, %v7165_v25  ;;  %v5802_v25 = vld [vmem:[%s7504_s15 + $0x38] sm:$0xff]   ;;  %v4192_v18 = vrot.slane %v5016_v63, %v6856_v36 }
0x24dd   : > { %v5465_v19 = vpop.f32.mrf.mxu1  ;;  %5468 = vmatpush3.bf16.msra.mxu0 %v5802_v25 }
0x24de   : > { %v7305_v20 = vadd.f32 %v3983_v17, %v3979_v14  ;;  %5469 = vmatprep.subr.bf16.mxu0 %v6224_v0 }
0x24df   : > { %v3976_v9 = vpop.f32.mrf.mxu1 }
0x24e0   : > { %v3985_v21 = vsel %vm1157_vm6, %v7305_v20, 0.0 }
0x24e1   : > { %3986 = vadd.xlane.f32.xlu1 %v3985_v21  ;;  %v5466_v23 = vpop.f32.mrf.mxu1  ;;  %5470 = vmatpush3.bf16.msra.mxu0 %v5803_v8 }
0x24e2   : > { %5471 = vmatprep.subr.bf16.mxu0 %v6224_v0 }
0x24e5   : > { %5472 = vmatpush3.bf16.msra.mxu0 %v5804_v31 }
0x24e6   : > { %5473 = vmatprep.subr.bf16.mxu0 %v6224_v0 }
0x24e9   : > { %5474 = vmatpush3.bf16.msra.mxu0 %v5805_v34 }
0x24ea   : > { %5491 = vmatprep.subr.bf16.mxu0 %v6224_v0 }
0x256a   : > { %v3987_v37 = vpop.xlane.xlu1 %3986 }
0x256b   : > { %v3988_v26 = vmul.f32 0.015625, %v3987_v37 }
0x256d   : > { %v3989_v60 = vsub.f32 %v7305_v20, %v3988_v26 }
0x256f   : > { %v3990_v29 = vmul.f32 %v3989_v60, %v3989_v60 }
0x2571   : > { %v3991_v30 = vsel %vm1157_vm6, %v3990_v29, 0.0 }
0x2572   : > { %3992 = vadd.xlane.f32.xlu0 %v3991_v30 }
0x2588   : > { %4095 = vrot.lane.b32.xlu0 %v4093_v33, %s7579_s30 }
0x25fb   : > { %v3993_v28 = vpop.xlane.xlu0 %3992 }
0x25fc   : > { %v3994_v35 = vmul.f32 0.015625, %v3993_v28  ;;  %v4205_v28 = vrot.slane %v5016_v63, %v6840_v22  ;;  %v5018_v63 = vld [vmem:[%s7508_s19 + $0x18] ss:$0 sm:$0xff] }
0x25fe   : > { %v3995_v38 = vadd.f32 1e-05, %v3994_v35 }
0x25ff   : > { %v4096_v46 = vpop.permute.xlu0 %4095 }
0x2600   : > { %5928 = vrsqrt.f32 %v3995_v38 }
0x260d   : > { %v5929_v2 = vpop.eup %5928 }
0x260e   : > { %v3997_v40 = vmul.f32 %v5929_v2, %v3989_v60 }
0x2610   : > { %v4002_v43 = vmul.f32 %v4001_v39, %v3997_v40 }
0x2612   : > { %v4007_v44 = vadd.f32 %v4006_v41, %v4002_v43 }
0x2614   : > { %v4008_v45 = vpack.c.bf16 %v4007_v44, %v4007_v44 }
0x2616   : > { %5476 = vmatmul.mubr.msk.bf16.vlgmr.msra.gmra.mxu0 %vm1157_vm6, %v4008_v45 }
0x2617   : > { %5499 = vmatprep.mubr.msk.bf16.mxu0 %vm6225_vm2, %v6224_v0 }
0x26d6   : > { %v4079_v11 = vpop.f32.mrf.mxu0 }
0x26d7   : > { %v4098_v47 = vadd.f32 %v4096_v46, %v4079_v11  ;;  %v4089_v62 = vadd.f32 %v4088_v61, %v4079_v11 }
0x26d8   : > { %v5477_v48 = vpop.f32.mrf.mxu0 }
0x26d9   : > { %v5015_v49 = vmul.f32 -1.442695, %v4098_v47 }
0x26da   : > { %v4082_v32 = vpop.f32.mrf.mxu0 }
0x26db   : > { %5930 = vpow2.f32 %v5015_v49 }
0x26dc   : > { %v5478_v50 = vpop.f32.mrf.mxu0 }
0x26e8   : > { %v5931_v52 = vpop.eup %5930 }
0x26e9   : > { %v4102_v53 = vadd.f32 1.0, %v5931_v52 }
0x26eb   : > { %5932 = vrcp.f32 %v4102_v53 }
0x26f8   : > { %v5933_v57 = vpop.eup %5932 }
0x26f9   : > { %4106 = vrot.lane.b32.xlu1 %v5933_v57, %s7579_s30  ;;  %s781_s30 = sand.u32 1, %s6203_s28  }
0x26fa   : > { %s4820_s23 = sshll.u32 %s781_s30, 3  ;;  %s4652_s27 = scalar_lea.sflag [#allocation4], %s781_s30 }
0x26fb   : > { %s783_s29 = scalar_lea.vmem [#allocation14], %s4820_s23 }
0x26fc   : > { %s4665_s0 = sshll.u32 %s783_s29, 4  ;;  %s4666_s0 = int_to_ptr.vmem [resolvable:$true] %s4665_s0 }
0x26fd   : > { %s6135_s20 = scalar_lea.vmem %s4666_s0, 128  ;;  %p6142_p1 = scmp.lt.s32.totalorder %s4666_s0, %s6140_s9 }
0x26fe   : > { %p6136_p5 = scmp.ne.s32.totalorder %s4666_s0, %s6135_s20  ;;  %p6143_p2 = scmp.lt.s32.totalorder %s6141_s4, %s6135_s20 }
0x2700   : > { %p6137_p10 = pnand %p6136_p5, %p7584_p6  ;;  %p6144_p13 = por %p6143_p2, %p6142_p1 }
0x2702   : > { %p6138_p0 = pneg %p6137_p10 }
0x2704   : > { %p6145_p3 = pnand %p6144_p13, %p6138_p0 }
0x276b   : > { %v4107_v1 = vpop.permute.xlu1 %4106 }
0x276c   : > { %v4109_v4 = vmul.f32 %v4107_v1, %v4089_v62 }
0x276e   : > { %v4111_v7 = vrot.slane %v4109_v4, 4 }
0x2770   : > { %v4113_v51 = vsel %vm2054_vm7, 0.0, %v4111_v7  ;;  %v4114_v58 = vsel %vm2054_vm7, %v4111_v7, 0.0  ;;  %v4224_v7 = vrot.slane %v7206_v56, %v6856_v36 }
0x2771   : > { %v4128_v15 = vmul.f32 %v4127_v54, %v4113_v51  ;;  %v4129_v16 = vmul.f32 %v4127_v54, %v4114_v58  ;;  %v4141_v17 = vmul.f32 %v4140_v24, %v4113_v51  ;;  %v4142_v14 = vmul.f32 %v4140_v24, %v4114_v58 }
0x2772   : > { %v4154_v19 = vmul.f32 %v4153_v6, %v4113_v51  ;;  %v4155_v9 = vmul.f32 %v4153_v6, %v4114_v58  ;;  %v4167_v21 = vmul.f32 %v4166_v10, %v4113_v51  ;;  %v4168_v60 = vmul.f32 %v4166_v10, %v4114_v58 }
0x2773   : > { %v4132_v23 = vrot.slane %v4128_v15, 1  ;;  %v4133_v37 = vrot.slane %v4129_v16, 1  ;;  %v4145_v26 = vrot.slane %v4141_v17, 2  ;;  %v4122_v29 = vmul.f32 %v4121_v3, %v4113_v51 }
0x2774   : > { %v4146_v30 = vrot.slane %v4142_v14, 2  ;;  %v4158_v25 = vrot.slane %v4154_v19, 3  ;;  %v4159_v8 = vrot.slane %v4155_v9, 3  ;;  %v4180_v33 = vmul.f32 %v4179_v5, %v4113_v51  ;;  %v5806_v14 = vld [vmem:[%s7505_s16 + $0x38] sm:$0xff]   ;;  %v5808_v19 = vld [vmem:[%s7505_s16 + $0x28] sm:$0xff]   ;;  %v5809_v9 = vld [vmem:[%s7505_s16 + $0x20] sm:$0xff]  }
0x2775   : > { %v4134_v31 = vsel %vm808_vm0, %v4132_v23, %v4133_v37  ;;  %v4181_v34 = vmul.f32 %v4179_v5, %v4114_v58  ;;  %v4171_v38 = vrot.slane %v4167_v21, 4  ;;  %v4172_v2 = vrot.slane %v4168_v60, 4  ;;  %5480 = vmatpush3.bf16.msra.mxu1 %v5806_v14 }
0x2776   : > { %v4136_v35 = vadd.f32 %v4134_v31, %v4122_v29  ;;  %v4147_v39 = vsel %vm840_vm1, %v4145_v26, %v4146_v30  ;;  %v4193_v40 = vmul.f32 %v4192_v18, %v4113_v51  ;;  %v4194_v41 = vmul.f32 %v4192_v18, %v4114_v58  ;;  %5481 = vmatprep.subr.bf16.mxu1 %v6224_v0  ;;  %v7383_v26 = vld [vmem:[#allocation10 + $0x28] sm:$0xff] }
0x2777   : > { %v4160_v44 = vsel %vm2704_vm9, %v4158_v25, %v4159_v8  ;;  %v4184_v45 = vrot.slane %v4180_v33, 5  ;;  %v4185_v46 = vrot.slane %v4181_v34, 5  ;;  %v4206_v11 = vmul.f32 %v4205_v28, %v4113_v51 }
0x2778   : > { %v4149_v43 = vadd.f32 %v4147_v39, %v4136_v35  ;;  %v4207_v47 = vmul.f32 %v4205_v28, %v4114_v58  ;;  %v4173_v49 = vsel %vm2054_vm7, %v4171_v38, %v4172_v2  ;;  %v4197_v32 = vrot.slane %v4193_v40, 6 }
0x2779   : > { %v4198_v50 = vrot.slane %v4194_v41, 6  ;;  %v4186_v53 = vsel %vm2731_vm10, %v4184_v45, %v4185_v46  ;;  %v4210_v57 = vrot.slane %v4206_v11, 7  ;;  %v4219_v6 = vmul.f32 %v5018_v63, %v4114_v58  ;;  %v5807_v58 = vld [vmem:[%s7505_s16 + $0x30] sm:$0xff]  }
0x277a   : > { %v4162_v48 = vadd.f32 %v4160_v44, %v4149_v43  ;;  %v4211_v61 = vrot.slane %v4207_v47, 7  ;;  %5482 = vmatpush3.bf16.msra.mxu1 %v5807_v58  ;;  %v4242_v60 = vrot.slane %v7206_v56, %v6840_v22  ;;  %v4247_v25 = vrot.slane %v7383_v26, %v6650_v59 }
0x277b   : > { %v4199_v1 = vsel %vm2745_vm11, %v4197_v32, %v4198_v50  ;;  %5483 = vmatprep.subr.bf16.mxu1 %v6224_v0  ;;  %v4337_v56 = vrot.slane %v7383_v26, %v6731_v42  ;;  %v5810_v42 = vld [vmem:[%s7506_s17 + $0x38] sm:$0xff]   ;;  %v5812_v32 = vld [vmem:[%s7506_s17 + $0x28] sm:$0xff]   ;;  %v5813_v50 = vld [vmem:[%s7506_s17 + $0x20] sm:$0xff]  }
0x277c   : > { %v4175_v52 = vadd.f32 %v4173_v49, %v4162_v48  ;;  %v4212_v54 = vsel %vm2759_vm12, %v4210_v57, %v4211_v61  ;;  %5492 = vmatpush3.bf16.msra.mxu0 %v5810_v42  ;;  %v4355_v61 = vrot.slane %v7383_v26, %v6739_v55  ;;  %v5815_v55 = vld [vmem:[%s7507_s18 + $0x30] sm:$0xff]  }
0x277d   : > { %5493 = vmatprep.subr.bf16.mxu0 %v6224_v0 }
0x277e   : > { %v4188_v62 = vadd.f32 %v4186_v53, %v4175_v52  ;;  %5484 = vmatpush3.bf16.msra.mxu1 %v5808_v19 }
0x277f   : > { %5485 = vmatprep.subr.bf16.mxu1 %v6224_v0 }
0x2780   : > { %v4201_v4 = vadd.f32 %v4199_v1, %v4188_v62  ;;  %v4360_v1 = vrot.slane %v7383_v26, %v6746_v12  ;;  %v5816_v12 = vld [vmem:[%s7507_s18 + $0x28] sm:$0xff]  }
0x2782   : > { %v4214_v24 = vadd.f32 %v4212_v54, %v4201_v4  ;;  %5486 = vmatpush3.bf16.msra.mxu1 %v5809_v9 }
0x2783   : > { %5503 = vmatprep.subr.bf16.mxu1 %v6224_v0 }
0x2784   : > { %v4220_v10 = vadd.f32 %v4219_v6, %v4214_v24  ;;  %v5814_v6 = vld [vmem:[%s7507_s18 + $0x38] sm:$0xff]  }
0x2786   : > { %v4225_v3 = vadd.f32 %v4224_v7, %v4220_v10  ;;  %v5817_v7 = vld [vmem:[%s7507_s18 + $0x20] sm:$0xff]   ;;  %v4375_v10 = vrot.slane %v7383_v26, %v6749_v13 }
0x2788   : > { %v4226_v51 = vsel %vm1157_vm6, %v4225_v3, 0.0 }
0x2789   : > { %4227 = vadd.xlane.f32.xlu1 %v4226_v51 }
0x2812   : > { %v4228_v5 = vpop.xlane.xlu1 %4227 }
0x2813   : > { %v4229_v15 = vmul.f32 0.015625, %v4228_v5 }
0x2815   : > { %v4230_v16 = vsub.f32 %v4225_v3, %v4229_v15 }
0x2817   : > { %v4231_v17 = vmul.f32 %v4230_v16, %v4230_v16 }
0x2819   : > { %v4232_v18 = vsel %vm1157_vm6, %v4231_v17, 0.0 }
0x281a   : > { %4233 = vadd.xlane.f32.xlu0 %v4232_v18 }
0x28a3   : > { %v4234_v21 = vpop.xlane.xlu0 %4233 }
0x28a4   : > { %v4235_v23 = vmul.f32 0.015625, %v4234_v21  ;;  %v4463_v21 = vrot.slane %v7383_v26, %v6846_v27  ;;  %v5819_v27 = vld [vmem:[#allocation11 + $0x10] sm:$0xff]  }
0x28a6   : > { %v4236_v37 = vadd.f32 1e-05, %v4235_v23 }
0x28a8   : > { %5934 = vrsqrt.f32 %v4236_v37 }
0x28b5   : > { %v5935_v29 = vpop.eup %5934 }
0x28b6   : > { %v4238_v30 = vmul.f32 %v5935_v29, %v4230_v16 }
0x28b8   : > { %v4243_v8 = vmul.f32 %v4242_v60, %v4238_v30 }
0x28ba   : > { %v4248_v31 = vadd.f32 %v4247_v25, %v4243_v8 }
0x28bc   : > { %v5019_v33 = vmul.f32 -1.442695, %v4248_v31 }
0x28be   : > { %5936 = vpow2.f32 %v5019_v33 }
0x28cb   : > { %v5937_v34 = vpop.eup %5936 }
0x28cc   : > { %v4252_v28 = vadd.f32 1.0, %v5937_v34 }
0x28ce   : > { %5938 = vrcp.f32 %v4252_v28 }
0x28db   : > { %v5939_v35 = vpop.eup %5938 }
0x28dc   : > { %v4255_v38 = vmul.f32 %v5939_v35, %v4248_v31 }
0x28de   : > { %v4256_v39 = vpack.c.bf16 %v4255_v38, %v4255_v38  ;;  %v5818_v38 = vld [vmem:[#allocation11 + $0x18] sm:$0xff]  }
0x28e0   : > { %5488 = vmatmul.mubr.msk.bf16.vlgmr.msra.gmra.mxu1 %vm1157_vm6, %v4256_v39  ;;  %v5820_v39 = vld [vmem:[#allocation11 + $0x8] sm:$0xff]  }
0x28e1   : > { %5511 = vmatprep.mubr.msk.bf16.mxu1 %vm6225_vm2, %v6224_v0  ;;  %5504 = vmatpush3.bf16.msra.mxu1 %v5814_v6 }
0x28e2   : > { %5505 = vmatprep.subr.bf16.mxu1 %v6224_v0 }
0x28e5   : > { %5506 = vmatpush3.bf16.msra.mxu1 %v5815_v55 }
0x28e6   : > { %5507 = vmatprep.subr.bf16.mxu1 %v6224_v0 }
0x28e9   : > { %5508 = vmatpush3.bf16.msra.mxu1 %v5816_v12 }
0x28ea   : > { %5509 = vmatprep.subr.bf16.mxu1 %v6224_v0 }
0x28ed   : > { %5510 = vmatpush3.bf16.msra.mxu1 %v5817_v7 }
0x29a0   : > { %v4327_v2 = vpop.f32.mrf.mxu1 }
0x29a1   : > { %v4333_v59 = vadd.f32 %v4327_v2, %v7305_v20  ;;  %v5811_v20 = vld [vmem:[%s7506_s17 + $0x30] sm:$0xff]  }
0x29a2   : > { %v5489_v40 = vpop.f32.mrf.mxu1  ;;  %5494 = vmatpush3.bf16.msra.mxu0 %v5811_v20 }
0x29a3   : > { %v7395_v41 = vadd.f32 %v4337_v56, %v4333_v59  ;;  %5495 = vmatprep.subr.bf16.mxu0 %v6224_v0  ;;  %v5821_v56 = vld [vmem:[#allocation11] sm:$0xff]  }
0x29a4   : > { %v4330_v43 = vpop.f32.mrf.mxu1 }
0x29a5   : > { %v4339_v44 = vsel %vm1157_vm6, %v7395_v41, 0.0 }
0x29a6   : > { %4340 = vadd.xlane.f32.xlu0 %v4339_v44  ;;  %v5490_v45 = vpop.f32.mrf.mxu1  ;;  %5496 = vmatpush3.bf16.msra.mxu0 %v5812_v32 }
0x29a7   : > { %5497 = vmatprep.subr.bf16.mxu0 %v6224_v0  ;;  %v4554_v45 = vrot.slane %v7383_v26, %v6840_v22 }
0x29aa   : > { %5498 = vmatpush3.bf16.msra.mxu0 %v5813_v50 }
0x29ab   : > { %5515 = vmatprep.subr.bf16.mxu0 %v6224_v0 }
0x2a2f   : > { %v4341_v46 = vpop.xlane.xlu0 %4340 }
0x2a30   : > { %v4342_v11 = vmul.f32 0.015625, %v4341_v46 }
0x2a32   : > { %v4343_v47 = vsub.f32 %v7395_v41, %v4342_v11 }
0x2a34   : > { %v4344_v48 = vmul.f32 %v4343_v47, %v4343_v47 }
0x2a36   : > { %v4345_v49 = vsel %vm1157_vm6, %v4344_v48, 0.0 }
0x2a37   : > { %4346 = vadd.xlane.f32.xlu1 %v4345_v49 }
0x2ac0   : > { %v4347_v52 = vpop.xlane.xlu1 %4346 }
0x2ac1   : > { %v4348_v53 = vmul.f32 0.015625, %v4347_v52 }
0x2ac3   : > { %v4349_v57 = vadd.f32 1e-05, %v4348_v53 }
0x2ac5   : > { %5940 = vrsqrt.f32 %v4349_v57 }
0x2ad2   : > { %v5941_v62 = vpop.eup %5940 }
0x2ad3   : > { %v4351_v63 = vmul.f32 %v5941_v62, %v4343_v47 }
0x2ad5   : > { %v4356_v4 = vmul.f32 %v4355_v61, %v4351_v63 }
0x2ad7   : > { %v4361_v54 = vadd.f32 %v4360_v1, %v4356_v4 }
0x2ad9   : > { %v4362_v24 = vpack.c.bf16 %v4361_v54, %v4361_v54 }
0x2adb   : > { %5500 = vmatmul.mubr.msk.bf16.vlgmr.msra.gmra.mxu0 %vm1157_vm6, %v4362_v24 }
0x2adc   : > { %5523 = vmatprep.mubr.msk.bf16.mxu0 %vm6225_vm2, %v6224_v0  ;;  %5516 = vmatpush3.bf16.msra.mxu0 %v5818_v38 }
0x2add   : > { %5517 = vmatprep.subr.bf16.mxu0 %v6224_v0 }
0x2ae0   : > { %5518 = vmatpush3.bf16.msra.mxu0 %v5819_v27 }
0x2ae1   : > { %5519 = vmatprep.subr.bf16.mxu0 %v6224_v0 }
0x2ae4   : > { %5520 = vmatpush3.bf16.msra.mxu0 %v5820_v39 }
0x2ae5   : > { %5521 = vmatprep.subr.bf16.mxu0 %v6224_v0  ;;  %v5060_v0 = vld [vmem:[#allocation13] ss:$0 sm:$0xff] }
0x2ae8   : > { %5522 = vmatpush3.bf16.msra.mxu0 %v5821_v56 }
0x2b9b   : > { %v4437_v3 = vpop.f32.mrf.mxu0 }
0x2b9c   : > { %v4438_v51 = vadd.f32 %v4437_v3, %v4375_v10 }
0x2b9d   : > { %v5501_v5 = vpop.f32.mrf.mxu0 }
0x2b9e   : > { %v5046_v15 = vmul.f32 -1.442695, %v4438_v51 }
0x2b9f   : > { %v4440_v16 = vpop.f32.mrf.mxu0 }
0x2ba0   : > { %5942 = vpow2.f32 %v5046_v15 }
0x2ba1   : > { %v5502_v17 = vpop.f32.mrf.mxu0 }
0x2bad   : > { %v5943_v18 = vpop.eup %5942 }
0x2bae   : > { %v4446_v14 = vadd.f32 1.0, %v5943_v18 }
0x2bb0   : > { %5944 = vrcp.f32 %v4446_v14 }
0x2bbd   : > { %v5945_v58 = vpop.eup %5944 }
0x2bbe   : > { %v4449_v19 = vmul.f32 %v5945_v58, %v4438_v51 }
0x2bc0   : > { %v4450_v9 = vpack.c.bf16 %v4449_v19, %v4449_v19 }
0x2bc2   : > { %5512 = vmatmul.mubr.msk.bf16.vlgmr.msra.gmra.mxu1 %vm1157_vm6, %v4450_v9 }
0x2c82   : > { %v4525_v23 = vpop.f32.mrf.mxu1 }
0x2c83   : > { %v4526_v13 = vadd.f32 %v4525_v23, %v4463_v21 }
0x2c84   : > { %v5513_v37 = vpop.f32.mrf.mxu1 }
0x2c85   : > { %v4531_v60 = vmul.f32 0.5, %v4526_v13 }
0x2c86   : > { %v4528_v29 = vpop.f32.mrf.mxu1 }
0x2c87   : > { %v4532_v30 = vadd.f32 %v4531_v60, %v7395_v41  ;;  %v4549_v41 = vrot.slane %v7383_v26, %v6856_v36 }
0x2c88   : > { %v5514_v25 = vpop.f32.mrf.mxu1 }
0x2c89   : > { %v4533_v8 = vsel %vm1157_vm6, %v4532_v30, 0.0 }
0x2c8a   : > { %4534 = vadd.xlane.f32.xlu0 %v4533_v8 }
0x2d13   : > { %v4535_v31 = vpop.xlane.xlu0 %4534 }
0x2d14   : > { %v4536_v33 = vmul.f32 0.015625, %v4535_v31 }
0x2d16   : > { %v4537_v34 = vsub.f32 %v4532_v30, %v4536_v33 }
0x2d18   : > { %v4538_v28 = vmul.f32 %v4537_v34, %v4537_v34 }
0x2d1a   : > { %v4539_v35 = vsel %vm1157_vm6, %v4538_v28, 0.0 }
0x2d1b   : > { %4540 = vadd.xlane.f32.xlu1 %v4539_v35 }
0x2da4   : > { %v4541_v2 = vpop.xlane.xlu1 %4540 }
0x2da5   : > { %v4542_v59 = vmul.f32 0.015625, %v4541_v2 }
0x2da7   : > { %v4543_v40 = vadd.f32 1e-05, %v4542_v59 }
0x2da9   : > { %5946 = vrsqrt.f32 %v4543_v40 }
0x2db6   : > { %v5947_v43 = vpop.eup %5946 }
0x2db7   : > { %v4545_v44 = vmul.f32 %v5947_v43, %v4537_v34 }
0x2db9   : > { %v4550_v46 = vmul.f32 %v4549_v41, %v4545_v44 }
0x2dbb   : > { %v4555_v11 = vadd.f32 %v4554_v45, %v4550_v46 }
0x2dbd   : > { %v4556_v47 = vpack.c.bf16 %v4555_v11, %v4555_v11 }
0x2dbf   : > { %5524 = vmatmul.mubr.msk.bf16.vlgmr.msra.gmra.mxu0 %vm1157_vm6, %v4556_v47 }
0x2e7f   : > { %v4633_v48 = vpop.f32.mrf.mxu0 }
0x2e80   : > { %v4634_v49 = vadd.f32 %v5060_v0, %v4633_v48 }
0x2e81   : > { %v5525_v42 = vpop.f32.mrf.mxu0 }
0x2e82   : > { %4639 = vmax.xlane.f32.xlu0 %v4634_v49 }
0x2e83   : > { %v4636_v20 = vpop.f32.mrf.mxu0 }
0x2e85   : > { %v5526_v32 = vpop.f32.mrf.mxu0 }
0x2f0b   : > { %v4640_v36 = vpop.xlane.xlu0 %4639 }
0x2f0c   : > { %v4641_v50 = vsub.f32 %v4634_v49, %v4640_v36 }
0x2f0e   : > { %v4642_v52 = vmul.f32 1.442695, %v4641_v50 }
0x2f10   : > { %5948 = vpow2.f32 %v4642_v52 }
0x2f1d   : > { %v5949_v53 = vpop.eup %5948 }
0x2f1e   : > { %4644 = vadd.xlane.f32.xlu1 %v5949_v53 }
0x2fa7   : > { %v4645_v22 = vpop.xlane.xlu1 %4644 }
0x2fa8   : > { %5950 = vlog2.f32 %v4645_v22 }
0x2fb5   : > { %v5951_v26 = vpop.eup %5950 }
0x2fb6   : > { %v4647_v57 = vmul.f32 0.6931472, %v5951_v26 }
0x2fb8   : > { %v4648_v61 = vadd.f32 %v4647_v57, %v4640_v36 }
0x2fba   : > { %v4649_v62 = vsub.f32 %v4634_v49, %v4648_v61 }
0x2fbc   : > { %4650 = vst [vmem:[%s783_s29] sm:$0xff] %v4649_v62 }
0x2fbd   : > { %6148 = shalt.err (!%p6145_p3)
}
0x2fbe   : > { %s6149_s3 = scalar_lea.hbm %s4663_s24, 128  ;;  %s6153_s2 = scalar_lea.hbm %s7511_s22, 256 }
0x2fbf   : > { %p6150_p4 = scmp.ne.s32.totalorder %s4663_s24, %s6149_s3  ;;  %p6154_p9 = scmp.lt.s32.totalorder %s4663_s24, %s7511_s22 }
0x2fc0   : > { %p6155_p8 = scmp.lt.s32.totalorder %s6153_s2, %s6149_s3 }
0x2fc1   : > { %p6151_p7 = pnand %p6150_p4, %p7584_p6 }
0x2fc2   : > { %p6156_p11 = por %p6155_p8, %p6154_p9 }
0x2fc3   : > { %p6152_p12 = pneg %p6151_p7 }
0x2fc5   : > { %p6157_p5 = pnand %p6156_p11, %p6152_p12 }
0x2fc7   : > { %6160 = shalt.err (!%p6157_p5)
}
0x2fc8   : > { %5556 = dma.vmem_to_hbm [thread:$0]  (%p7584_p6), %s4666_s0, 128, %s4663_s24, %s4652_s27  }
0x2fc9 PF: > { %s7585_s5 = sld [smem:[#allocation22_spill]] }
0x2fca   : > { %s7586_s20 = sld [smem:[#allocation20_spill]] }
0x2fcb   : > { %s7587_s26 = sld [smem:[#allocation25_spill]] }
0x2fcf   : > { %p5598_p10 = scmp.ge.s32.totalorder %s7585_s5, 2 }
0x2fd0   : > { %s4677_s9 = sand.u32 1, %s7586_s20  }
0x2fd1   : > { %p7588_p0 = scmp.ne.s32.totalorder %s7587_s26, 0  ;;  %s4678_s4 = scalar_lea.sflag [#allocation4], %s4677_s9 }
0x2fd3   : > { %p5581_p1 = pnand %p5598_p10, %p7588_p0 }
0x2fd5   : > { %p5582_p2 = pneg %p5581_p1 }
0x2fd7   : > { %6194 = dma.done.wait (%p5582_p2), %s4678_s4, 128  }
0x2fd8   : > { %6196 = vsyncadd (%p5582_p2), %s4678_s4, 4294967168  ;;  %s7589_s30 = sld [smem:[#allocation23_spill]]  ;;  %s7592_s3 = smov %s6203_s28 }
0x2fd9   : > { %s7590_s23 = sld [smem:[#allocation21_spill]] }
0x2fda   : > { %s7591_s29 = sld [smem:[#allocation24_spill]] }
0x2fde   : > { %p36_p13 = scmp.ge.s32.totalorder %s7589_s30, 4  }
0x2fdf   : > { %s7593_s28 = smov %s7590_s23 }
0x2fe0   :  { %38 = sbr.rel (!%p36_p13) target bundleno = 17 (0x11), region = 185 }
0x2fe5   :  { %4683 = vsyncpa [#allocation3], 1 }
0x2fe6   :  { %4685 = vsyncpa [#allocation3 + $0x1], 1 }
0x2fe7   :  { %4686 = vsyncpa [#allocation6], 1 }
0x2fe8   :  { %4687 = vsyncpa [#allocation9], 1 }
0x2fe9   :  { %4688 = vsyncpa [#allocation12], 1 }
0x2fea   :  { %4689 = vsyncpa [#allocation4], 1 }
0x2feb   :  { %4691 = vsyncpa [#allocation4 + $0x1], 1 }

</bundles_post_ra>
